<compile_context>
chip_gen: v6e
topology: v6e:2x2x1
jax: 0.10.0
libtpu: 0.0.40
codegen_flags: <defaults>
</compile_context>

<pallas_src>
import functools

import jax
import jax.numpy as jnp
from jax.experimental import pallas as pl
from jax.experimental.pallas import tpu as pltpu


def _round_up(x, m):
    return ((x + m - 1) // m) * m


# ----------------------------------------------------------------------------
# Pallas kernels
# ----------------------------------------------------------------------------

def _conv_mm_base_kernel(x_ref, w_ref, b_ref, o_ref, *, relu):
    # (TS, K)bf16 @ (K, N)bf16 + (1, N)f32  -> (TS, N)f32 on the MXU
    acc = jnp.dot(x_ref[0], w_ref[...], preferred_element_type=jnp.float32)
    acc = acc + b_ref[...]
    if relu:
        acc = jnp.maximum(acc, 0.0)
    o_ref[0] = acc.astype(o_ref.dtype)


def _conv_mm_fpa_kernel(x_ref, w_ref, b_ref, g_ref, o_ref):
    # FPA fuse: relu(conv1x1(x) + broadcast global-context branch)
    acc = jnp.dot(x_ref[0], w_ref[...], preferred_element_type=jnp.float32)
    acc = acc + b_ref[...] + g_ref[0]          # g_ref[0]: (1, N) broadcast
    o_ref[0] = jnp.maximum(acc, 0.0).astype(o_ref.dtype)


def _conv_mm_gau_kernel(x_ref, w_ref, b_ref, g_ref, a_ref, o_ref):
    # GAU fuse: relu(conv3x3(low)) * channel-attention + upsampled high path
    acc = jnp.dot(x_ref[0], w_ref[...], preferred_element_type=jnp.float32)
    acc = jnp.maximum(acc + b_ref[...], 0.0)
    o_ref[0] = (acc * g_ref[0] + a_ref[0]).astype(o_ref.dtype)


def conv_matmul(x_bhk, w_kn, b_n, *, relu=False, gate=None, add=None):
    """Batched, row-tiled matmul with fused bias + activation epilogues.

    x_bhk : (B, HW, K)   im2col patches
    w_kn  : (K, N)       weights
    b_n   : (N,)         bias
    gate  : optional (B, 1, N)   per-(batch, channel) broadcast term
    add   : optional (B, HW, N)  per-row residual term

      gate=None, add=None : y = act(x @ w + b)
      gate only           : y = relu(x @ w + b + gate)          (FPA fuse)
      gate and add        : y = relu(x @ w + b) * gate + add    (GAU fuse)
    """
    B, HW, K = x_bhk.shape
    K2, N = w_kn.shape
    assert K == K2, (K, K2)

    TS = min(1024, _round_up(HW, 8))      # big row tile; multiple of 8
    ns = pl.cdiv(HW, TS)                  # ragged last block, no pad copy

    x_bhk = x_bhk.astype(jnp.bfloat16)    # bf16 operands, f32 accumulation
    w_kn = w_kn.astype(jnp.bfloat16)
    b2 = b_n.reshape(1, N).astype(jnp.float32)

    in_specs = [
        pl.BlockSpec((1, TS, K), lambda b, s: (b, s, 0)),
        pl.BlockSpec((K, N), lambda b, s: (0, 0)),
        pl.BlockSpec((1, N), lambda b, s: (0, 0)),
    ]
    args = [x_bhk, w_kn, b2]

    if gate is not None and add is not None:
        kernel = _conv_mm_gau_kernel
        in_specs += [
            pl.BlockSpec((1, 1, N), lambda b, s: (b, 0, 0)),
            pl.BlockSpec((1, TS, N), lambda b, s: (b, s, 0)),
        ]
        args += [gate.astype(jnp.float32), add.astype(jnp.float32)]
    elif gate is not None:
        kernel = _conv_mm_fpa_kernel
        in_specs += [pl.BlockSpec((1, 1, N), lambda b, s: (b, 0, 0))]
        args += [gate.astype(jnp.float32)]
    else:
        kernel = functools.partial(_conv_mm_base_kernel, relu=relu)

    return pl.pallas_call(
        kernel,
        out_shape=jax.ShapeDtypeStruct((B, HW, N), jnp.float32),
        grid_spec=pltpu.PrefetchScalarGridSpec(
            num_scalar_prefetch=0,
            grid=(B, ns),
            in_specs=in_specs,
            out_specs=pl.BlockSpec((1, TS, N), lambda b, s: (b, s, 0)),
        ),
        compiler_params=pltpu.CompilerParams(
            dimension_semantics=("parallel", "parallel"),
            # Generation-safe ceiling (< v7x 64 MiB physical); per-tile usage
            # here is only a few MiB even double-buffered.
            vmem_limit_bytes=48 * 1024 * 1024,
        ),
    )(*args)


def _gap_kernel(x_ref, o_ref, *, hw, ts):
    # Tiled global average pool: accumulate partial sums into the resident
    # (1,1,C) output block, masking the ragged last HW tile.
    s = pl.program_id(1)

    @pl.when(s == 0)
    def _():
        o_ref[...] = jnp.zeros_like(o_ref)

    rows = jax.lax.broadcasted_iota(jnp.int32, x_ref.shape, 1)   # (1, TS, C)
    valid = (s * ts + rows) < hw
    o_ref[...] += jnp.sum(jnp.where(valid, x_ref[...], 0.0), axis=1,
                          keepdims=True)

    @pl.when(s == pl.num_programs(1) - 1)
    def _():
        o_ref[...] *= (1.0 / hw)


def global_avg_pool(x_bsc):
    """x: (B, H*W, C) -> (B, 1, C), tiled over the spatial axis."""
    B, HW, C = x_bsc.shape
    TS = min(1024, _round_up(HW, 8))
    ns = pl.cdiv(HW, TS)
    return pl.pallas_call(
        functools.partial(_gap_kernel, hw=HW, ts=TS),
        out_shape=jax.ShapeDtypeStruct((B, 1, C), jnp.float32),
        grid_spec=pltpu.PrefetchScalarGridSpec(
            num_scalar_prefetch=0,
            grid=(B, ns),
            in_specs=[pl.BlockSpec((1, TS, C), lambda b, s: (b, s, 0))],
            out_specs=pl.BlockSpec((1, 1, C), lambda b, s: (b, 0, 0)),
        ),
        compiler_params=pltpu.CompilerParams(
            dimension_semantics=("parallel", "arbitrary")),
    )(x_bsc.astype(jnp.float32))


# ----------------------------------------------------------------------------
# Plain-JAX glue: im2col, conv wrapper, tiny dense, upsampling, params
# ----------------------------------------------------------------------------

def im2col(x_nhwc, kh, kw, stride, pad):
    """Returns (B, Ho*Wo, kh*kw*C) patches (same dtype as x), Ho, Wo."""
    B, H, W, C = x_nhwc.shape
    if kh == 1 and kw == 1 and stride == 1 and pad == 0:
        return x_nhwc.reshape(B, H * W, C), H, W
    xp = jnp.pad(x_nhwc, ((0, 0), (pad, pad), (pad, pad), (0, 0)))
    Ho = (H + 2 * pad - kh) // stride + 1
    Wo = (W + 2 * pad - kw) // stride + 1
    cols = []
    for dy in range(kh):
        for dx in range(kw):
            cols.append(xp[:, dy:dy + stride * Ho:stride,
                           dx:dx + stride * Wo:stride, :])
    patches = jnp.concatenate(cols, axis=-1)            # (B, Ho, Wo, kh*kw*C)
    return patches.reshape(B, Ho * Wo, kh * kw * C), Ho, Wo


def conv2d(x_nhwc, w, b, stride=1, pad=0, relu=False, gate=None, add=None):
    """w: (kh, kw, Cin, Cout); hot path runs in the Pallas conv_matmul kernel."""
    kh, kw, cin, cout = w.shape
    B = x_nhwc.shape[0]
    # build the 9x-expanded patches matrix in bf16 to halve its HBM footprint
    patches, Ho, Wo = im2col(x_nhwc.astype(jnp.bfloat16), kh, kw, stride, pad)
    if add is not None:
        add = add.reshape(B, Ho * Wo, cout)
    y = conv_matmul(patches, w.reshape(kh * kw * cin, cout), b,
                    relu=relu, gate=gate, add=add)
    return y.reshape(B, Ho, Wo, cout)


def dense_small(x, w, b, relu=False):
    # Tiny (B, K) @ (K, N) attention/global matmuls: a Pallas call would be
    # pure launch/DMA overhead, so let XLA fuse them.
    y = jnp.dot(x, w, preferred_element_type=jnp.float32) + b
    return jnp.maximum(y, 0.0) if relu else y


def upsample_to(x_nhwc, H, W):
    # TODO(synk): smp.PAN uses F.interpolate(bilinear); done in plain JAX (not Pallas).
    B, _, _, C = x_nhwc.shape
    return jax.image.resize(x_nhwc, (B, H, W, C), method="bilinear")


def init_conv(key, kh, kw, cin, cout):
    fan_in = kh * kw * cin
    w = jax.random.normal(key, (kh, kw, cin, cout), jnp.float32) * (2.0 / fan_in) ** 0.5
    b = jnp.zeros((cout,), jnp.float32)
    return w, b


def init_params(key, in_channels=3, classes=11, dec=32):
    ks = jax.random.split(key, 10)
    return {
        "enc1":     init_conv(ks[0], 3, 3, in_channels, 16),
        "enc2":     init_conv(ks[1], 3, 3, 16, 24),
        "enc3":     init_conv(ks[2], 3, 3, 24, 40),
        "fpa_mid":  init_conv(ks[3], 1, 1, 40, dec),
        "fpa_glob": init_conv(ks[4], 1, 1, 40, dec),
        "gau1_low": init_conv(ks[5], 3, 3, 24, dec),
        "gau1_att": init_conv(ks[6], 1, 1, dec, dec),
        "gau2_low": init_conv(ks[7], 3, 3, 16, dec),
        "gau2_att": init_conv(ks[8], 1, 1, dec, dec),
        "head":     init_conv(ks[9], 1, 1, dec, classes),
    }


def gau_block(low, high, w_low, w_att):
    """Global Attention Upsample (simplified).  Gating fused into the conv."""
    B, Hl, Wl, _ = low.shape
    _, Hh, Wh, Ch = high.shape
    dec = w_low[0].shape[-1]

    gap_h = global_avg_pool(high.reshape(B, Hh * Wh, Ch))               # (B,1,Ch)
    att = dense_small(gap_h.reshape(B, Ch),
                      w_att[0].reshape(Ch, w_att[0].shape[-1]),
                      w_att[1], relu=True)                              # (B,dec)
    high_up = upsample_to(high, Hl, Wl)                                 # (B,Hl,Wl,dec)

    # fused: relu(conv3x3(low)) * att + high_up
    out = conv2d(low, *w_low, stride=1, pad=1, relu=True,
                 gate=att.reshape(B, 1, dec), add=high_up)
    return out                                                          # (B,Hl,Wl,dec)


def pan_forward(params, x_nchw):
    """x_nchw: (B, 3, H, W) float32  ->  {'out': (B, classes, H, W)}"""
    x = jnp.transpose(x_nchw, (0, 2, 3, 1))                             # NCHW -> NHWC

    # --- encoder (efficientnet-b0 stand-in) ---
    f1 = conv2d(x,  *params["enc1"], stride=2, pad=1, relu=True)        # 1/2, 16ch
    f2 = conv2d(f1, *params["enc2"], stride=2, pad=1, relu=True)        # 1/4, 24ch
    f3 = conv2d(f2, *params["enc3"], stride=2, pad=1, relu=True)        # 1/8, 40ch

    # --- FPA (simplified): local 1x1 branch + global-context branch (fused) ---
    B, H3, W3, C3 = f3.shape
    dec = params["fpa_mid"][0].shape[-1]
    gap3 = global_avg_pool(f3.reshape(B, H3 * W3, C3))                  # (B,1,C3)
    glob = dense_small(gap3.reshape(B, C3),
                       params["fpa_glob"][0].reshape(C3, dec),
                       params["fpa_glob"][1], relu=False)               # (B,dec)
    fpa = conv2d(f3, *params["fpa_mid"], stride=1, pad=0,
                 gate=glob.reshape(B, 1, dec))                          # relu(mid+glob)

    # --- GAU decoder blocks ---
    d2 = gau_block(f2, fpa, params["gau1_low"], params["gau1_att"])     # 1/4
    d1 = gau_block(f1, d2,  params["gau2_low"], params["gau2_att"])     # 1/2

    # --- segmentation head + upsample to input resolution ---
    logits = conv2d(d1, *params["head"], stride=1, pad=0, relu=False)   # (B,H/2,W/2,classes)
    H, W = x.shape[1], x.shape[2]
    logits = upsample_to(logits, H, W)                                  # (B,H,W,classes)
    out = jnp.transpose(logits, (0, 3, 1, 2))                           # NHWC -> NCHW
    return {"out": out}


if __name__ == "__main__":
    B, C_IN, H, W, CLASSES = 2, 3, 32, 32, 11
    x = jax.random.normal(jax.random.PRNGKey(0), (B, C_IN, H, W), jnp.float32)
    params = init_params(jax.random.PRNGKey(42), in_channels=C_IN, classes=CLASSES)

    fwd = jax.jit(pan_forward)
    result = fwd(params, x)
    out = jax.block_until_ready(result["out"])

    assert out.shape == (B, CLASSES, H, W), out.shape
    assert out.dtype == jnp.float32
    assert bool(jnp.all(jnp.isfinite(out)))
    print("KERNEL_OK")
</pallas_src>

<mosaic_0001>
module attributes {stable_mosaic.version = 11 : i64} {
  func.func @_conv_mm_base_kernel(%arg0: i32, %arg1: i32, %arg2: memref<1x256x27xbf16, #tpu.memory_space<vmem>>, %arg3: memref<27x16xbf16, #tpu.memory_space<vmem>>, %arg4: memref<1x16xf32, #tpu.memory_space<vmem>>, %arg5: memref<1x256x16xf32, #tpu.memory_space<vmem>>) attributes {dimension_semantics = [#tpu.dimension_semantics<parallel>, #tpu.dimension_semantics<parallel>], iteration_bounds = array<i64: 2, 1>, scalar_prefetch = 0 : i64, scratch_operands = 0 : i64, tpu.core_type = #tpu.core_type<tc>, window_params = [{transform_indices = @transform_0, window_bounds = array<i64: 1, 256, 27>}, {pipeline_mode = #tpu.pipeline_mode<synchronous>, transform_indices = @transform_1, window_bounds = array<i64: 27, 16>}, {pipeline_mode = #tpu.pipeline_mode<synchronous>, transform_indices = @transform_2, window_bounds = array<i64: 1, 16>}, {transform_indices = @transform_3, window_bounds = array<i64: 1, 256, 16>}]} {
    %c0 = arith.constant 0 : index
    %c0_0 = arith.constant 0 : index
    %c0_1 = arith.constant 0 : index
    %0 = vector.load %arg2[%c0, %c0_0, %c0_1] : memref<1x256x27xbf16, #tpu.memory_space<vmem>>, vector<1x256x27xbf16>
    %1 = vector.shape_cast %0 : vector<1x256x27xbf16> to vector<256x27xbf16>
    %c0_2 = arith.constant 0 : index
    %c0_3 = arith.constant 0 : index
    %2 = vector.load %arg3[%c0_2, %c0_3] : memref<27x16xbf16, #tpu.memory_space<vmem>>, vector<27x16xbf16>
    %cst = arith.constant dense<0.000000e+00> : vector<256x16xf32>
    %3 = tpu.matmul %1, %2, %cst {dimension_numbers = #tpu.dot_dimension_numbers<[1], [0], [0], [1], [0, 0, 1, 1], [], []>} : vector<256x27xbf16>, vector<27x16xbf16>, vector<256x16xf32> -> vector<256x16xf32>
    %c0_4 = arith.constant 0 : index
    %c0_5 = arith.constant 0 : index
    %4 = vector.load %arg4[%c0_4, %c0_5] : memref<1x16xf32, #tpu.memory_space<vmem>>, vector<1x16xf32>
    %5 = vector.broadcast %4 : vector<1x16xf32> to vector<256x16xf32>
    %6 = arith.addf %3, %5 : vector<256x16xf32>
    %cst_6 = arith.constant 0.000000e+00 : f32
    %7 = vector.broadcast %cst_6 : f32 to vector<256x16xf32>
    %8 = arith.maximumf %6, %7 : vector<256x16xf32>
    %c0_7 = arith.constant 0 : index
    %c0_8 = arith.constant 0 : index
    %c0_9 = arith.constant 0 : index
    %9 = vector.load %arg5[%c0_7, %c0_8, %c0_9] : memref<1x256x16xf32, #tpu.memory_space<vmem>>, vector<1x256x16xf32>
    %10 = vector.shape_cast %9 : vector<1x256x16xf32> to vector<256x16xf32>
    %11 = vector.shape_cast %8 : vector<256x16xf32> to vector<1x256x16xf32>
    tpu.vector_store %arg5[%c0_7, %c0_8, %c0_9], %11 {strides = array<i32>} : memref<1x256x16xf32, #tpu.memory_space<vmem>>, vector<1x256x16xf32>,
    return
  }
  func.func @transform_0(%arg0: i32, %arg1: i32) -> (i32, i32, i32) {
    %c0_i32 = arith.constant 0 : i32
    %c0_i32_0 = arith.constant 0 : i32
    return %arg0, %arg1, %c0_i32 : i32, i32, i32
  }
  func.func @transform_1(%arg0: i32, %arg1: i32) -> (i32, i32) {
    %c0_i32 = arith.constant 0 : i32
    %c0_i32_0 = arith.constant 0 : i32
    %c0_i32_1 = arith.constant 0 : i32
    return %c0_i32, %c0_i32_0 : i32, i32
  }
  func.func @transform_2(%arg0: i32, %arg1: i32) -> (i32, i32) {
    %c0_i32 = arith.constant 0 : i32
    %c0_i32_0 = arith.constant 0 : i32
    %c0_i32_1 = arith.constant 0 : i32
    return %c0_i32, %c0_i32_0 : i32, i32
  }
  func.func @transform_3(%arg0: i32, %arg1: i32) -> (i32, i32, i32) {
    %c0_i32 = arith.constant 0 : i32
    %c0_i32_0 = arith.constant 0 : i32
    return %arg0, %arg1, %c0_i32 : i32, i32, i32
  }
}

module attributes {stable_mosaic.version = 11 : i64} {
  func.func @_conv_mm_base_kernel(%arg0: i32, %arg1: i32, %arg2: memref<1x64x144xbf16, #tpu.memory_space<vmem>>, %arg3: memref<144x24xbf16, #tpu.memory_space<vmem>>, %arg4: memref<1x24xf32, #tpu.memory_space<vmem>>, %arg5: memref<1x64x24xf32, #tpu.memory_space<vmem>>) attributes {dimension_semantics = [#tpu.dimension_semantics<parallel>, #tpu.dimension_semantics<parallel>], iteration_bounds = array<i64: 2, 1>, scalar_prefetch = 0 : i64, scratch_operands = 0 : i64, tpu.core_type = #tpu.core_type<tc>, window_params = [{transform_indices = @transform_0, window_bounds = array<i64: 1, 64, 144>}, {pipeline_mode = #tpu.pipeline_mode<synchronous>, transform_indices = @transform_1, window_bounds = array<i64: 144, 24>}, {pipeline_mode = #tpu.pipeline_mode<synchronous>, transform_indices = @transform_2, window_bounds = array<i64: 1, 24>}, {transform_indices = @transform_3, window_bounds = array<i64: 1, 64, 24>}]} {
    %c0 = arith.constant 0 : index
    %c0_0 = arith.constant 0 : index
    %c0_1 = arith.constant 0 : index
    %0 = vector.load %arg2[%c0, %c0_0, %c0_1] : memref<1x64x144xbf16, #tpu.memory_space<vmem>>, vector<1x64x144xbf16>
    %1 = vector.shape_cast %0 : vector<1x64x144xbf16> to vector<64x144xbf16>
    %c0_2 = arith.constant 0 : index
    %c0_3 = arith.constant 0 : index
    %2 = vector.load %arg3[%c0_2, %c0_3] : memref<144x24xbf16, #tpu.memory_space<vmem>>, vector<144x24xbf16>
    %cst = arith.constant dense<0.000000e+00> : vector<64x24xf32>
    %3 = tpu.matmul %1, %2, %cst {dimension_numbers = #tpu.dot_dimension_numbers<[1], [0], [0], [1], [0, 0, 1, 1], [], []>} : vector<64x144xbf16>, vector<144x24xbf16>, vector<64x24xf32> -> vector<64x24xf32>
    %c0_4 = arith.constant 0 : index
    %c0_5 = arith.constant 0 : index
    %4 = vector.load %arg4[%c0_4, %c0_5] : memref<1x24xf32, #tpu.memory_space<vmem>>, vector<1x24xf32>
    %5 = vector.broadcast %4 : vector<1x24xf32> to vector<64x24xf32>
    %6 = arith.addf %3, %5 : vector<64x24xf32>
    %cst_6 = arith.constant 0.000000e+00 : f32
    %7 = vector.broadcast %cst_6 : f32 to vector<64x24xf32>
    %8 = arith.maximumf %6, %7 : vector<64x24xf32>
    %c0_7 = arith.constant 0 : index
    %c0_8 = arith.constant 0 : index
    %c0_9 = arith.constant 0 : index
    %9 = vector.load %arg5[%c0_7, %c0_8, %c0_9] : memref<1x64x24xf32, #tpu.memory_space<vmem>>, vector<1x64x24xf32>
    %10 = vector.shape_cast %9 : vector<1x64x24xf32> to vector<64x24xf32>
    %11 = vector.shape_cast %8 : vector<64x24xf32> to vector<1x64x24xf32>
    tpu.vector_store %arg5[%c0_7, %c0_8, %c0_9], %11 {strides = array<i32>} : memref<1x64x24xf32, #tpu.memory_space<vmem>>, vector<1x64x24xf32>,
    return
  }
  func.func @transform_0(%arg0: i32, %arg1: i32) -> (i32, i32, i32) {
    %c0_i32 = arith.constant 0 : i32
    %c0_i32_0 = arith.constant 0 : i32
    return %arg0, %arg1, %c0_i32 : i32, i32, i32
  }
  func.func @transform_1(%arg0: i32, %arg1: i32) -> (i32, i32) {
    %c0_i32 = arith.constant 0 : i32
    %c0_i32_0 = arith.constant 0 : i32
    %c0_i32_1 = arith.constant 0 : i32
    return %c0_i32, %c0_i32_0 : i32, i32
  }
  func.func @transform_2(%arg0: i32, %arg1: i32) -> (i32, i32) {
    %c0_i32 = arith.constant 0 : i32
    %c0_i32_0 = arith.constant 0 : i32
    %c0_i32_1 = arith.constant 0 : i32
    return %c0_i32, %c0_i32_0 : i32, i32
  }
  func.func @transform_3(%arg0: i32, %arg1: i32) -> (i32, i32, i32) {
    %c0_i32 = arith.constant 0 : i32
    %c0_i32_0 = arith.constant 0 : i32
    return %arg0, %arg1, %c0_i32 : i32, i32, i32
  }
}

module attributes {stable_mosaic.version = 11 : i64} {
  func.func @_gap_kernel(%arg0: i32, %arg1: i32, %arg2: memref<1x16x40xf32, #tpu.memory_space<vmem>>, %arg3: memref<1x1x40xf32, #tpu.memory_space<vmem>>) attributes {dimension_semantics = [#tpu.dimension_semantics<parallel>, #tpu.dimension_semantics<arbitrary>], iteration_bounds = array<i64: 2, 1>, scalar_prefetch = 0 : i64, scratch_operands = 0 : i64, tpu.core_type = #tpu.core_type<tc>, window_params = [{transform_indices = @transform_0, window_bounds = array<i64: 1, 16, 40>}, {transform_indices = @transform_1, window_bounds = array<i64: 1, 1, 40>}]} {
    %c0_i32 = arith.constant 0 : i32
    %0 = arith.cmpi eq, %arg1, %c0_i32 : i32
    %1 = arith.extui %0 : i1 to i32
    %c0_i32_0 = arith.constant 0 : i32
    %2 = arith.cmpi ne, %1, %c0_i32_0 : i32
    scf.if %2 {
      %cst_13 = arith.constant 0.000000e+00 : f32
      %20 = vector.broadcast %cst_13 : f32 to vector<1x1x40xf32>
      %c0_14 = arith.constant 0 : index
      %c0_15 = arith.constant 0 : index
      %c0_16 = arith.constant 0 : index
      %21 = vector.load %arg3[%c0_14, %c0_15, %c0_16] : memref<1x1x40xf32, #tpu.memory_space<vmem>>, vector<1x1x40xf32>
      tpu.vector_store %arg3[%c0_14, %c0_15, %c0_16], %20 {strides = array<i32>} : memref<1x1x40xf32, #tpu.memory_space<vmem>>, vector<1x1x40xf32>,
    } else {
    }
    %3 = tpu.iota {dimensions = array<i32: 1>} : vector<1x16x40xi32>
    %c16_i32 = arith.constant 16 : i32
    %4 = arith.muli %arg1, %c16_i32 : i32
    %5 = vector.broadcast %4 : i32 to vector<1x16x40xi32>
    %6 = arith.addi %5, %3 : vector<1x16x40xi32>
    %c16_i32_1 = arith.constant 16 : i32
    %7 = vector.broadcast %c16_i32_1 : i32 to vector<1x16x40xi32>
    %8 = arith.cmpi slt, %6, %7 : vector<1x16x40xi32>
    %c0 = arith.constant 0 : index
    %c0_2 = arith.constant 0 : index
    %c0_3 = arith.constant 0 : index
    %9 = vector.load %arg3[%c0, %c0_2, %c0_3] : memref<1x1x40xf32, #tpu.memory_space<vmem>>, vector<1x1x40xf32>
    %c0_4 = arith.constant 0 : index
    %c0_5 = arith.constant 0 : index
    %c0_6 = arith.constant 0 : index
    %10 = vector.load %arg2[%c0_4, %c0_5, %c0_6] : memref<1x16x40xf32, #tpu.memory_space<vmem>>, vector<1x16x40xf32>
    %cst = arith.constant 0.000000e+00 : f32
    %11 = vector.broadcast %cst : f32 to vector<1x16x40xf32>
    %12 = arith.select %8, %10, %11 : vector<1x16x40xi1>, vector<1x16x40xf32>
    %cst_7 = arith.constant dense<0.000000e+00> : vector<1x40xf32>
    %13 = vector.multi_reduction <add>, %12, %cst_7 [1] : vector<1x16x40xf32> to vector<1x40xf32>
    %14 = vector.shape_cast %13 : vector<1x40xf32> to vector<1x1x40xf32>
    %15 = arith.addf %9, %14 : vector<1x1x40xf32>
    %c0_8 = arith.constant 0 : index
    %c0_9 = arith.constant 0 : index
    %c0_10 = arith.constant 0 : index
    %16 = vector.load %arg3[%c0_8, %c0_9, %c0_10] : memref<1x1x40xf32, #tpu.memory_space<vmem>>, vector<1x1x40xf32>
    tpu.vector_store %arg3[%c0_8, %c0_9, %c0_10], %15 {strides = array<i32>} : memref<1x1x40xf32, #tpu.memory_space<vmem>>, vector<1x1x40xf32>,
    %c0_i32_11 = arith.constant 0 : i32
    %17 = arith.cmpi eq, %arg1, %c0_i32_11 : i32
    %18 = arith.extui %17 : i1 to i32
    %c0_i32_12 = arith.constant 0 : i32
    %19 = arith.cmpi ne, %18, %c0_i32_12 : i32
    scf.if %19 {
      %c0_13 = arith.constant 0 : index
      %c0_14 = arith.constant 0 : index
      %c0_15 = arith.constant 0 : index
      %20 = vector.load %arg3[%c0_13, %c0_14, %c0_15] : memref<1x1x40xf32, #tpu.memory_space<vmem>>, vector<1x1x40xf32>
      %cst_16 = arith.constant 6.250000e-02 : f32
      %21 = vector.broadcast %cst_16 : f32 to vector<1x1x40xf32>
      %22 = arith.mulf %20, %21 : vector<1x1x40xf32>
      %c0_17 = arith.constant 0 : index
      %c0_18 = arith.constant 0 : index
      %c0_19 = arith.constant 0 : index
      %23 = vector.load %arg3[%c0_17, %c0_18, %c0_19] : memref<1x1x40xf32, #tpu.memory_space<vmem>>, vector<1x1x40xf32>
      tpu.vector_store %arg3[%c0_17, %c0_18, %c0_19], %22 {strides = array<i32>} : memref<1x1x40xf32, #tpu.memory_space<vmem>>, vector<1x1x40xf32>,
    } else {
    }
    return
  }
  func.func @transform_0(%arg0: i32, %arg1: i32) -> (i32, i32, i32) {
    %c0_i32 = arith.constant 0 : i32
    %c0_i32_0 = arith.constant 0 : i32
    return %arg0, %arg1, %c0_i32 : i32, i32, i32
  }
  func.func @transform_1(%arg0: i32, %arg1: i32) -> (i32, i32, i32) {
    %c0_i32 = arith.constant 0 : i32
    %c0_i32_0 = arith.constant 0 : i32
    %c0_i32_1 = arith.constant 0 : i32
    return %arg0, %c0_i32, %c0_i32_0 : i32, i32, i32
  }
}

module attributes {stable_mosaic.version = 11 : i64} {
  func.func @_conv_mm_base_kernel(%arg0: i32, %arg1: i32, %arg2: memref<1x16x216xbf16, #tpu.memory_space<vmem>>, %arg3: memref<216x40xbf16, #tpu.memory_space<vmem>>, %arg4: memref<1x40xf32, #tpu.memory_space<vmem>>, %arg5: memref<1x16x40xf32, #tpu.memory_space<vmem>>) attributes {dimension_semantics = [#tpu.dimension_semantics<parallel>, #tpu.dimension_semantics<parallel>], iteration_bounds = array<i64: 2, 1>, scalar_prefetch = 0 : i64, scratch_operands = 0 : i64, tpu.core_type = #tpu.core_type<tc>, window_params = [{transform_indices = @transform_0, window_bounds = array<i64: 1, 16, 216>}, {pipeline_mode = #tpu.pipeline_mode<synchronous>, transform_indices = @transform_1, window_bounds = array<i64: 216, 40>}, {pipeline_mode = #tpu.pipeline_mode<synchronous>, transform_indices = @transform_2, window_bounds = array<i64: 1, 40>}, {transform_indices = @transform_3, window_bounds = array<i64: 1, 16, 40>}]} {
    %c0 = arith.constant 0 : index
    %c0_0 = arith.constant 0 : index
    %c0_1 = arith.constant 0 : index
    %0 = vector.load %arg2[%c0, %c0_0, %c0_1] : memref<1x16x216xbf16, #tpu.memory_space<vmem>>, vector<1x16x216xbf16>
    %1 = vector.shape_cast %0 : vector<1x16x216xbf16> to vector<16x216xbf16>
    %c0_2 = arith.constant 0 : index
    %c0_3 = arith.constant 0 : index
    %2 = vector.load %arg3[%c0_2, %c0_3] : memref<216x40xbf16, #tpu.memory_space<vmem>>, vector<216x40xbf16>
    %cst = arith.constant dense<0.000000e+00> : vector<16x40xf32>
    %3 = tpu.matmul %1, %2, %cst {dimension_numbers = #tpu.dot_dimension_numbers<[1], [0], [0], [1], [0, 0, 1, 1], [], []>} : vector<16x216xbf16>, vector<216x40xbf16>, vector<16x40xf32> -> vector<16x40xf32>
    %c0_4 = arith.constant 0 : index
    %c0_5 = arith.constant 0 : index
    %4 = vector.load %arg4[%c0_4, %c0_5] : memref<1x40xf32, #tpu.memory_space<vmem>>, vector<1x40xf32>
    %5 = vector.broadcast %4 : vector<1x40xf32> to vector<16x40xf32>
    %6 = arith.addf %3, %5 : vector<16x40xf32>
    %cst_6 = arith.constant 0.000000e+00 : f32
    %7 = vector.broadcast %cst_6 : f32 to vector<16x40xf32>
    %8 = arith.maximumf %6, %7 : vector<16x40xf32>
    %c0_7 = arith.constant 0 : index
    %c0_8 = arith.constant 0 : index
    %c0_9 = arith.constant 0 : index
    %9 = vector.load %arg5[%c0_7, %c0_8, %c0_9] : memref<1x16x40xf32, #tpu.memory_space<vmem>>, vector<1x16x40xf32>
    %10 = vector.shape_cast %9 : vector<1x16x40xf32> to vector<16x40xf32>
    %11 = vector.shape_cast %8 : vector<16x40xf32> to vector<1x16x40xf32>
    tpu.vector_store %arg5[%c0_7, %c0_8, %c0_9], %11 {strides = array<i32>} : memref<1x16x40xf32, #tpu.memory_space<vmem>>, vector<1x16x40xf32>,
    return
  }
  func.func @transform_0(%arg0: i32, %arg1: i32) -> (i32, i32, i32) {
    %c0_i32 = arith.constant 0 : i32
    %c0_i32_0 = arith.constant 0 : i32
    return %arg0, %arg1, %c0_i32 : i32, i32, i32
  }
  func.func @transform_1(%arg0: i32, %arg1: i32) -> (i32, i32) {
    %c0_i32 = arith.constant 0 : i32
    %c0_i32_0 = arith.constant 0 : i32
    %c0_i32_1 = arith.constant 0 : i32
    return %c0_i32, %c0_i32_0 : i32, i32
  }
  func.func @transform_2(%arg0: i32, %arg1: i32) -> (i32, i32) {
    %c0_i32 = arith.constant 0 : i32
    %c0_i32_0 = arith.constant 0 : i32
    %c0_i32_1 = arith.constant 0 : i32
    return %c0_i32, %c0_i32_0 : i32, i32
  }
  func.func @transform_3(%arg0: i32, %arg1: i32) -> (i32, i32, i32) {
    %c0_i32 = arith.constant 0 : i32
    %c0_i32_0 = arith.constant 0 : i32
    return %arg0, %arg1, %c0_i32 : i32, i32, i32
  }
}

module attributes {stable_mosaic.version = 11 : i64} {
  func.func @_conv_mm_fpa_kernel(%arg0: i32, %arg1: i32, %arg2: memref<1x16x40xbf16, #tpu.memory_space<vmem>>, %arg3: memref<40x32xbf16, #tpu.memory_space<vmem>>, %arg4: memref<1x32xf32, #tpu.memory_space<vmem>>, %arg5: memref<1x1x32xf32, #tpu.memory_space<vmem>>, %arg6: memref<1x16x32xf32, #tpu.memory_space<vmem>>) attributes {dimension_semantics = [#tpu.dimension_semantics<parallel>, #tpu.dimension_semantics<parallel>], iteration_bounds = array<i64: 2, 1>, scalar_prefetch = 0 : i64, scratch_operands = 0 : i64, tpu.core_type = #tpu.core_type<tc>, window_params = [{transform_indices = @transform_0, window_bounds = array<i64: 1, 16, 40>}, {pipeline_mode = #tpu.pipeline_mode<synchronous>, transform_indices = @transform_1, window_bounds = array<i64: 40, 32>}, {pipeline_mode = #tpu.pipeline_mode<synchronous>, transform_indices = @transform_2, window_bounds = array<i64: 1, 32>}, {transform_indices = @transform_3, window_bounds = array<i64: 1, 1, 32>}, {transform_indices = @transform_4, window_bounds = array<i64: 1, 16, 32>}]} {
    %c0 = arith.constant 0 : index
    %c0_0 = arith.constant 0 : index
    %c0_1 = arith.constant 0 : index
    %0 = vector.load %arg2[%c0, %c0_0, %c0_1] : memref<1x16x40xbf16, #tpu.memory_space<vmem>>, vector<1x16x40xbf16>
    %1 = vector.shape_cast %0 : vector<1x16x40xbf16> to vector<16x40xbf16>
    %c0_2 = arith.constant 0 : index
    %c0_3 = arith.constant 0 : index
    %2 = vector.load %arg3[%c0_2, %c0_3] : memref<40x32xbf16, #tpu.memory_space<vmem>>, vector<40x32xbf16>
    %cst = arith.constant dense<0.000000e+00> : vector<16x32xf32>
    %3 = tpu.matmul %1, %2, %cst {dimension_numbers = #tpu.dot_dimension_numbers<[1], [0], [0], [1], [0, 0, 1, 1], [], []>} : vector<16x40xbf16>, vector<40x32xbf16>, vector<16x32xf32> -> vector<16x32xf32>
    %c0_4 = arith.constant 0 : index
    %c0_5 = arith.constant 0 : index
    %4 = vector.load %arg4[%c0_4, %c0_5] : memref<1x32xf32, #tpu.memory_space<vmem>>, vector<1x32xf32>
    %5 = vector.broadcast %4 : vector<1x32xf32> to vector<16x32xf32>
    %6 = arith.addf %3, %5 : vector<16x32xf32>
    %c0_6 = arith.constant 0 : index
    %c0_7 = arith.constant 0 : index
    %c0_8 = arith.constant 0 : index
    %7 = vector.load %arg5[%c0_6, %c0_7, %c0_8] : memref<1x1x32xf32, #tpu.memory_space<vmem>>, vector<1x1x32xf32>
    %8 = vector.shape_cast %7 : vector<1x1x32xf32> to vector<1x32xf32>
    %9 = vector.broadcast %8 : vector<1x32xf32> to vector<16x32xf32>
    %10 = arith.addf %6, %9 : vector<16x32xf32>
    %cst_9 = arith.constant 0.000000e+00 : f32
    %11 = vector.broadcast %cst_9 : f32 to vector<16x32xf32>
    %12 = arith.maximumf %10, %11 : vector<16x32xf32>
    %c0_10 = arith.constant 0 : index
    %c0_11 = arith.constant 0 : index
    %c0_12 = arith.constant 0 : index
    %13 = vector.load %arg6[%c0_10, %c0_11, %c0_12] : memref<1x16x32xf32, #tpu.memory_space<vmem>>, vector<1x16x32xf32>
    %14 = vector.shape_cast %13 : vector<1x16x32xf32> to vector<16x32xf32>
    %15 = vector.shape_cast %12 : vector<16x32xf32> to vector<1x16x32xf32>
    tpu.vector_store %arg6[%c0_10, %c0_11, %c0_12], %15 {strides = array<i32>} : memref<1x16x32xf32, #tpu.memory_space<vmem>>, vector<1x16x32xf32>,
    return
  }
  func.func @transform_0(%arg0: i32, %arg1: i32) -> (i32, i32, i32) {
    %c0_i32 = arith.constant 0 : i32
    %c0_i32_0 = arith.constant 0 : i32
    return %arg0, %arg1, %c0_i32 : i32, i32, i32
  }
  func.func @transform_1(%arg0: i32, %arg1: i32) -> (i32, i32) {
    %c0_i32 = arith.constant 0 : i32
    %c0_i32_0 = arith.constant 0 : i32
    %c0_i32_1 = arith.constant 0 : i32
    return %c0_i32, %c0_i32_0 : i32, i32
  }
  func.func @transform_2(%arg0: i32, %arg1: i32) -> (i32, i32) {
    %c0_i32 = arith.constant 0 : i32
    %c0_i32_0 = arith.constant 0 : i32
    %c0_i32_1 = arith.constant 0 : i32
    return %c0_i32, %c0_i32_0 : i32, i32
  }
  func.func @transform_3(%arg0: i32, %arg1: i32) -> (i32, i32, i32) {
    %c0_i32 = arith.constant 0 : i32
    %c0_i32_0 = arith.constant 0 : i32
    %c0_i32_1 = arith.constant 0 : i32
    return %arg0, %c0_i32, %c0_i32_0 : i32, i32, i32
  }
  func.func @transform_4(%arg0: i32, %arg1: i32) -> (i32, i32, i32) {
    %c0_i32 = arith.constant 0 : i32
    %c0_i32_0 = arith.constant 0 : i32
    return %arg0, %arg1, %c0_i32 : i32, i32, i32
  }
}

module attributes {stable_mosaic.version = 11 : i64} {
  func.func @_gap_kernel(%arg0: i32, %arg1: i32, %arg2: memref<1x16x32xf32, #tpu.memory_space<vmem>>, %arg3: memref<1x1x32xf32, #tpu.memory_space<vmem>>) attributes {dimension_semantics = [#tpu.dimension_semantics<parallel>, #tpu.dimension_semantics<arbitrary>], iteration_bounds = array<i64: 2, 1>, scalar_prefetch = 0 : i64, scratch_operands = 0 : i64, tpu.core_type = #tpu.core_type<tc>, window_params = [{transform_indices = @transform_0, window_bounds = array<i64: 1, 16, 32>}, {transform_indices = @transform_1, window_bounds = array<i64: 1, 1, 32>}]} {
    %c0_i32 = arith.constant 0 : i32
    %0 = arith.cmpi eq, %arg1, %c0_i32 : i32
    %1 = arith.extui %0 : i1 to i32
    %c0_i32_0 = arith.constant 0 : i32
    %2 = arith.cmpi ne, %1, %c0_i32_0 : i32
    scf.if %2 {
      %cst_13 = arith.constant 0.000000e+00 : f32
      %20 = vector.broadcast %cst_13 : f32 to vector<1x1x32xf32>
      %c0_14 = arith.constant 0 : index
      %c0_15 = arith.constant 0 : index
      %c0_16 = arith.constant 0 : index
      %21 = vector.load %arg3[%c0_14, %c0_15, %c0_16] : memref<1x1x32xf32, #tpu.memory_space<vmem>>, vector<1x1x32xf32>
      tpu.vector_store %arg3[%c0_14, %c0_15, %c0_16], %20 {strides = array<i32>} : memref<1x1x32xf32, #tpu.memory_space<vmem>>, vector<1x1x32xf32>,
    } else {
    }
    %3 = tpu.iota {dimensions = array<i32: 1>} : vector<1x16x32xi32>
    %c16_i32 = arith.constant 16 : i32
    %4 = arith.muli %arg1, %c16_i32 : i32
    %5 = vector.broadcast %4 : i32 to vector<1x16x32xi32>
    %6 = arith.addi %5, %3 : vector<1x16x32xi32>
    %c16_i32_1 = arith.constant 16 : i32
    %7 = vector.broadcast %c16_i32_1 : i32 to vector<1x16x32xi32>
    %8 = arith.cmpi slt, %6, %7 : vector<1x16x32xi32>
    %c0 = arith.constant 0 : index
    %c0_2 = arith.constant 0 : index
    %c0_3 = arith.constant 0 : index
    %9 = vector.load %arg3[%c0, %c0_2, %c0_3] : memref<1x1x32xf32, #tpu.memory_space<vmem>>, vector<1x1x32xf32>
    %c0_4 = arith.constant 0 : index
    %c0_5 = arith.constant 0 : index
    %c0_6 = arith.constant 0 : index
    %10 = vector.load %arg2[%c0_4, %c0_5, %c0_6] : memref<1x16x32xf32, #tpu.memory_space<vmem>>, vector<1x16x32xf32>
    %cst = arith.constant 0.000000e+00 : f32
    %11 = vector.broadcast %cst : f32 to vector<1x16x32xf32>
    %12 = arith.select %8, %10, %11 : vector<1x16x32xi1>, vector<1x16x32xf32>
    %cst_7 = arith.constant dense<0.000000e+00> : vector<1x32xf32>
    %13 = vector.multi_reduction <add>, %12, %cst_7 [1] : vector<1x16x32xf32> to vector<1x32xf32>
    %14 = vector.shape_cast %13 : vector<1x32xf32> to vector<1x1x32xf32>
    %15 = arith.addf %9, %14 : vector<1x1x32xf32>
    %c0_8 = arith.constant 0 : index
    %c0_9 = arith.constant 0 : index
    %c0_10 = arith.constant 0 : index
    %16 = vector.load %arg3[%c0_8, %c0_9, %c0_10] : memref<1x1x32xf32, #tpu.memory_space<vmem>>, vector<1x1x32xf32>
    tpu.vector_store %arg3[%c0_8, %c0_9, %c0_10], %15 {strides = array<i32>} : memref<1x1x32xf32, #tpu.memory_space<vmem>>, vector<1x1x32xf32>,
    %c0_i32_11 = arith.constant 0 : i32
    %17 = arith.cmpi eq, %arg1, %c0_i32_11 : i32
    %18 = arith.extui %17 : i1 to i32
    %c0_i32_12 = arith.constant 0 : i32
    %19 = arith.cmpi ne, %18, %c0_i32_12 : i32
    scf.if %19 {
      %c0_13 = arith.constant 0 : index
      %c0_14 = arith.constant 0 : index
      %c0_15 = arith.constant 0 : index
      %20 = vector.load %arg3[%c0_13, %c0_14, %c0_15] : memref<1x1x32xf32, #tpu.memory_space<vmem>>, vector<1x1x32xf32>
      %cst_16 = arith.constant 6.250000e-02 : f32
      %21 = vector.broadcast %cst_16 : f32 to vector<1x1x32xf32>
      %22 = arith.mulf %20, %21 : vector<1x1x32xf32>
      %c0_17 = arith.constant 0 : index
      %c0_18 = arith.constant 0 : index
      %c0_19 = arith.constant 0 : index
      %23 = vector.load %arg3[%c0_17, %c0_18, %c0_19] : memref<1x1x32xf32, #tpu.memory_space<vmem>>, vector<1x1x32xf32>
      tpu.vector_store %arg3[%c0_17, %c0_18, %c0_19], %22 {strides = array<i32>} : memref<1x1x32xf32, #tpu.memory_space<vmem>>, vector<1x1x32xf32>,
    } else {
    }
    return
  }
  func.func @transform_0(%arg0: i32, %arg1: i32) -> (i32, i32, i32) {
    %c0_i32 = arith.constant 0 : i32
    %c0_i32_0 = arith.constant 0 : i32
    return %arg0, %arg1, %c0_i32 : i32, i32, i32
  }
  func.func @transform_1(%arg0: i32, %arg1: i32) -> (i32, i32, i32) {
    %c0_i32 = arith.constant 0 : i32
    %c0_i32_0 = arith.constant 0 : i32
    %c0_i32_1 = arith.constant 0 : i32
    return %arg0, %c0_i32, %c0_i32_0 : i32, i32, i32
  }
}

module attributes {stable_mosaic.version = 11 : i64} {
  func.func @_conv_mm_gau_kernel(%arg0: i32, %arg1: i32, %arg2: memref<1x64x216xbf16, #tpu.memory_space<vmem>>, %arg3: memref<216x32xbf16, #tpu.memory_space<vmem>>, %arg4: memref<1x32xf32, #tpu.memory_space<vmem>>, %arg5: memref<1x1x32xf32, #tpu.memory_space<vmem>>, %arg6: memref<1x64x32xf32, #tpu.memory_space<vmem>>, %arg7: memref<1x64x32xf32, #tpu.memory_space<vmem>>) attributes {dimension_semantics = [#tpu.dimension_semantics<parallel>, #tpu.dimension_semantics<parallel>], iteration_bounds = array<i64: 2, 1>, scalar_prefetch = 0 : i64, scratch_operands = 0 : i64, tpu.core_type = #tpu.core_type<tc>, window_params = [{transform_indices = @transform_0, window_bounds = array<i64: 1, 64, 216>}, {pipeline_mode = #tpu.pipeline_mode<synchronous>, transform_indices = @transform_1, window_bounds = array<i64: 216, 32>}, {pipeline_mode = #tpu.pipeline_mode<synchronous>, transform_indices = @transform_2, window_bounds = array<i64: 1, 32>}, {transform_indices = @transform_3, window_bounds = array<i64: 1, 1, 32>}, {transform_indices = @transform_4, window_bounds = array<i64: 1, 64, 32>}, {transform_indices = @transform_5, window_bounds = array<i64: 1, 64, 32>}]} {
    %c0 = arith.constant 0 : index
    %c0_0 = arith.constant 0 : index
    %c0_1 = arith.constant 0 : index
    %0 = vector.load %arg2[%c0, %c0_0, %c0_1] : memref<1x64x216xbf16, #tpu.memory_space<vmem>>, vector<1x64x216xbf16>
    %1 = vector.shape_cast %0 : vector<1x64x216xbf16> to vector<64x216xbf16>
    %c0_2 = arith.constant 0 : index
    %c0_3 = arith.constant 0 : index
    %2 = vector.load %arg3[%c0_2, %c0_3] : memref<216x32xbf16, #tpu.memory_space<vmem>>, vector<216x32xbf16>
    %cst = arith.constant dense<0.000000e+00> : vector<64x32xf32>
    %3 = tpu.matmul %1, %2, %cst {dimension_numbers = #tpu.dot_dimension_numbers<[1], [0], [0], [1], [0, 0, 1, 1], [], []>} : vector<64x216xbf16>, vector<216x32xbf16>, vector<64x32xf32> -> vector<64x32xf32>
    %c0_4 = arith.constant 0 : index
    %c0_5 = arith.constant 0 : index
    %4 = vector.load %arg4[%c0_4, %c0_5] : memref<1x32xf32, #tpu.memory_space<vmem>>, vector<1x32xf32>
    %5 = vector.broadcast %4 : vector<1x32xf32> to vector<64x32xf32>
    %6 = arith.addf %3, %5 : vector<64x32xf32>
    %cst_6 = arith.constant 0.000000e+00 : f32
    %7 = vector.broadcast %cst_6 : f32 to vector<64x32xf32>
    %8 = arith.maximumf %6, %7 : vector<64x32xf32>
    %c0_7 = arith.constant 0 : index
    %c0_8 = arith.constant 0 : index
    %c0_9 = arith.constant 0 : index
    %9 = vector.load %arg5[%c0_7, %c0_8, %c0_9] : memref<1x1x32xf32, #tpu.memory_space<vmem>>, vector<1x1x32xf32>
    %10 = vector.shape_cast %9 : vector<1x1x32xf32> to vector<1x32xf32>
    %11 = vector.broadcast %10 : vector<1x32xf32> to vector<64x32xf32>
    %12 = arith.mulf %8, %11 : vector<64x32xf32>
    %c0_10 = arith.constant 0 : index
    %c0_11 = arith.constant 0 : index
    %c0_12 = arith.constant 0 : index
    %13 = vector.load %arg6[%c0_10, %c0_11, %c0_12] : memref<1x64x32xf32, #tpu.memory_space<vmem>>, vector<1x64x32xf32>
    %14 = vector.shape_cast %13 : vector<1x64x32xf32> to vector<64x32xf32>
    %15 = arith.addf %12, %14 : vector<64x32xf32>
    %c0_13 = arith.constant 0 : index
    %c0_14 = arith.constant 0 : index
    %c0_15 = arith.constant 0 : index
    %16 = vector.load %arg7[%c0_13, %c0_14, %c0_15] : memref<1x64x32xf32, #tpu.memory_space<vmem>>, vector<1x64x32xf32>
    %17 = vector.shape_cast %16 : vector<1x64x32xf32> to vector<64x32xf32>
    %18 = vector.shape_cast %15 : vector<64x32xf32> to vector<1x64x32xf32>
    tpu.vector_store %arg7[%c0_13, %c0_14, %c0_15], %18 {strides = array<i32>} : memref<1x64x32xf32, #tpu.memory_space<vmem>>, vector<1x64x32xf32>,
    return
  }
  func.func @transform_0(%arg0: i32, %arg1: i32) -> (i32, i32, i32) {
    %c0_i32 = arith.constant 0 : i32
    %c0_i32_0 = arith.constant 0 : i32
    return %arg0, %arg1, %c0_i32 : i32, i32, i32
  }
  func.func @transform_1(%arg0: i32, %arg1: i32) -> (i32, i32) {
    %c0_i32 = arith.constant 0 : i32
    %c0_i32_0 = arith.constant 0 : i32
    %c0_i32_1 = arith.constant 0 : i32
    return %c0_i32, %c0_i32_0 : i32, i32
  }
  func.func @transform_2(%arg0: i32, %arg1: i32) -> (i32, i32) {
    %c0_i32 = arith.constant 0 : i32
    %c0_i32_0 = arith.constant 0 : i32
    %c0_i32_1 = arith.constant 0 : i32
    return %c0_i32, %c0_i32_0 : i32, i32
  }
  func.func @transform_3(%arg0: i32, %arg1: i32) -> (i32, i32, i32) {
    %c0_i32 = arith.constant 0 : i32
    %c0_i32_0 = arith.constant 0 : i32
    %c0_i32_1 = arith.constant 0 : i32
    return %arg0, %c0_i32, %c0_i32_0 : i32, i32, i32
  }
  func.func @transform_4(%arg0: i32, %arg1: i32) -> (i32, i32, i32) {
    %c0_i32 = arith.constant 0 : i32
    %c0_i32_0 = arith.constant 0 : i32
    return %arg0, %arg1, %c0_i32 : i32, i32, i32
  }
  func.func @transform_5(%arg0: i32, %arg1: i32) -> (i32, i32, i32) {
    %c0_i32 = arith.constant 0 : i32
    %c0_i32_0 = arith.constant 0 : i32
    return %arg0, %arg1, %c0_i32 : i32, i32, i32
  }
}

module attributes {stable_mosaic.version = 11 : i64} {
  func.func @_gap_kernel(%arg0: i32, %arg1: i32, %arg2: memref<1x64x32xf32, #tpu.memory_space<vmem>>, %arg3: memref<1x1x32xf32, #tpu.memory_space<vmem>>) attributes {dimension_semantics = [#tpu.dimension_semantics<parallel>, #tpu.dimension_semantics<arbitrary>], iteration_bounds = array<i64: 2, 1>, scalar_prefetch = 0 : i64, scratch_operands = 0 : i64, tpu.core_type = #tpu.core_type<tc>, window_params = [{transform_indices = @transform_0, window_bounds = array<i64: 1, 64, 32>}, {transform_indices = @transform_1, window_bounds = array<i64: 1, 1, 32>}]} {
    %c0_i32 = arith.constant 0 : i32
    %0 = arith.cmpi eq, %arg1, %c0_i32 : i32
    %1 = arith.extui %0 : i1 to i32
    %c0_i32_0 = arith.constant 0 : i32
    %2 = arith.cmpi ne, %1, %c0_i32_0 : i32
    scf.if %2 {
      %cst_13 = arith.constant 0.000000e+00 : f32
      %20 = vector.broadcast %cst_13 : f32 to vector<1x1x32xf32>
      %c0_14 = arith.constant 0 : index
      %c0_15 = arith.constant 0 : index
      %c0_16 = arith.constant 0 : index
      %21 = vector.load %arg3[%c0_14, %c0_15, %c0_16] : memref<1x1x32xf32, #tpu.memory_space<vmem>>, vector<1x1x32xf32>
      tpu.vector_store %arg3[%c0_14, %c0_15, %c0_16], %20 {strides = array<i32>} : memref<1x1x32xf32, #tpu.memory_space<vmem>>, vector<1x1x32xf32>,
    } else {
    }
    %3 = tpu.iota {dimensions = array<i32: 1>} : vector<1x64x32xi32>
    %c64_i32 = arith.constant 64 : i32
    %4 = arith.muli %arg1, %c64_i32 : i32
    %5 = vector.broadcast %4 : i32 to vector<1x64x32xi32>
    %6 = arith.addi %5, %3 : vector<1x64x32xi32>
    %c64_i32_1 = arith.constant 64 : i32
    %7 = vector.broadcast %c64_i32_1 : i32 to vector<1x64x32xi32>
    %8 = arith.cmpi slt, %6, %7 : vector<1x64x32xi32>
    %c0 = arith.constant 0 : index
    %c0_2 = arith.constant 0 : index
    %c0_3 = arith.constant 0 : index
    %9 = vector.load %arg3[%c0, %c0_2, %c0_3] : memref<1x1x32xf32, #tpu.memory_space<vmem>>, vector<1x1x32xf32>
    %c0_4 = arith.constant 0 : index
    %c0_5 = arith.constant 0 : index
    %c0_6 = arith.constant 0 : index
    %10 = vector.load %arg2[%c0_4, %c0_5, %c0_6] : memref<1x64x32xf32, #tpu.memory_space<vmem>>, vector<1x64x32xf32>
    %cst = arith.constant 0.000000e+00 : f32
    %11 = vector.broadcast %cst : f32 to vector<1x64x32xf32>
    %12 = arith.select %8, %10, %11 : vector<1x64x32xi1>, vector<1x64x32xf32>
    %cst_7 = arith.constant dense<0.000000e+00> : vector<1x32xf32>
    %13 = vector.multi_reduction <add>, %12, %cst_7 [1] : vector<1x64x32xf32> to vector<1x32xf32>
    %14 = vector.shape_cast %13 : vector<1x32xf32> to vector<1x1x32xf32>
    %15 = arith.addf %9, %14 : vector<1x1x32xf32>
    %c0_8 = arith.constant 0 : index
    %c0_9 = arith.constant 0 : index
    %c0_10 = arith.constant 0 : index
    %16 = vector.load %arg3[%c0_8, %c0_9, %c0_10] : memref<1x1x32xf32, #tpu.memory_space<vmem>>, vector<1x1x32xf32>
    tpu.vector_store %arg3[%c0_8, %c0_9, %c0_10], %15 {strides = array<i32>} : memref<1x1x32xf32, #tpu.memory_space<vmem>>, vector<1x1x32xf32>,
    %c0_i32_11 = arith.constant 0 : i32
    %17 = arith.cmpi eq, %arg1, %c0_i32_11 : i32
    %18 = arith.extui %17 : i1 to i32
    %c0_i32_12 = arith.constant 0 : i32
    %19 = arith.cmpi ne, %18, %c0_i32_12 : i32
    scf.if %19 {
      %c0_13 = arith.constant 0 : index
      %c0_14 = arith.constant 0 : index
      %c0_15 = arith.constant 0 : index
      %20 = vector.load %arg3[%c0_13, %c0_14, %c0_15] : memref<1x1x32xf32, #tpu.memory_space<vmem>>, vector<1x1x32xf32>
      %cst_16 = arith.constant 1.562500e-02 : f32
      %21 = vector.broadcast %cst_16 : f32 to vector<1x1x32xf32>
      %22 = arith.mulf %20, %21 : vector<1x1x32xf32>
      %c0_17 = arith.constant 0 : index
      %c0_18 = arith.constant 0 : index
      %c0_19 = arith.constant 0 : index
      %23 = vector.load %arg3[%c0_17, %c0_18, %c0_19] : memref<1x1x32xf32, #tpu.memory_space<vmem>>, vector<1x1x32xf32>
      tpu.vector_store %arg3[%c0_17, %c0_18, %c0_19], %22 {strides = array<i32>} : memref<1x1x32xf32, #tpu.memory_space<vmem>>, vector<1x1x32xf32>,
    } else {
    }
    return
  }
  func.func @transform_0(%arg0: i32, %arg1: i32) -> (i32, i32, i32) {
    %c0_i32 = arith.constant 0 : i32
    %c0_i32_0 = arith.constant 0 : i32
    return %arg0, %arg1, %c0_i32 : i32, i32, i32
  }
  func.func @transform_1(%arg0: i32, %arg1: i32) -> (i32, i32, i32) {
    %c0_i32 = arith.constant 0 : i32
    %c0_i32_0 = arith.constant 0 : i32
    %c0_i32_1 = arith.constant 0 : i32
    return %arg0, %c0_i32, %c0_i32_0 : i32, i32, i32
  }
}

module attributes {stable_mosaic.version = 11 : i64} {
  func.func @_conv_mm_gau_kernel(%arg0: i32, %arg1: i32, %arg2: memref<1x256x144xbf16, #tpu.memory_space<vmem>>, %arg3: memref<144x32xbf16, #tpu.memory_space<vmem>>, %arg4: memref<1x32xf32, #tpu.memory_space<vmem>>, %arg5: memref<1x1x32xf32, #tpu.memory_space<vmem>>, %arg6: memref<1x256x32xf32, #tpu.memory_space<vmem>>, %arg7: memref<1x256x32xf32, #tpu.memory_space<vmem>>) attributes {dimension_semantics = [#tpu.dimension_semantics<parallel>, #tpu.dimension_semantics<parallel>], iteration_bounds = array<i64: 2, 1>, scalar_prefetch = 0 : i64, scratch_operands = 0 : i64, tpu.core_type = #tpu.core_type<tc>, window_params = [{transform_indices = @transform_0, window_bounds = array<i64: 1, 256, 144>}, {pipeline_mode = #tpu.pipeline_mode<synchronous>, transform_indices = @transform_1, window_bounds = array<i64: 144, 32>}, {pipeline_mode = #tpu.pipeline_mode<synchronous>, transform_indices = @transform_2, window_bounds = array<i64: 1, 32>}, {transform_indices = @transform_3, window_bounds = array<i64: 1, 1, 32>}, {transform_indices = @transform_4, window_bounds = array<i64: 1, 256, 32>}, {transform_indices = @transform_5, window_bounds = array<i64: 1, 256, 32>}]} {
    %c0 = arith.constant 0 : index
    %c0_0 = arith.constant 0 : index
    %c0_1 = arith.constant 0 : index
    %0 = vector.load %arg2[%c0, %c0_0, %c0_1] : memref<1x256x144xbf16, #tpu.memory_space<vmem>>, vector<1x256x144xbf16>
    %1 = vector.shape_cast %0 : vector<1x256x144xbf16> to vector<256x144xbf16>
    %c0_2 = arith.constant 0 : index
    %c0_3 = arith.constant 0 : index
    %2 = vector.load %arg3[%c0_2, %c0_3] : memref<144x32xbf16, #tpu.memory_space<vmem>>, vector<144x32xbf16>
    %cst = arith.constant dense<0.000000e+00> : vector<256x32xf32>
    %3 = tpu.matmul %1, %2, %cst {dimension_numbers = #tpu.dot_dimension_numbers<[1], [0], [0], [1], [0, 0, 1, 1], [], []>} : vector<256x144xbf16>, vector<144x32xbf16>, vector<256x32xf32> -> vector<256x32xf32>
    %c0_4 = arith.constant 0 : index
    %c0_5 = arith.constant 0 : index
    %4 = vector.load %arg4[%c0_4, %c0_5] : memref<1x32xf32, #tpu.memory_space<vmem>>, vector<1x32xf32>
    %5 = vector.broadcast %4 : vector<1x32xf32> to vector<256x32xf32>
    %6 = arith.addf %3, %5 : vector<256x32xf32>
    %cst_6 = arith.constant 0.000000e+00 : f32
    %7 = vector.broadcast %cst_6 : f32 to vector<256x32xf32>
    %8 = arith.maximumf %6, %7 : vector<256x32xf32>
    %c0_7 = arith.constant 0 : index
    %c0_8 = arith.constant 0 : index
    %c0_9 = arith.constant 0 : index
    %9 = vector.load %arg5[%c0_7, %c0_8, %c0_9] : memref<1x1x32xf32, #tpu.memory_space<vmem>>, vector<1x1x32xf32>
    %10 = vector.shape_cast %9 : vector<1x1x32xf32> to vector<1x32xf32>
    %11 = vector.broadcast %10 : vector<1x32xf32> to vector<256x32xf32>
    %12 = arith.mulf %8, %11 : vector<256x32xf32>
    %c0_10 = arith.constant 0 : index
    %c0_11 = arith.constant 0 : index
    %c0_12 = arith.constant 0 : index
    %13 = vector.load %arg6[%c0_10, %c0_11, %c0_12] : memref<1x256x32xf32, #tpu.memory_space<vmem>>, vector<1x256x32xf32>
    %14 = vector.shape_cast %13 : vector<1x256x32xf32> to vector<256x32xf32>
    %15 = arith.addf %12, %14 : vector<256x32xf32>
    %c0_13 = arith.constant 0 : index
    %c0_14 = arith.constant 0 : index
    %c0_15 = arith.constant 0 : index
    %16 = vector.load %arg7[%c0_13, %c0_14, %c0_15] : memref<1x256x32xf32, #tpu.memory_space<vmem>>, vector<1x256x32xf32>
    %17 = vector.shape_cast %16 : vector<1x256x32xf32> to vector<256x32xf32>
    %18 = vector.shape_cast %15 : vector<256x32xf32> to vector<1x256x32xf32>
    tpu.vector_store %arg7[%c0_13, %c0_14, %c0_15], %18 {strides = array<i32>} : memref<1x256x32xf32, #tpu.memory_space<vmem>>, vector<1x256x32xf32>,
    return
  }
  func.func @transform_0(%arg0: i32, %arg1: i32) -> (i32, i32, i32) {
    %c0_i32 = arith.constant 0 : i32
    %c0_i32_0 = arith.constant 0 : i32
    return %arg0, %arg1, %c0_i32 : i32, i32, i32
  }
  func.func @transform_1(%arg0: i32, %arg1: i32) -> (i32, i32) {
    %c0_i32 = arith.constant 0 : i32
    %c0_i32_0 = arith.constant 0 : i32
    %c0_i32_1 = arith.constant 0 : i32
    return %c0_i32, %c0_i32_0 : i32, i32
  }
  func.func @transform_2(%arg0: i32, %arg1: i32) -> (i32, i32) {
    %c0_i32 = arith.constant 0 : i32
    %c0_i32_0 = arith.constant 0 : i32
    %c0_i32_1 = arith.constant 0 : i32
    return %c0_i32, %c0_i32_0 : i32, i32
  }
  func.func @transform_3(%arg0: i32, %arg1: i32) -> (i32, i32, i32) {
    %c0_i32 = arith.constant 0 : i32
    %c0_i32_0 = arith.constant 0 : i32
    %c0_i32_1 = arith.constant 0 : i32
    return %arg0, %c0_i32, %c0_i32_0 : i32, i32, i32
  }
  func.func @transform_4(%arg0: i32, %arg1: i32) -> (i32, i32, i32) {
    %c0_i32 = arith.constant 0 : i32
    %c0_i32_0 = arith.constant 0 : i32
    return %arg0, %arg1, %c0_i32 : i32, i32, i32
  }
  func.func @transform_5(%arg0: i32, %arg1: i32) -> (i32, i32, i32) {
    %c0_i32 = arith.constant 0 : i32
    %c0_i32_0 = arith.constant 0 : i32
    return %arg0, %arg1, %c0_i32 : i32, i32, i32
  }
}

module attributes {stable_mosaic.version = 11 : i64} {
  func.func @_conv_mm_base_kernel(%arg0: i32, %arg1: i32, %arg2: memref<1x256x32xbf16, #tpu.memory_space<vmem>>, %arg3: memref<32x11xbf16, #tpu.memory_space<vmem>>, %arg4: memref<1x11xf32, #tpu.memory_space<vmem>>, %arg5: memref<1x256x11xf32, #tpu.memory_space<vmem>>) attributes {dimension_semantics = [#tpu.dimension_semantics<parallel>, #tpu.dimension_semantics<parallel>], iteration_bounds = array<i64: 2, 1>, scalar_prefetch = 0 : i64, scratch_operands = 0 : i64, tpu.core_type = #tpu.core_type<tc>, window_params = [{transform_indices = @transform_0, window_bounds = array<i64: 1, 256, 32>}, {pipeline_mode = #tpu.pipeline_mode<synchronous>, transform_indices = @transform_1, window_bounds = array<i64: 32, 11>}, {pipeline_mode = #tpu.pipeline_mode<synchronous>, transform_indices = @transform_2, window_bounds = array<i64: 1, 11>}, {transform_indices = @transform_3, window_bounds = array<i64: 1, 256, 11>}]} {
    %c0 = arith.constant 0 : index
    %c0_0 = arith.constant 0 : index
    %c0_1 = arith.constant 0 : index
    %0 = vector.load %arg2[%c0, %c0_0, %c0_1] : memref<1x256x32xbf16, #tpu.memory_space<vmem>>, vector<1x256x32xbf16>
    %1 = vector.shape_cast %0 : vector<1x256x32xbf16> to vector<256x32xbf16>
    %c0_2 = arith.constant 0 : index
    %c0_3 = arith.constant 0 : index
    %2 = vector.load %arg3[%c0_2, %c0_3] : memref<32x11xbf16, #tpu.memory_space<vmem>>, vector<32x11xbf16>
    %cst = arith.constant dense<0.000000e+00> : vector<256x11xf32>
    %3 = tpu.matmul %1, %2, %cst {dimension_numbers = #tpu.dot_dimension_numbers<[1], [0], [0], [1], [0, 0, 1, 1], [], []>} : vector<256x32xbf16>, vector<32x11xbf16>, vector<256x11xf32> -> vector<256x11xf32>
    %c0_4 = arith.constant 0 : index
    %c0_5 = arith.constant 0 : index
    %4 = vector.load %arg4[%c0_4, %c0_5] : memref<1x11xf32, #tpu.memory_space<vmem>>, vector<1x11xf32>
    %5 = vector.broadcast %4 : vector<1x11xf32> to vector<256x11xf32>
    %6 = arith.addf %3, %5 : vector<256x11xf32>
    %c0_6 = arith.constant 0 : index
    %c0_7 = arith.constant 0 : index
    %c0_8 = arith.constant 0 : index
    %7 = vector.load %arg5[%c0_6, %c0_7, %c0_8] : memref<1x256x11xf32, #tpu.memory_space<vmem>>, vector<1x256x11xf32>
    %8 = vector.shape_cast %7 : vector<1x256x11xf32> to vector<256x11xf32>
    %9 = vector.shape_cast %6 : vector<256x11xf32> to vector<1x256x11xf32>
    tpu.vector_store %arg5[%c0_6, %c0_7, %c0_8], %9 {strides = array<i32>} : memref<1x256x11xf32, #tpu.memory_space<vmem>>, vector<1x256x11xf32>,
    return
  }
  func.func @transform_0(%arg0: i32, %arg1: i32) -> (i32, i32, i32) {
    %c0_i32 = arith.constant 0 : i32
    %c0_i32_0 = arith.constant 0 : i32
    return %arg0, %arg1, %c0_i32 : i32, i32, i32
  }
  func.func @transform_1(%arg0: i32, %arg1: i32) -> (i32, i32) {
    %c0_i32 = arith.constant 0 : i32
    %c0_i32_0 = arith.constant 0 : i32
    %c0_i32_1 = arith.constant 0 : i32
    return %c0_i32, %c0_i32_0 : i32, i32
  }
  func.func @transform_2(%arg0: i32, %arg1: i32) -> (i32, i32) {
    %c0_i32 = arith.constant 0 : i32
    %c0_i32_0 = arith.constant 0 : i32
    %c0_i32_1 = arith.constant 0 : i32
    return %c0_i32, %c0_i32_0 : i32, i32
  }
  func.func @transform_3(%arg0: i32, %arg1: i32) -> (i32, i32, i32) {
    %c0_i32 = arith.constant 0 : i32
    %c0_i32_0 = arith.constant 0 : i32
    return %arg0, %arg1, %c0_i32 : i32, i32, i32
  }
}

</mosaic_0001>

<bundles_post_ra>
// kernel: pan_forward.10
= control target key start
LH: loop header
LB: loop body
LE: loop exit
PB: predicated region body
PF: predicated region fallthrough
CT: control target
= control target key end

     0   :  { %s908_s12 = smov 0   ;;  %s910_s13 = smov 0   ;;  %s1088_s0 = inlined_call_operand.vmem [shape: bf16[2,256,27], index: 0, kind: input, shape index: {}]   ;;  %s1089_s1 = inlined_call_operand.vmem [shape: bf16[27,16], index: 1, kind: input, shape index: {}]   ;;  %s1090_s2 = inlined_call_operand.vmem [shape: f32[1,16], index: 2, kind: input, shape index: {}]   ;;  %s1091_s3 = inlined_call_operand.vmem [shape: f32[2,256,16], index: 3, kind: output, shape index: {}]  }
   0x1   :  { %s912_s14 = smov 0  }
   0x2 LB: > { %s25_s15 = sadd.s32 1, %s881_s13  ;;  %p718_p0 = scmp.ge.s32.totalorder %s885_s14, 1  ;;  %s885_s14 = sphi %s912_s14, %s13_s14   ;;  %s881_s13 = sphi %s910_s13, %s1093_s13   ;;  %s877_s12 = sphi %s908_s12, %s1092_s12  }
   0x3   : > { %p27_p1 = scmp.ge.s32.totalorder %s25_s15, 2  ;;  %p158_p2 = scmp.lt.s32.totalorder %s885_s14, 3 }
   0x5   : > { %s1095_s15 = smov (%p27_p1, %s25_s15), 0  ;;  %p159_p3 = pnand %p718_p0, %p158_p2 }
   0x6   : > { %p191_p4 = scmp.lt.s32.totalorder (!%p159_p3), %s877_s12, 1 }
   0x7   : > { %162 = sbr.rel (%p159_p3) target bundleno = 253 (0xfd), region = 32 }
   0xc   : > { %v845_v0 = vld [vmem:[%s1089_s1 + $0x8] sm:$0x3f]   ;;  %vm394_vm0 = vcmask 1044480   ;;  %vm395_vm1 = vcmask 1045504   ;;  %v887_v1 = vmov 65535   ;;  %v846_v5 = vld [vmem:[%s1089_s1] sm:$0xff]  }
   0xd   : > { %v396_v2 = vsel %vm394_vm0, 4294967295, %v887_v1  ;;  %s1097_s12 = smov (!%p191_p4, %s877_s12), 1  ;;  %vm345_vm2 = vcmask 220160   ;;  %v975_v22 = vld [vmem:[%s1090_s2] ss:$0 sm:$0xff]  ;;  %vm594_vm3 = vcmask 130048  }
   0xe   : > { %v397_v3 = vsel %vm395_vm1, %v396_v2, 0  ;;  %s760_s20 = sshll.u32 %s1097_s12, 7  ;;  %s761_s26 = sshll.u32 %s1097_s12, 8 }
   0xf   : > { %v399_v4 = vand.u32 %v845_v0, %v397_v3  ;;  %s938_s23 = scalar_lea.vmem %s1088_s0, %s760_s20  ;;  %s983_s29 = scalar_lea.vmem %s1091_s3, %s761_s26 }
  0x10   : > { %v847_v6 = vld [vmem:[%s938_s23] sm:$0xff]   ;;  %v849_v8 = vld [vmem:[%s938_s23 + $0x8] sm:$0xff]   ;;  %v851_v10 = vld [vmem:[%s938_s23 + $0x10] sm:$0xff]  }
  0x11   : > { %780 = vmatprep.subr.bf16.mxu0 %v399_v4  ;;  %816 = vmatprep.subr.bf16.mxu1 %v399_v4  ;;  %v848_v7 = vld [vmem:[%s938_s23 + $0x40] sm:$0xff]   ;;  %v850_v9 = vld [vmem:[%s938_s23 + $0x48] sm:$0xff]   ;;  %v852_v11 = vld [vmem:[%s938_s23 + $0x50] sm:$0xff]  }
  0x12   : > { %781 = vmatpush3.bf16.msra.mxu0 %v399_v4  ;;  %818 = vmatpush3.bf16.msra.mxu1 %v399_v4  ;;  %v853_v12 = vld [vmem:[%s938_s23 + $0x18] sm:$0xff]   ;;  %v855_v14 = vld [vmem:[%s938_s23 + $0x20] sm:$0xff]   ;;  %v857_v16 = vld [vmem:[%s938_s23 + $0x28] sm:$0xff]  }
  0x13   : > { %782 = vmatprep.subr.bf16.mxu0 %v846_v5  ;;  %817 = vmatprep.subr.bf16.mxu1 %v846_v5  ;;  %v854_v13 = vld [vmem:[%s938_s23 + $0x58] sm:$0xff]   ;;  %v856_v15 = vld [vmem:[%s938_s23 + $0x60] sm:$0xff]   ;;  %v858_v17 = vld [vmem:[%s938_s23 + $0x68] sm:$0xff]  }
  0x14   : > { %784 = vmatprep.mubr.msk.bf16.mxu0 %vm345_vm2, %v847_v6  ;;  %800 = vmatprep.mubr.msk.bf16.mxu1 %vm345_vm2, %v848_v7  ;;  %v859_v18 = vld [vmem:[%s938_s23 + $0x30] sm:$0xff]   ;;  %v861_v20 = vld [vmem:[%s938_s23 + $0x38] sm:$0xff]  }
  0x15   : > { %v860_v19 = vld [vmem:[%s938_s23 + $0x70] sm:$0xff]   ;;  %v862_v21 = vld [vmem:[%s938_s23 + $0x78] sm:$0xff]  }
  0x16   : > { %783 = vmatpush3.bf16.msra.mxu0 %v846_v5  ;;  %819 = vmatpush3.bf16.msra.mxu1 %v846_v5 }
  0x19   : > { %785 = vmatmul.mubr.msk.bf16.vlgmr.msra.gmra.mxu0 %vm345_vm2, %v849_v8  ;;  %801 = vmatmul.mubr.msk.bf16.vlgmr.msra.gmra.mxu1 %vm345_vm2, %v850_v9 }
  0x1a   : > { %788 = vmatprep.mubr.msk.bf16.mxu0 %vm345_vm2, %v851_v10  ;;  %804 = vmatprep.mubr.msk.bf16.mxu1 %vm345_vm2, %v852_v11 }
  0x21   : > { %789 = vmatmul.mubr.msk.bf16.gmra.mxu0 %vm345_vm2, %v853_v12  ;;  %805 = vmatmul.mubr.msk.bf16.gmra.mxu1 %vm345_vm2, %v854_v13 }
  0x22   : > { %792 = vmatprep.mubr.msk.bf16.mxu0 %vm345_vm2, %v855_v14  ;;  %808 = vmatprep.mubr.msk.bf16.mxu1 %vm345_vm2, %v856_v15 }
  0x29   : > { %793 = vmatmul.mubr.msk.bf16.gmra.mxu0 %vm345_vm2, %v857_v16  ;;  %809 = vmatmul.mubr.msk.bf16.gmra.mxu1 %vm345_vm2, %v858_v17 }
  0x2a   : > { %796 = vmatprep.mubr.msk.bf16.mxu0 %vm345_vm2, %v859_v18  ;;  %812 = vmatprep.mubr.msk.bf16.mxu1 %vm345_vm2, %v860_v19 }
  0x31   : > { %797 = vmatmul.mubr.msk.bf16.gmra.mxu0 %vm345_vm2, %v861_v20  ;;  %813 = vmatmul.mubr.msk.bf16.gmra.mxu1 %vm345_vm2, %v862_v21 }
  0xd9   : > { %v786_v23 = vpop.f32.mrf.mxu0  ;;  %v802_v24 = vpop.f32.mrf.mxu1 }
  0xda   : > { %v444_v25 = vadd.f32 %v786_v23, %v975_v22  ;;  %v508_v26 = vadd.f32 %v802_v24, %v975_v22 }
  0xdb   : > { %v435_v27 = vpop.f32.mrf.mxu0  ;;  %v499_v28 = vpop.f32.mrf.mxu1 }
  0xdc   : > { %v564_v29 = vmax.f32 %v444_v25, 0.0  ;;  %v580_v30 = vmax.f32 %v508_v26, 0.0  ;;  %v436_v31 = vadd.f32 %v975_v22, %v435_v27  ;;  %v500_v32 = vadd.f32 %v975_v22, %v499_v28 }
  0xdd   : > { %v787_v33 = vpop.f32.mrf.mxu0  ;;  %v803_v34 = vpop.f32.mrf.mxu1 }
  0xde   : > { %597 = vst.msk [vmem:[%s983_s29 + $0x10] sm:$0xff] %vm594_vm3, %v564_v29  ;;  %613 = vst.msk [vmem:[%s983_s29 + $0x90] sm:$0xff] %vm594_vm3, %v580_v30  ;;  %v562_v35 = vmax.f32 %v436_v31, 0.0  ;;  %v578_v36 = vmax.f32 %v500_v32, 0.0  ;;  %v447_v37 = vadd.f32 %v787_v33, %v975_v22  ;;  %v511_v38 = vadd.f32 %v803_v34, %v975_v22 }
  0xdf   : > { %v438_v39 = vpop.f32.mrf.mxu0  ;;  %v502_v40 = vpop.f32.mrf.mxu1 }
  0xe0   : > { %595 = vst.msk [vmem:[%s983_s29] sm:$0xff] %vm594_vm3, %v562_v35  ;;  %611 = vst.msk [vmem:[%s983_s29 + $0x80] sm:$0xff] %vm594_vm3, %v578_v36  ;;  %v565_v41 = vmax.f32 %v447_v37, 0.0  ;;  %v581_v42 = vmax.f32 %v511_v38, 0.0  ;;  %v439_v43 = vadd.f32 %v975_v22, %v438_v39  ;;  %v503_v44 = vadd.f32 %v975_v22, %v502_v40 }
  0xe1   : > { %v790_v45 = vpop.f32.mrf.mxu0  ;;  %v806_v46 = vpop.f32.mrf.mxu1 }
  0xe2   : > { %598 = vst.msk [vmem:[%s983_s29 + $0x18] sm:$0xff] %vm594_vm3, %v565_v41  ;;  %614 = vst.msk [vmem:[%s983_s29 + $0x98] sm:$0xff] %vm594_vm3, %v581_v42  ;;  %v563_v47 = vmax.f32 %v439_v43, 0.0  ;;  %v579_v48 = vmax.f32 %v503_v44, 0.0  ;;  %v460_v49 = vadd.f32 %v790_v45, %v975_v22  ;;  %v524_v50 = vadd.f32 %v806_v46, %v975_v22 }
  0xe3   : > { %v451_v51 = vpop.f32.mrf.mxu0  ;;  %v515_v52 = vpop.f32.mrf.mxu1 }
  0xe4   : > { %596 = vst.msk [vmem:[%s983_s29 + $0x8] sm:$0xff] %vm594_vm3, %v563_v47  ;;  %612 = vst.msk [vmem:[%s983_s29 + $0x88] sm:$0xff] %vm594_vm3, %v579_v48  ;;  %v568_v53 = vmax.f32 %v460_v49, 0.0  ;;  %v584_v54 = vmax.f32 %v524_v50, 0.0  ;;  %v452_v55 = vadd.f32 %v975_v22, %v451_v51  ;;  %v516_v56 = vadd.f32 %v975_v22, %v515_v52 }
  0xe5   : > { %v791_v57 = vpop.f32.mrf.mxu0  ;;  %v807_v58 = vpop.f32.mrf.mxu1 }
  0xe6   : > { %601 = vst.msk [vmem:[%s983_s29 + $0x30] sm:$0xff] %vm594_vm3, %v568_v53  ;;  %617 = vst.msk [vmem:[%s983_s29 + $0xb0] sm:$0xff] %vm594_vm3, %v584_v54  ;;  %v566_v59 = vmax.f32 %v452_v55, 0.0  ;;  %v582_v60 = vmax.f32 %v516_v56, 0.0  ;;  %v463_v61 = vadd.f32 %v791_v57, %v975_v22  ;;  %v527_v62 = vadd.f32 %v807_v58, %v975_v22 }
  0xe7   : > { %v454_v63 = vpop.f32.mrf.mxu0  ;;  %v518_v0 = vpop.f32.mrf.mxu1 }
  0xe8   : > { %599 = vst.msk [vmem:[%s983_s29 + $0x20] sm:$0xff] %vm594_vm3, %v566_v59  ;;  %615 = vst.msk [vmem:[%s983_s29 + $0xa0] sm:$0xff] %vm594_vm3, %v582_v60  ;;  %v569_v1 = vmax.f32 %v463_v61, 0.0  ;;  %v585_v2 = vmax.f32 %v527_v62, 0.0  ;;  %v455_v3 = vadd.f32 %v975_v22, %v454_v63  ;;  %v519_v4 = vadd.f32 %v975_v22, %v518_v0 }
  0xe9   : > { %v794_v5 = vpop.f32.mrf.mxu0  ;;  %v810_v6 = vpop.f32.mrf.mxu1 }
  0xea   : > { %602 = vst.msk [vmem:[%s983_s29 + $0x38] sm:$0xff] %vm594_vm3, %v569_v1  ;;  %618 = vst.msk [vmem:[%s983_s29 + $0xb8] sm:$0xff] %vm594_vm3, %v585_v2  ;;  %v567_v7 = vmax.f32 %v455_v3, 0.0  ;;  %v583_v8 = vmax.f32 %v519_v4, 0.0  ;;  %v476_v9 = vadd.f32 %v794_v5, %v975_v22  ;;  %v540_v10 = vadd.f32 %v810_v6, %v975_v22 }
  0xeb   : > { %v467_v11 = vpop.f32.mrf.mxu0  ;;  %v531_v12 = vpop.f32.mrf.mxu1 }
  0xec   : > { %600 = vst.msk [vmem:[%s983_s29 + $0x28] sm:$0xff] %vm594_vm3, %v567_v7  ;;  %616 = vst.msk [vmem:[%s983_s29 + $0xa8] sm:$0xff] %vm594_vm3, %v583_v8  ;;  %v572_v13 = vmax.f32 %v476_v9, 0.0  ;;  %v588_v14 = vmax.f32 %v540_v10, 0.0  ;;  %v468_v15 = vadd.f32 %v975_v22, %v467_v11  ;;  %v532_v16 = vadd.f32 %v975_v22, %v531_v12 }
  0xed   : > { %v795_v17 = vpop.f32.mrf.mxu0  ;;  %v811_v18 = vpop.f32.mrf.mxu1 }
  0xee   : > { %605 = vst.msk [vmem:[%s983_s29 + $0x50] sm:$0xff] %vm594_vm3, %v572_v13  ;;  %621 = vst.msk [vmem:[%s983_s29 + $0xd0] sm:$0xff] %vm594_vm3, %v588_v14  ;;  %v570_v19 = vmax.f32 %v468_v15, 0.0  ;;  %v586_v20 = vmax.f32 %v532_v16, 0.0  ;;  %v479_v21 = vadd.f32 %v795_v17, %v975_v22  ;;  %v543_v23 = vadd.f32 %v811_v18, %v975_v22 }
  0xef   : > { %v470_v24 = vpop.f32.mrf.mxu0  ;;  %v534_v25 = vpop.f32.mrf.mxu1 }
  0xf0   : > { %603 = vst.msk [vmem:[%s983_s29 + $0x40] sm:$0xff] %vm594_vm3, %v570_v19  ;;  %619 = vst.msk [vmem:[%s983_s29 + $0xc0] sm:$0xff] %vm594_vm3, %v586_v20  ;;  %v573_v26 = vmax.f32 %v479_v21, 0.0  ;;  %v589_v27 = vmax.f32 %v543_v23, 0.0  ;;  %v471_v28 = vadd.f32 %v975_v22, %v470_v24  ;;  %v535_v29 = vadd.f32 %v975_v22, %v534_v25 }
  0xf1   : > { %v798_v30 = vpop.f32.mrf.mxu0  ;;  %v814_v31 = vpop.f32.mrf.mxu1 }
  0xf2   : > { %606 = vst.msk [vmem:[%s983_s29 + $0x58] sm:$0xff] %vm594_vm3, %v573_v26  ;;  %622 = vst.msk [vmem:[%s983_s29 + $0xd8] sm:$0xff] %vm594_vm3, %v589_v27  ;;  %v571_v32 = vmax.f32 %v471_v28, 0.0  ;;  %v587_v33 = vmax.f32 %v535_v29, 0.0  ;;  %v492_v34 = vadd.f32 %v798_v30, %v975_v22  ;;  %v556_v35 = vadd.f32 %v814_v31, %v975_v22 }
  0xf3   : > { %v483_v36 = vpop.f32.mrf.mxu0  ;;  %v547_v37 = vpop.f32.mrf.mxu1 }
  0xf4   : > { %604 = vst.msk [vmem:[%s983_s29 + $0x48] sm:$0xff] %vm594_vm3, %v571_v32  ;;  %620 = vst.msk [vmem:[%s983_s29 + $0xc8] sm:$0xff] %vm594_vm3, %v587_v33  ;;  %v576_v38 = vmax.f32 %v492_v34, 0.0  ;;  %v592_v39 = vmax.f32 %v556_v35, 0.0  ;;  %v484_v40 = vadd.f32 %v975_v22, %v483_v36  ;;  %v548_v41 = vadd.f32 %v975_v22, %v547_v37 }
  0xf5   : > { %v799_v42 = vpop.f32.mrf.mxu0  ;;  %v815_v43 = vpop.f32.mrf.mxu1 }
  0xf6   : > { %609 = vst.msk [vmem:[%s983_s29 + $0x70] sm:$0xff] %vm594_vm3, %v576_v38  ;;  %625 = vst.msk [vmem:[%s983_s29 + $0xf0] sm:$0xff] %vm594_vm3, %v592_v39  ;;  %v574_v44 = vmax.f32 %v484_v40, 0.0  ;;  %v590_v45 = vmax.f32 %v548_v41, 0.0  ;;  %v495_v46 = vadd.f32 %v799_v42, %v975_v22  ;;  %v559_v47 = vadd.f32 %v815_v43, %v975_v22 }
  0xf7   : > { %v486_v48 = vpop.f32.mrf.mxu0  ;;  %v550_v49 = vpop.f32.mrf.mxu1 }
  0xf8   : > { %607 = vst.msk [vmem:[%s983_s29 + $0x60] sm:$0xff] %vm594_vm3, %v574_v44  ;;  %623 = vst.msk [vmem:[%s983_s29 + $0xe0] sm:$0xff] %vm594_vm3, %v590_v45  ;;  %v577_v50 = vmax.f32 %v495_v46, 0.0  ;;  %v593_v51 = vmax.f32 %v559_v47, 0.0  ;;  %v487_v52 = vadd.f32 %v975_v22, %v486_v48  ;;  %v551_v53 = vadd.f32 %v975_v22, %v550_v49 }
  0xfa   : > { %610 = vst.msk [vmem:[%s983_s29 + $0x78] sm:$0xff] %vm594_vm3, %v577_v50  ;;  %626 = vst.msk [vmem:[%s983_s29 + $0xf8] sm:$0xff] %vm594_vm3, %v593_v51  ;;  %v575_v54 = vmax.f32 %v487_v52, 0.0  ;;  %v591_v55 = vmax.f32 %v551_v53, 0.0 }
  0xfc   : > { %608 = vst.msk [vmem:[%s983_s29 + $0x68] sm:$0xff] %vm594_vm3, %v575_v54  ;;  %624 = vst.msk [vmem:[%s983_s29 + $0xe8] sm:$0xff] %vm594_vm3, %v591_v55 }
  0xfd PF: > { %s13_s14 = sadd.s32 1, %s885_s14   ;;  %s1092_s12 = smov %s881_s13 }
  0xfe   : > { %p10_p5 = scmp.ge.s32.totalorder %s13_s14, 4   ;;  %s1093_s13 = smov %s1095_s15 }
 0x100   :  { %12 = sbr.rel (!%p10_p5) target bundleno = 2 (0x2), region = 62 }

// kernel: pan_forward.11
= control target key start
LH: loop header
LB: loop body
LE: loop exit
PB: predicated region body
PF: predicated region fallthrough
CT: control target
= control target key end

     0   :  { %s666_s12 = smov 0   ;;  %s668_s13 = smov 0   ;;  %s768_s0 = inlined_call_operand.vmem [shape: bf16[2,64,144], index: 0, kind: input, shape index: {}]   ;;  %s769_s1 = inlined_call_operand.vmem [shape: bf16[144,24], index: 1, kind: input, shape index: {}]   ;;  %s770_s2 = inlined_call_operand.vmem [shape: f32[1,24], index: 2, kind: input, shape index: {}]   ;;  %s771_s3 = inlined_call_operand.vmem [shape: f32[2,64,24], index: 3, kind: output, shape index: {}]  }
   0x1   :  { %s670_s14 = smov 0  }
   0x2 LB: > { %s25_s15 = sadd.s32 1, %s639_s13  ;;  %p526_p0 = scmp.ge.s32.totalorder %s643_s14, 1  ;;  %s643_s14 = sphi %s670_s14, %s13_s14   ;;  %s639_s13 = sphi %s668_s13, %s773_s13   ;;  %s635_s12 = sphi %s666_s12, %s772_s12  }
   0x3   : > { %p27_p1 = scmp.ge.s32.totalorder %s25_s15, 2  ;;  %p159_p2 = scmp.lt.s32.totalorder %s643_s14, 3 }
   0x5   : > { %s775_s15 = smov (%p27_p1, %s25_s15), 0  ;;  %p160_p3 = pnand %p526_p0, %p159_p2 }
   0x6   : > { %p193_p4 = scmp.lt.s32.totalorder (!%p160_p3), %s635_s12, 1 }
   0x7   : > { %163 = sbr.rel (%p160_p3) target bundleno = 259 (0x103), region = 32 }
   0xc   : > { %v600_v0 = vld [vmem:[%s769_s1 + $0x38] sm:$0xff]   ;;  %v645_v1 = vmov 0   ;;  %v601_v2 = vld [vmem:[%s769_s1 + $0x30] sm:$0xff]   ;;  %s777_s12 = smov (!%p193_p4, %s635_s12), 1  ;;  %v602_v3 = vld [vmem:[%s769_s1 + $0x28] sm:$0xff]   ;;  %vm337_vm0 = vcmask 130048  }
   0xd   : > { %350 = vmatprep.subr.bf16.mxu0 %v645_v1  ;;  %557 = vmatprep.subr.bf16.mxu1 %v645_v1  ;;  %s555_s20 = sshll.u32 %s777_s12, 6  ;;  %v603_v4 = vld [vmem:[%s769_s1 + $0x20] sm:$0xff]   ;;  %v604_v7 = vld [vmem:[%s769_s1 + $0x18] sm:$0xff]   ;;  %v605_v8 = vld [vmem:[%s769_s1 + $0x10] sm:$0xff]   ;;  %vm423_vm1 = vcmask 195584  }
   0xe   : > { %351 = vmatpush1.bf16.msra.mxu0 %v600_v0  ;;  %566 = vmatpush1.bf16.msra.mxu1 %v600_v0  ;;  %s701_s25 = scalar_lea.vmem %s768_s0, %s555_s20  ;;  %v606_v9 = vld [vmem:[%s769_s1 + $0x8] sm:$0xff]   ;;  %v607_v10 = vld [vmem:[%s769_s1] sm:$0xff]   ;;  %s741_s19 = scalar_lea.vmem %s771_s3, %s555_s20 }
   0xf   : > { %352 = vmatprep.subr.bf16.mxu0 %v645_v1  ;;  %558 = vmatprep.subr.bf16.mxu1 %v645_v1  ;;  %v611_v5 = vld [vmem:[%s701_s25 + $0x4] ss:$8 sps:$4 sm:$0xff]   ;;  %v609_v12 = vld [vmem:[%s701_s25] ss:$8 sps:$4 sm:$0xff]   ;;  %v615_v14 = vld [vmem:[%s701_s25 + $0x14] ss:$8 sps:$4 sm:$0xff]  }
  0x10   : > { %v614_v6 = vld [vmem:[%s701_s25 + $0x24] ss:$8 sps:$4 sm:$0xff]   ;;  %549 = vmatprep.mubr.msk.bf16.mxu0 %vm337_vm0, %v611_v5  ;;  %v612_v13 = vld [vmem:[%s701_s25 + $0x20] ss:$8 sps:$4 sm:$0xff]   ;;  %v617_v15 = vld [vmem:[%s701_s25 + $0x34] ss:$8 sps:$4 sm:$0xff]  }
  0x11   : > { %551 = vmatprep.mubr.msk.bf16.mxu1 %vm337_vm0, %v614_v6  ;;  %v608_v11 = vld [vmem:[%s769_s1 + $0x40] sm:$0xff]   ;;  %v619_v16 = vld [vmem:[%s701_s25 + $0x10] ss:$8 sps:$4 sm:$0xff]  }
  0x12   : > { %353 = vmatpush1.bf16.msra.mxu0 %v601_v2  ;;  %567 = vmatpush1.bf16.msra.mxu1 %v601_v2  ;;  %v620_v17 = vld [vmem:[%s701_s25 + $0x30] ss:$8 sps:$4 sm:$0xff]   ;;  %v531_v18 = vld [vmem:[%s770_s2] ss:$0 sm:$0xff] }
  0x13   : > { %354 = vmatprep.subr.bf16.mxu0 %v645_v1  ;;  %559 = vmatprep.subr.bf16.mxu1 %v645_v1 }
  0x16   : > { %355 = vmatpush1.bf16.msra.mxu0 %v602_v3  ;;  %568 = vmatpush1.bf16.msra.mxu1 %v602_v3 }
  0x17   : > { %356 = vmatprep.subr.bf16.mxu0 %v645_v1  ;;  %560 = vmatprep.subr.bf16.mxu1 %v645_v1 }
  0x1a   : > { %357 = vmatpush1.bf16.msra.mxu0 %v603_v4  ;;  %569 = vmatpush1.bf16.msra.mxu1 %v603_v4 }
  0x1b   : > { %358 = vmatprep.subr.bf16.mxu0 %v645_v1  ;;  %561 = vmatprep.subr.bf16.mxu1 %v645_v1 }
  0x1e   : > { %359 = vmatpush1.bf16.msra.mxu0 %v604_v7  ;;  %570 = vmatpush1.bf16.msra.mxu1 %v604_v7 }
  0x1f   : > { %360 = vmatprep.subr.bf16.mxu0 %v645_v1  ;;  %562 = vmatprep.subr.bf16.mxu1 %v645_v1 }
  0x22   : > { %361 = vmatpush1.bf16.msra.mxu0 %v605_v8  ;;  %571 = vmatpush1.bf16.msra.mxu1 %v605_v8 }
  0x23   : > { %362 = vmatprep.subr.bf16.mxu0 %v645_v1  ;;  %563 = vmatprep.subr.bf16.mxu1 %v645_v1 }
  0x26   : > { %363 = vmatpush1.bf16.msra.mxu0 %v606_v9  ;;  %572 = vmatpush1.bf16.msra.mxu1 %v606_v9 }
  0x27   : > { %364 = vmatprep.subr.bf16.mxu0 %v645_v1  ;;  %564 = vmatprep.subr.bf16.mxu1 %v645_v1 }
  0x2a   : > { %365 = vmatpush1.bf16.msra.mxu0 %v607_v10  ;;  %573 = vmatpush1.bf16.msra.mxu1 %v607_v10 }
  0x2b   : > { %380 = vmatprep.subr.bf16.mxu0 %v645_v1  ;;  %565 = vmatprep.subr.bf16.mxu1 %v645_v1 }
  0x2e   : > { %381 = vmatpush2.bf16.msra.mxu0 %v608_v11  ;;  %574 = vmatpush2.bf16.msra.mxu1 %v608_v11 }
  0x31   : > { %383 = vmatmul.mubr.bf16.vlgmr.msra.gmra.mxu0 %v609_v12  ;;  %399 = vmatmul.mubr.bf16.vlgmr.msra.gmra.mxu1 %v612_v13 }
  0x32   : > { %550 = vmatprep.mubr.msk.bf16.mxu0 %vm337_vm0, %v615_v14  ;;  %552 = vmatprep.mubr.msk.bf16.mxu1 %vm337_vm0, %v617_v15 }
  0x39   : > { %391 = vmatmul.mubr.bf16.gmra.mxu0 %v619_v16  ;;  %407 = vmatmul.mubr.bf16.gmra.mxu1 %v620_v17 }
  0xf1   : > { %v384_v19 = vpop.f32.mrf.mxu0  ;;  %v400_v20 = vpop.f32.mrf.mxu1 }
  0xf2   : > { %v385_v21 = vadd.f32 %v531_v18, %v384_v19  ;;  %v401_v22 = vadd.f32 %v531_v18, %v400_v20 }
  0xf3   : > { %v386_v23 = vpop.f32.mrf.mxu0  ;;  %v402_v24 = vpop.f32.mrf.mxu1 }
  0xf4   : > { %v415_v25 = vmax.f32 %v385_v21, 0.0  ;;  %v419_v26 = vmax.f32 %v401_v22, 0.0 }
  0xf5   : > { %v387_v27 = vpop.f32.mrf.mxu0  ;;  %v403_v28 = vpop.f32.mrf.mxu1 }
  0xf6   : > { %424 = vst.msk [vmem:[%s741_s19] sm:$0xff] %vm423_vm1, %v415_v25  ;;  %428 = vst.msk [vmem:[%s741_s19 + $0x20] sm:$0xff] %vm423_vm1, %v419_v26  ;;  %v388_v29 = vadd.f32 %v531_v18, %v387_v27  ;;  %v404_v30 = vadd.f32 %v531_v18, %v403_v28 }
  0xf7   : > { %v389_v31 = vpop.f32.mrf.mxu0  ;;  %v405_v32 = vpop.f32.mrf.mxu1 }
  0xf8   : > { %v416_v33 = vmax.f32 %v388_v29, 0.0  ;;  %v420_v34 = vmax.f32 %v404_v30, 0.0 }
  0xf9   : > { %v392_v35 = vpop.f32.mrf.mxu0  ;;  %v408_v36 = vpop.f32.mrf.mxu1 }
  0xfa   : > { %425 = vst.msk [vmem:[%s741_s19 + $0x8] sm:$0xff] %vm423_vm1, %v416_v33  ;;  %429 = vst.msk [vmem:[%s741_s19 + $0x28] sm:$0xff] %vm423_vm1, %v420_v34  ;;  %v393_v37 = vadd.f32 %v531_v18, %v392_v35  ;;  %v409_v38 = vadd.f32 %v531_v18, %v408_v36 }
  0xfb   : > { %v394_v39 = vpop.f32.mrf.mxu0  ;;  %v410_v40 = vpop.f32.mrf.mxu1 }
  0xfc   : > { %v417_v41 = vmax.f32 %v393_v37, 0.0  ;;  %v421_v42 = vmax.f32 %v409_v38, 0.0 }
  0xfd   : > { %v395_v43 = vpop.f32.mrf.mxu0  ;;  %v411_v44 = vpop.f32.mrf.mxu1 }
  0xfe   : > { %426 = vst.msk [vmem:[%s741_s19 + $0x10] sm:$0xff] %vm423_vm1, %v417_v41  ;;  %430 = vst.msk [vmem:[%s741_s19 + $0x30] sm:$0xff] %vm423_vm1, %v421_v42  ;;  %v396_v45 = vadd.f32 %v531_v18, %v395_v43  ;;  %v412_v46 = vadd.f32 %v531_v18, %v411_v44 }
  0xff   : > { %v397_v47 = vpop.f32.mrf.mxu0  ;;  %v413_v48 = vpop.f32.mrf.mxu1 }
 0x100   : > { %v418_v49 = vmax.f32 %v396_v45, 0.0  ;;  %v422_v50 = vmax.f32 %v412_v46, 0.0 }
 0x102   : > { %427 = vst.msk [vmem:[%s741_s19 + $0x18] sm:$0xff] %vm423_vm1, %v418_v49  ;;  %431 = vst.msk [vmem:[%s741_s19 + $0x38] sm:$0xff] %vm423_vm1, %v422_v50 }
 0x103 PF: > { %s13_s14 = sadd.s32 1, %s643_s14   ;;  %s772_s12 = smov %s639_s13 }
 0x104   : > { %p10_p5 = scmp.ge.s32.totalorder %s13_s14, 4   ;;  %s773_s13 = smov %s775_s15 }
 0x106   :  { %12 = sbr.rel (!%p10_p5) target bundleno = 2 (0x2), region = 62 }

// kernel: pan_forward.14
= control target key start
LH: loop header
LB: loop body
LE: loop exit
PB: predicated region body
PF: predicated region fallthrough
CT: control target
= control target key end

     0   :  { %s560_s15 = smov 0   ;;  %s562_s16 = smov 0   ;;  %s608_s0 = inlined_call_operand.vmem [shape: bf16[2,16,40], index: 0, kind: input, shape index: {}]   ;;  %s609_s1 = inlined_call_operand.vmem [shape: bf16[40,32], index: 1, kind: input, shape index: {}]   ;;  %s610_s2 = inlined_call_operand.vmem [shape: f32[1,32], index: 2, kind: input, shape index: {}]   ;;  %s611_s3 = inlined_call_operand.vmem [shape: f32[2,1,32], index: 3, kind: input, shape index: {}]   ;;  %s612_s4 = inlined_call_operand.vmem [shape: f32[2,16,32], index: 4, kind: output, shape index: {}]  }
   0x1   :  { %s564_s17 = smov 0  }
   0x2 LB: > { %s26_s18 = sadd.s32 1, %s527_s16  ;;  %p449_p0 = scmp.ge.s32.totalorder %s531_s17, 1  ;;  %s531_s17 = sphi %s564_s17, %s14_s17   ;;  %s527_s16 = sphi %s562_s16, %s614_s16   ;;  %s523_s15 = sphi %s560_s15, %s613_s15  }
   0x3   : > { %p28_p1 = scmp.ge.s32.totalorder %s26_s18, 2  ;;  %p191_p2 = scmp.lt.s32.totalorder %s531_s17, 3 }
   0x5   : > { %s616_s18 = smov (%p28_p1, %s26_s18), 0  ;;  %p192_p3 = pnand %p449_p0, %p191_p2 }
   0x6   : > { %p229_p4 = scmp.lt.s32.totalorder (!%p192_p3), %s523_s15, 1 }
   0x7   : > { %195 = sbr.rel (%p192_p3) target bundleno = 229 (0xe5), region = 36 }
   0xc   : > { %v505_v0 = vld [vmem:[%s609_s1 + $0x10] ss:$0 sps:$4 sm:$0xff]   ;;  %vm290_vm0 = vcmask 1043456   ;;  %v533_v1 = vmov 0.0   ;;  %vm534_vm1 = vmmov 0   ;;  %v506_v3 = vld [vmem:[%s609_s1 + $0x8] sm:$0xff]  }
   0xd   : > { %469 = vmatprep.subr.bf16.mxu0 %v533_v1  ;;  %v292_v2 = vsel %vm290_vm0, %v505_v0, 0  ;;  %475 = vmatprep.mubr.msk.bf16.mxu0 %vm534_vm1, %v533_v1  ;;  %s618_s15 = smov (!%p229_p4, %s523_s15), 1  ;;  %v507_v4 = vld [vmem:[%s609_s1] sm:$0xff]   ;;  %vm286_vm2 = vcmask 326656   ;;  %vm346_vm3 = vcmask 261120  }
   0xe   : > { %470 = vmatpush3.bf16.msra.mxu0 %v292_v2  ;;  %s463_s25 = sshll.u32 %s618_s15, 3  ;;  %s240_s5 = scalar_lea.vmem %s611_s3, %s618_s15  ;;  %v454_v6 = vld [vmem:[%s610_s2] ss:$0 sm:$0xff] }
   0xf   : > { %471 = vmatprep.subr.bf16.mxu0 %v533_v1  ;;  %s236_s28 = scalar_lea.vmem %s608_s0, %s463_s25  ;;  %v460_v8 = vld [vmem:[%s240_s5] ss:$0 sm:$0xff]  ;;  %s464_s8 = sshll.u32 %s618_s15, 4 }
  0x10   : > { %v508_v5 = vld [vmem:[%s236_s28] sm:$0xff]   ;;  %s249_s11 = scalar_lea.vmem %s612_s4, %s464_s8 }
  0x12   : > { %472 = vmatpush3.bf16.msra.mxu0 %v506_v3 }
  0x13   : > { %473 = vmatprep.subr.bf16.mxu0 %v533_v1 }
  0x16   : > { %474 = vmatpush3.bf16.msra.mxu0 %v507_v4 }
  0x19   : > { %476 = vmatmul.mubr.msk.bf16.vlgmr.msra.gmra.mxu0 %vm286_vm2, %v508_v5 }
  0xd9   : > { %v328_v7 = vpop.f32.mrf.mxu0 }
  0xda   : > { %v329_v9 = vadd.f32 %v454_v6, %v328_v7 }
  0xdb   : > { %v477_v10 = vpop.f32.mrf.mxu0 }
  0xdc   : > { %v342_v11 = vadd.f32 %v460_v8, %v329_v9 }
  0xdd   : > { %v331_v12 = vpop.f32.mrf.mxu0 }
  0xde   : > { %v344_v13 = vmax.f32 %v342_v11, 0.0  ;;  %v332_v14 = vadd.f32 %v454_v6, %v331_v12 }
  0xdf   : > { %v478_v15 = vpop.f32.mrf.mxu0 }
  0xe0   : > { %347 = vst.msk [vmem:[%s249_s11] sm:$0xff] %vm346_vm3, %v344_v13  ;;  %v343_v16 = vadd.f32 %v460_v8, %v332_v14 }
  0xe2   : > { %v345_v17 = vmax.f32 %v343_v16, 0.0 }
  0xe4   : > { %348 = vst.msk [vmem:[%s249_s11 + $0x8] sm:$0xff] %vm346_vm3, %v345_v17 }
  0xe5 PF: > { %s14_s17 = sadd.s32 1, %s531_s17   ;;  %s613_s15 = smov %s527_s16 }
  0xe6   : > { %p11_p5 = scmp.ge.s32.totalorder %s14_s17, 4   ;;  %s614_s16 = smov %s616_s18 }
  0xe8   :  { %13 = sbr.rel (!%p11_p5) target bundleno = 2 (0x2), region = 69 }

// kernel: pan_forward.13
= control target key start
LH: loop header
LB: loop body
LE: loop exit
PB: predicated region body
PF: predicated region fallthrough
CT: control target
= control target key end

     0   :  { %s311_s6 = smov 0   ;;  %s313_s7 = smov 0   ;;  %s347_s0 = inlined_call_operand.vmem [shape: f32[2,16,40], index: 0, kind: input, shape index: {}]   ;;  %s348_s1 = inlined_call_operand.vmem [shape: f32[2,1,40], index: 1, kind: output, shape index: {}]  }
   0x1   :  { %s315_s8 = smov 0  }
   0x2 LB: > { %s23_s9 = sadd.s32 1, %s294_s7  ;;  %p245_p0 = scmp.ge.s32.totalorder %s298_s8, 1  ;;  %s298_s8 = sphi %s315_s8, %s11_s8   ;;  %s294_s7 = sphi %s313_s7, %s350_s7   ;;  %s290_s6 = sphi %s311_s6, %s349_s6  }
   0x3   : > { %p25_p1 = scmp.ge.s32.totalorder %s23_s9, 2  ;;  %p106_p2 = scmp.lt.s32.totalorder %s298_s8, 3 }
   0x5   : > { %s352_s9 = smov (%p25_p1, %s23_s9), 0  ;;  %p107_p3 = pnand %p245_p0, %p106_p2 }
   0x6   : > { %p129_p4 = scmp.lt.s32.totalorder (!%p107_p3), %s290_s6, 1 }
   0x7   : > { %110 = sbr.rel (%p107_p3) target bundleno = 44 (0x2c), region = 24 }
   0xc   : > { %s354_s6 = smov (!%p129_p4, %s290_s6), 1  ;;  %vm145_vm0 = vcmask 319488   ;;  %vm161_vm1 = vcmask 326656   ;;  %v300_v0 = vmov 0.0  }
   0xd   : > { %s250_s10 = sshll.u32 %s354_s6, 4  ;;  %s140_s13 = scalar_lea.vmem %s348_s1, %s354_s6 }
   0xe   : > { %s136_s16 = scalar_lea.vmem %s347_s0, %s250_s10  ;;  %146 = vst.msk [vmem:[%s140_s13] sm:$0x1] %vm145_vm0, %v300_v0 }
   0xf   : > { %v157_v1 = vld [vmem:[%s136_s16] sm:$0xff]  ;;  %v158_v2 = vld [vmem:[%s136_s16 + $0x8] sm:$0xff] }
  0x10   : > { %v162_v3 = vsel %vm161_vm1, %v157_v1, 0.0  ;;  %v163_v4 = vsel %vm161_vm1, %v158_v2, 0.0 }
  0x11   : > { %v164_v5 = vadd.f32 %v163_v4, %v162_v3 }
  0x13   : > { %v165_v6 = vrot.slane %v164_v5, 4 }
  0x15   : > { %v166_v7 = vadd.f32 %v165_v6, %v164_v5  ;;  %v156_v11 = vld [vmem:[%s140_s13] sm:$0x1] }
  0x17   : > { %v167_v8 = vrot.slane %v166_v7, 2 }
  0x19   : > { %v168_v9 = vadd.f32 %v167_v8, %v166_v7 }
  0x1b   : > { %v169_v10 = vrot.slane %v168_v9, 1 }
  0x1d   : > { %v170_v12 = vadd.f32 %v169_v10, %v168_v9 }
  0x1f   : > { %v171_v13 = vadd.f32 %v170_v12, %v156_v11 }
  0x21   : > { %173 = vst.msk [vmem:[%s140_s13] sm:$0x1] %vm145_vm0, %v171_v13 }
  0x28   : > { %v177_v14 = vld [vmem:[%s140_s13] sm:$0x1] }
  0x29   : > { %v178_v15 = vmul.f32 0.0625, %v177_v14 }
  0x2b   : > { %179 = vst.msk [vmem:[%s140_s13] sm:$0x1] %vm145_vm0, %v178_v15 }
  0x2c PF: > { %s11_s8 = sadd.s32 1, %s298_s8   ;;  %s349_s6 = smov %s294_s7 }
  0x2d   : > { %p8_p5 = scmp.ge.s32.totalorder %s11_s8, 4   ;;  %s350_s7 = smov %s352_s9 }
  0x2f   :  { %10 = sbr.rel (!%p8_p5) target bundleno = 2 (0x2), region = 62 }

// kernel: pan_forward.12
= control target key start
LH: loop header
LB: loop body
LE: loop exit
PB: predicated region body
PF: predicated region fallthrough
CT: control target
= control target key end

     0   :  { %s602_s12 = smov 0   ;;  %s604_s13 = smov 0   ;;  %s691_s0 = inlined_call_operand.vmem [shape: bf16[2,16,216], index: 0, kind: input, shape index: {}]   ;;  %s692_s1 = inlined_call_operand.vmem [shape: bf16[216,40], index: 1, kind: input, shape index: {}]   ;;  %s693_s2 = inlined_call_operand.vmem [shape: f32[1,40], index: 2, kind: input, shape index: {}]   ;;  %s694_s3 = inlined_call_operand.vmem [shape: f32[2,16,40], index: 3, kind: output, shape index: {}]  }
   0x1   :  { %s606_s14 = smov 0  }
   0x2 LB: > { %s25_s15 = sadd.s32 1, %s575_s13  ;;  %p488_p0 = scmp.ge.s32.totalorder %s579_s14, 1  ;;  %s579_s14 = sphi %s606_s14, %s13_s14   ;;  %s575_s13 = sphi %s604_s13, %s696_s13   ;;  %s571_s12 = sphi %s602_s12, %s695_s12  }
   0x3   : > { %p27_p1 = scmp.ge.s32.totalorder %s25_s15, 2  ;;  %p159_p2 = scmp.lt.s32.totalorder %s579_s14, 3 }
   0x5   : > { %s698_s15 = smov (%p27_p1, %s25_s15), 0  ;;  %p160_p3 = pnand %p488_p0, %p159_p2 }
   0x6   : > { %p193_p4 = scmp.lt.s32.totalorder (!%p160_p3), %s571_s12, 1 }
   0x7   : > { %163 = sbr.rel (%p160_p3) target bundleno = 271 (0x10f), region = 32 }
   0xc   : > { %v540_v0 = vld [vmem:[%s692_s1 + $0x38] sm:$0xff]   ;;  %v581_v1 = vmov 0   ;;  %v541_v2 = vld [vmem:[%s692_s1 + $0x30] sm:$0xff]   ;;  %s700_s12 = smov (!%p193_p4, %s571_s12), 1  ;;  %v542_v3 = vld [vmem:[%s692_s1 + $0x28] sm:$0xff]   ;;  %vm340_vm0 = vcmask 719872  }
   0xd   : > { %348 = vmatprep.subr.bf16.mxu0 %v581_v1  ;;  %s513_s22 = sshll.u32 %s700_s12, 4  ;;  %v543_v4 = vld [vmem:[%s692_s1 + $0x20] sm:$0xff]   ;;  %v544_v5 = vld [vmem:[%s692_s1 + $0x18] sm:$0xff]   ;;  %v545_v7 = vld [vmem:[%s692_s1 + $0x10] sm:$0xff]   ;;  %vm344_vm1 = vcmask 1043456   ;;  %vm391_vm2 = vcmask 326656  }
   0xe   : > { %349 = vmatpush1.bf16.msra.mxu0 %v540_v0  ;;  %s640_s27 = scalar_lea.vmem %s691_s0, %s513_s22  ;;  %v546_v8 = vld [vmem:[%s692_s1 + $0x8] sm:$0xff]   ;;  %v547_v9 = vld [vmem:[%s692_s1] sm:$0xff]   ;;  %v550_v13 = vld [vmem:[%s692_s1 + $0x58] sm:$0xff]   ;;  %s211_s4 = scalar_lea.vmem %s694_s3, %s513_s22 }
   0xf   : > { %350 = vmatprep.subr.bf16.mxu0 %v581_v1  ;;  %v556_v6 = vld [vmem:[%s640_s27 + $0x4] ss:$8 sps:$4 sm:$0xff]   ;;  %v548_v10 = vld [vmem:[%s692_s1 + $0x68] ss:$0 sps:$4 sm:$0xff]   ;;  %v551_v14 = vld [vmem:[%s692_s1 + $0x50] sm:$0xff]  }
  0x10   : > { %510 = vmatprep.mubr.msk.bf16.mxu0 %vm340_vm0, %v556_v6  ;;  %v346_v11 = vsel %vm344_vm1, %v548_v10, 0  ;;  %v549_v12 = vld [vmem:[%s692_s1 + $0x60] sm:$0xff]   ;;  %v552_v15 = vld [vmem:[%s692_s1 + $0x48] sm:$0xff]  }
  0x11   : > { %v553_v16 = vld [vmem:[%s692_s1 + $0x40] sm:$0xff]  }
  0x12   : > { %351 = vmatpush1.bf16.msra.mxu0 %v541_v2  ;;  %v554_v17 = vld [vmem:[%s640_s27] ss:$8 sps:$4 sm:$0xff]  }
  0x13   : > { %352 = vmatprep.subr.bf16.mxu0 %v581_v1  ;;  %v493_v18 = vld [vmem:[%s693_s2] ss:$0 sm:$0xff] }
  0x16   : > { %353 = vmatpush1.bf16.msra.mxu0 %v542_v3 }
  0x17   : > { %354 = vmatprep.subr.bf16.mxu0 %v581_v1 }
  0x1a   : > { %355 = vmatpush1.bf16.msra.mxu0 %v543_v4 }
  0x1b   : > { %356 = vmatprep.subr.bf16.mxu0 %v581_v1 }
  0x1e   : > { %357 = vmatpush1.bf16.msra.mxu0 %v544_v5 }
  0x1f   : > { %358 = vmatprep.subr.bf16.mxu0 %v581_v1 }
  0x22   : > { %359 = vmatpush1.bf16.msra.mxu0 %v545_v7 }
  0x23   : > { %360 = vmatprep.subr.bf16.mxu0 %v581_v1 }
  0x26   : > { %361 = vmatpush1.bf16.msra.mxu0 %v546_v8 }
  0x27   : > { %362 = vmatprep.subr.bf16.mxu0 %v581_v1 }
  0x2a   : > { %363 = vmatpush1.bf16.msra.mxu0 %v547_v9 }
  0x2b   : > { %368 = vmatprep.subr.bf16.mxu0 %v581_v1 }
  0x2e   : > { %369 = vmatpush2.bf16.msra.mxu0 %v346_v11 }
  0x2f   : > { %370 = vmatprep.subr.bf16.mxu0 %v581_v1 }
  0x32   : > { %371 = vmatpush2.bf16.msra.mxu0 %v549_v12 }
  0x33   : > { %372 = vmatprep.subr.bf16.mxu0 %v581_v1 }
  0x36   : > { %373 = vmatpush2.bf16.msra.mxu0 %v550_v13 }
  0x37   : > { %374 = vmatprep.subr.bf16.mxu0 %v581_v1 }
  0x3a   : > { %375 = vmatpush2.bf16.msra.mxu0 %v551_v14 }
  0x3b   : > { %376 = vmatprep.subr.bf16.mxu0 %v581_v1 }
  0x3e   : > { %377 = vmatpush2.bf16.msra.mxu0 %v552_v15 }
  0x3f   : > { %378 = vmatprep.subr.bf16.mxu0 %v581_v1 }
  0x42   : > { %379 = vmatpush2.bf16.msra.mxu0 %v553_v16 }
  0x45   : > { %381 = vmatmul.mubr.bf16.vlgmr.msra.gmra.mxu0 %v554_v17 }
 0x105   : > { %v382_v19 = vpop.f32.mrf.mxu0 }
 0x106   : > { %v383_v20 = vadd.f32 %v493_v18, %v382_v19 }
 0x107   : > { %v384_v21 = vpop.f32.mrf.mxu0 }
 0x108   : > { %v389_v22 = vmax.f32 %v383_v20, 0.0 }
 0x109   : > { %v385_v23 = vpop.f32.mrf.mxu0 }
 0x10a   : > { %392 = vst.msk [vmem:[%s211_s4] sm:$0xff] %vm391_vm2, %v389_v22  ;;  %v386_v24 = vadd.f32 %v493_v18, %v385_v23 }
 0x10b   : > { %v387_v25 = vpop.f32.mrf.mxu0 }
 0x10c   : > { %v390_v26 = vmax.f32 %v386_v24, 0.0 }
 0x10e   : > { %393 = vst.msk [vmem:[%s211_s4 + $0x8] sm:$0xff] %vm391_vm2, %v390_v26 }
 0x10f PF: > { %s13_s14 = sadd.s32 1, %s579_s14   ;;  %s695_s12 = smov %s575_s13 }
 0x110   : > { %p10_p5 = scmp.ge.s32.totalorder %s13_s14, 4   ;;  %s696_s13 = smov %s698_s15 }
 0x112   :  { %12 = sbr.rel (!%p10_p5) target bundleno = 2 (0x2), region = 62 }

// kernel: pan_forward.15
= control target key start
LH: loop header
LB: loop body
LE: loop exit
PB: predicated region body
PF: predicated region fallthrough
CT: control target
= control target key end

     0   :  { %s311_s6 = smov 0   ;;  %s313_s7 = smov 0   ;;  %s347_s0 = inlined_call_operand.vmem [shape: f32[2,16,32], index: 0, kind: input, shape index: {}]   ;;  %s348_s1 = inlined_call_operand.vmem [shape: f32[2,1,32], index: 1, kind: output, shape index: {}]  }
   0x1   :  { %s315_s8 = smov 0  }
   0x2 LB: > { %s23_s9 = sadd.s32 1, %s294_s7  ;;  %p245_p0 = scmp.ge.s32.totalorder %s298_s8, 1  ;;  %s298_s8 = sphi %s315_s8, %s11_s8   ;;  %s294_s7 = sphi %s313_s7, %s350_s7   ;;  %s290_s6 = sphi %s311_s6, %s349_s6  }
   0x3   : > { %p25_p1 = scmp.ge.s32.totalorder %s23_s9, 2  ;;  %p106_p2 = scmp.lt.s32.totalorder %s298_s8, 3 }
   0x5   : > { %s352_s9 = smov (%p25_p1, %s23_s9), 0  ;;  %p107_p3 = pnand %p245_p0, %p106_p2 }
   0x6   : > { %p129_p4 = scmp.lt.s32.totalorder (!%p107_p3), %s290_s6, 1 }
   0x7   : > { %110 = sbr.rel (%p107_p3) target bundleno = 44 (0x2c), region = 24 }
   0xc   : > { %s354_s6 = smov (!%p129_p4, %s290_s6), 1  ;;  %vm145_vm0 = vcmask 253952   ;;  %vm161_vm1 = vcmask 261120   ;;  %v300_v0 = vmov 0.0  }
   0xd   : > { %s250_s10 = sshll.u32 %s354_s6, 4  ;;  %s140_s13 = scalar_lea.vmem %s348_s1, %s354_s6 }
   0xe   : > { %s136_s16 = scalar_lea.vmem %s347_s0, %s250_s10  ;;  %146 = vst.msk [vmem:[%s140_s13] sm:$0x1] %vm145_vm0, %v300_v0 }
   0xf   : > { %v157_v1 = vld [vmem:[%s136_s16] sm:$0xff]  ;;  %v158_v2 = vld [vmem:[%s136_s16 + $0x8] sm:$0xff] }
  0x10   : > { %v162_v3 = vsel %vm161_vm1, %v157_v1, 0.0  ;;  %v163_v4 = vsel %vm161_vm1, %v158_v2, 0.0 }
  0x11   : > { %v164_v5 = vadd.f32 %v163_v4, %v162_v3 }
  0x13   : > { %v165_v6 = vrot.slane %v164_v5, 4 }
  0x15   : > { %v166_v7 = vadd.f32 %v165_v6, %v164_v5  ;;  %v156_v11 = vld [vmem:[%s140_s13] sm:$0x1] }
  0x17   : > { %v167_v8 = vrot.slane %v166_v7, 2 }
  0x19   : > { %v168_v9 = vadd.f32 %v167_v8, %v166_v7 }
  0x1b   : > { %v169_v10 = vrot.slane %v168_v9, 1 }
  0x1d   : > { %v170_v12 = vadd.f32 %v169_v10, %v168_v9 }
  0x1f   : > { %v171_v13 = vadd.f32 %v170_v12, %v156_v11 }
  0x21   : > { %173 = vst.msk [vmem:[%s140_s13] sm:$0x1] %vm145_vm0, %v171_v13 }
  0x28   : > { %v177_v14 = vld [vmem:[%s140_s13] sm:$0x1] }
  0x29   : > { %v178_v15 = vmul.f32 0.0625, %v177_v14 }
  0x2b   : > { %179 = vst.msk [vmem:[%s140_s13] sm:$0x1] %vm145_vm0, %v178_v15 }
  0x2c PF: > { %s11_s8 = sadd.s32 1, %s298_s8   ;;  %s349_s6 = smov %s294_s7 }
  0x2d   : > { %p8_p5 = scmp.ge.s32.totalorder %s11_s8, 4   ;;  %s350_s7 = smov %s352_s9 }
  0x2f   :  { %10 = sbr.rel (!%p8_p5) target bundleno = 2 (0x2), region = 62 }

// kernel: pan_forward.16
= control target key start
LH: loop header
LB: loop body
LE: loop exit
PB: predicated region body
PF: predicated region fallthrough
CT: control target
= control target key end

     0   :  { %s902_s18 = smov 0   ;;  %s904_s19 = smov 0   ;;  %s1065_s0 = inlined_call_operand.vmem [shape: bf16[2,64,216], index: 0, kind: input, shape index: {}]   ;;  %s1066_s1 = inlined_call_operand.vmem [shape: bf16[216,32], index: 1, kind: input, shape index: {}]   ;;  %s1067_s2 = inlined_call_operand.vmem [shape: f32[1,32], index: 2, kind: input, shape index: {}]   ;;  %s1068_s3 = inlined_call_operand.vmem [shape: f32[2,1,32], index: 3, kind: input, shape index: {}]   ;;  %s1069_s4 = inlined_call_operand.vmem [shape: f32[2,64,32], index: 4, kind: input, shape index: {}]   ;;  %s1070_s5 = inlined_call_operand.vmem [shape: f32[2,64,32], index: 5, kind: output, shape index: {}]  }
   0x1   :  { %s906_s20 = smov 0  }
   0x2 LB: > { %s27_s21 = sadd.s32 1, %s865_s19  ;;  %p728_p0 = scmp.ge.s32.totalorder %s869_s20, 1  ;;  %s869_s20 = sphi %s906_s20, %s15_s20   ;;  %s865_s19 = sphi %s904_s19, %s1072_s19   ;;  %s861_s18 = sphi %s902_s18, %s1071_s18  }
   0x3   : > { %p29_p1 = scmp.ge.s32.totalorder %s27_s21, 2  ;;  %p234_p2 = scmp.lt.s32.totalorder %s869_s20, 3 }
   0x5   : > { %s1074_s21 = smov (%p29_p1, %s27_s21), 0  ;;  %p235_p3 = pnand %p728_p0, %p234_p2 }
   0x6   : > { %p284_p4 = scmp.lt.s32.totalorder (!%p235_p3), %s861_s18, 1 }
   0x7   : > { %238 = sbr.rel (%p235_p3) target bundleno = 283 (0x11b), region = 40 }
   0xc   : > { %v821_v0 = vld [vmem:[%s1066_s1 + $0x38] sm:$0xff]   ;;  %v871_v1 = vmov 0   ;;  %v822_v2 = vld [vmem:[%s1066_s1 + $0x30] sm:$0xff]   ;;  %s1076_s18 = smov (!%p284_p4, %s861_s18), 1  ;;  %v823_v3 = vld [vmem:[%s1066_s1 + $0x28] sm:$0xff]   ;;  %vm477_vm0 = vcmask 719872  }
   0xd   : > { %494 = vmatprep.subr.bf16.mxu0 %v871_v1  ;;  %768 = vmatprep.subr.bf16.mxu1 %v871_v1  ;;  %s938_s28 = sshll.u32 %s1076_s18, 6  ;;  %v824_v4 = vld [vmem:[%s1066_s1 + $0x20] sm:$0xff]   ;;  %v825_v5 = vld [vmem:[%s1066_s1 + $0x18] sm:$0xff]   ;;  %v826_v8 = vld [vmem:[%s1066_s1 + $0x10] sm:$0xff]   ;;  %vm490_vm1 = vcmask 1043456   ;;  %s296_s14 = scalar_lea.vmem %s1068_s3, %s1076_s18  ;;  %vm598_vm2 = vcmask 261120  }
   0xe   : > { %495 = vmatpush1.bf16.msra.mxu0 %v821_v0  ;;  %782 = vmatpush1.bf16.msra.mxu1 %v821_v0  ;;  %s949_s8 = scalar_lea.vmem %s1065_s0, %s938_s28  ;;  %v827_v9 = vld [vmem:[%s1066_s1 + $0x8] sm:$0xff]   ;;  %v828_v10 = vld [vmem:[%s1066_s1] sm:$0xff]   ;;  %v831_v14 = vld [vmem:[%s1066_s1 + $0x58] sm:$0xff]   ;;  %s1024_s17 = scalar_lea.vmem %s1069_s4, %s938_s28 }
   0xf   : > { %496 = vmatprep.subr.bf16.mxu0 %v871_v1  ;;  %769 = vmatprep.subr.bf16.mxu1 %v871_v1  ;;  %v837_v6 = vld [vmem:[%s949_s8 + $0x4] ss:$8 sps:$4 sm:$0xff]   ;;  %v829_v11 = vld [vmem:[%s1066_s1 + $0x68] ss:$0 sps:$4 sm:$0xff]   ;;  %v832_v15 = vld [vmem:[%s1066_s1 + $0x50] sm:$0xff]   ;;  %s1032_s22 = scalar_lea.vmem %s1070_s5, %s938_s28 }
  0x10   : > { %758 = vmatprep.mubr.msk.bf16.mxu0 %vm477_vm0, %v837_v6  ;;  %v840_v7 = vld [vmem:[%s949_s8 + $0x24] ss:$8 sps:$4 sm:$0xff]   ;;  %v492_v12 = vsel %vm490_vm1, %v829_v11, 0  ;;  %v835_v18 = vld [vmem:[%s949_s8] ss:$8 sps:$4 sm:$0xff]   ;;  %v584_v62 = vld [vmem:[%s1024_s17 + $0x10] sm:$0xff] }
  0x11   : > { %760 = vmatprep.mubr.msk.bf16.mxu1 %vm477_vm0, %v840_v7  ;;  %v830_v13 = vld [vmem:[%s1066_s1 + $0x60] sm:$0xff]   ;;  %v833_v16 = vld [vmem:[%s1066_s1 + $0x48] sm:$0xff]   ;;  %v841_v20 = vld [vmem:[%s949_s8 + $0x14] ss:$8 sps:$4 sm:$0xff]  }
  0x12   : > { %497 = vmatpush1.bf16.msra.mxu0 %v822_v2  ;;  %783 = vmatpush1.bf16.msra.mxu1 %v822_v2  ;;  %v834_v17 = vld [vmem:[%s1066_s1 + $0x40] sm:$0xff]   ;;  %v843_v21 = vld [vmem:[%s949_s8 + $0x34] ss:$8 sps:$4 sm:$0xff]   ;;  %v845_v22 = vld [vmem:[%s949_s8 + $0x10] ss:$8 sps:$4 sm:$0xff]  }
  0x13   : > { %498 = vmatprep.subr.bf16.mxu0 %v871_v1  ;;  %770 = vmatprep.subr.bf16.mxu1 %v871_v1  ;;  %v838_v19 = vld [vmem:[%s949_s8 + $0x20] ss:$8 sps:$4 sm:$0xff]   ;;  %v846_v23 = vld [vmem:[%s949_s8 + $0x30] ss:$8 sps:$4 sm:$0xff]  }
  0x14   : > { %v735_v24 = vld [vmem:[%s1067_s2] ss:$0 sm:$0xff]  ;;  %v583_v48 = vld [vmem:[%s1024_s17 + $0x8] sm:$0xff]  ;;  %v588_v63 = vld [vmem:[%s1024_s17 + $0x30] sm:$0xff] }
  0x15   : > { %v762_v29 = vld [vmem:[%s296_s14] ss:$0 sm:$0xff]  ;;  %v587_v49 = vld [vmem:[%s1024_s17 + $0x28] sm:$0xff] }
  0x16   : > { %499 = vmatpush1.bf16.msra.mxu0 %v823_v3  ;;  %784 = vmatpush1.bf16.msra.mxu1 %v823_v3  ;;  %v582_v34 = vld [vmem:[%s1024_s17] sm:$0xff] }
  0x17   : > { %500 = vmatprep.subr.bf16.mxu0 %v871_v1  ;;  %771 = vmatprep.subr.bf16.mxu1 %v871_v1  ;;  %v586_v35 = vld [vmem:[%s1024_s17 + $0x20] sm:$0xff] }
  0x1a   : > { %501 = vmatpush1.bf16.msra.mxu0 %v824_v4  ;;  %785 = vmatpush1.bf16.msra.mxu1 %v824_v4 }
  0x1b   : > { %502 = vmatprep.subr.bf16.mxu0 %v871_v1  ;;  %772 = vmatprep.subr.bf16.mxu1 %v871_v1 }
  0x1e   : > { %503 = vmatpush1.bf16.msra.mxu0 %v825_v5  ;;  %786 = vmatpush1.bf16.msra.mxu1 %v825_v5 }
  0x1f   : > { %504 = vmatprep.subr.bf16.mxu0 %v871_v1  ;;  %773 = vmatprep.subr.bf16.mxu1 %v871_v1 }
  0x22   : > { %505 = vmatpush1.bf16.msra.mxu0 %v826_v8  ;;  %787 = vmatpush1.bf16.msra.mxu1 %v826_v8 }
  0x23   : > { %506 = vmatprep.subr.bf16.mxu0 %v871_v1  ;;  %774 = vmatprep.subr.bf16.mxu1 %v871_v1 }
  0x26   : > { %507 = vmatpush1.bf16.msra.mxu0 %v827_v9  ;;  %788 = vmatpush1.bf16.msra.mxu1 %v827_v9 }
  0x27   : > { %508 = vmatprep.subr.bf16.mxu0 %v871_v1  ;;  %775 = vmatprep.subr.bf16.mxu1 %v871_v1 }
  0x2a   : > { %509 = vmatpush1.bf16.msra.mxu0 %v828_v10  ;;  %789 = vmatpush1.bf16.msra.mxu1 %v828_v10 }
  0x2b   : > { %514 = vmatprep.subr.bf16.mxu0 %v871_v1  ;;  %776 = vmatprep.subr.bf16.mxu1 %v871_v1 }
  0x2e   : > { %515 = vmatpush2.bf16.msra.mxu0 %v492_v12  ;;  %790 = vmatpush2.bf16.msra.mxu1 %v492_v12  ;;  %v585_v12 = vld [vmem:[%s1024_s17 + $0x18] sm:$0xff] }
  0x2f   : > { %516 = vmatprep.subr.bf16.mxu0 %v871_v1  ;;  %777 = vmatprep.subr.bf16.mxu1 %v871_v1 }
  0x32   : > { %517 = vmatpush2.bf16.msra.mxu0 %v830_v13  ;;  %791 = vmatpush2.bf16.msra.mxu1 %v830_v13  ;;  %v589_v13 = vld [vmem:[%s1024_s17 + $0x38] sm:$0xff] }
  0x33   : > { %518 = vmatprep.subr.bf16.mxu0 %v871_v1  ;;  %778 = vmatprep.subr.bf16.mxu1 %v871_v1 }
  0x36   : > { %519 = vmatpush2.bf16.msra.mxu0 %v831_v14  ;;  %792 = vmatpush2.bf16.msra.mxu1 %v831_v14 }
  0x37   : > { %520 = vmatprep.subr.bf16.mxu0 %v871_v1  ;;  %779 = vmatprep.subr.bf16.mxu1 %v871_v1 }
  0x3a   : > { %521 = vmatpush2.bf16.msra.mxu0 %v832_v15  ;;  %793 = vmatpush2.bf16.msra.mxu1 %v832_v15 }
  0x3b   : > { %522 = vmatprep.subr.bf16.mxu0 %v871_v1  ;;  %780 = vmatprep.subr.bf16.mxu1 %v871_v1 }
  0x3e   : > { %523 = vmatpush2.bf16.msra.mxu0 %v833_v16  ;;  %794 = vmatpush2.bf16.msra.mxu1 %v833_v16 }
  0x3f   : > { %524 = vmatprep.subr.bf16.mxu0 %v871_v1  ;;  %781 = vmatprep.subr.bf16.mxu1 %v871_v1 }
  0x42   : > { %525 = vmatpush2.bf16.msra.mxu0 %v834_v17  ;;  %795 = vmatpush2.bf16.msra.mxu1 %v834_v17 }
  0x45   : > { %527 = vmatmul.mubr.bf16.vlgmr.msra.gmra.mxu0 %v835_v18  ;;  %543 = vmatmul.mubr.bf16.vlgmr.msra.gmra.mxu1 %v838_v19 }
  0x46   : > { %759 = vmatprep.mubr.msk.bf16.mxu0 %vm477_vm0, %v841_v20  ;;  %761 = vmatprep.mubr.msk.bf16.mxu1 %vm477_vm0, %v843_v21 }
  0x4d   : > { %535 = vmatmul.mubr.bf16.gmra.mxu0 %v845_v22  ;;  %551 = vmatmul.mubr.bf16.gmra.mxu1 %v846_v23 }
 0x105   : > { %v528_v25 = vpop.f32.mrf.mxu0  ;;  %v544_v26 = vpop.f32.mrf.mxu1 }
 0x106   : > { %v529_v27 = vadd.f32 %v735_v24, %v528_v25  ;;  %v545_v28 = vadd.f32 %v735_v24, %v544_v26 }
 0x107   : > { %v530_v30 = vpop.f32.mrf.mxu0  ;;  %v546_v31 = vpop.f32.mrf.mxu1 }
 0x108   : > { %v559_v32 = vmax.f32 %v529_v27, 0.0  ;;  %v563_v33 = vmax.f32 %v545_v28, 0.0 }
 0x109   : > { %v531_v36 = vpop.f32.mrf.mxu0  ;;  %v547_v37 = vpop.f32.mrf.mxu1 }
 0x10a   : > { %v574_v38 = vmul.f32 %v762_v29, %v559_v32  ;;  %v578_v39 = vmul.f32 %v762_v29, %v563_v33  ;;  %v532_v40 = vadd.f32 %v735_v24, %v531_v36  ;;  %v548_v41 = vadd.f32 %v735_v24, %v547_v37 }
 0x10b   : > { %v533_v42 = vpop.f32.mrf.mxu0  ;;  %v549_v43 = vpop.f32.mrf.mxu1 }
 0x10c   : > { %v590_v44 = vadd.f32 %v582_v34, %v574_v38  ;;  %v594_v45 = vadd.f32 %v586_v35, %v578_v39  ;;  %v560_v46 = vmax.f32 %v532_v40, 0.0  ;;  %v564_v47 = vmax.f32 %v548_v41, 0.0 }
 0x10d   : > { %v536_v50 = vpop.f32.mrf.mxu0  ;;  %v552_v51 = vpop.f32.mrf.mxu1 }
 0x10e   : > { %599 = vst.msk [vmem:[%s1032_s22] sm:$0xff] %vm598_vm2, %v590_v44  ;;  %603 = vst.msk [vmem:[%s1032_s22 + $0x20] sm:$0xff] %vm598_vm2, %v594_v45  ;;  %v575_v52 = vmul.f32 %v762_v29, %v560_v46  ;;  %v579_v53 = vmul.f32 %v762_v29, %v564_v47  ;;  %v537_v54 = vadd.f32 %v735_v24, %v536_v50 }
 0x10f   : > { %v553_v55 = vadd.f32 %v735_v24, %v552_v51  ;;  %v538_v56 = vpop.f32.mrf.mxu0  ;;  %v554_v57 = vpop.f32.mrf.mxu1 }
 0x110   : > { %v591_v58 = vadd.f32 %v583_v48, %v575_v52  ;;  %v595_v59 = vadd.f32 %v587_v49, %v579_v53  ;;  %v561_v60 = vmax.f32 %v537_v54, 0.0 }
 0x111   : > { %v565_v61 = vmax.f32 %v553_v55, 0.0  ;;  %v539_v0 = vpop.f32.mrf.mxu0  ;;  %v555_v1 = vpop.f32.mrf.mxu1 }
 0x112   : > { %600 = vst.msk [vmem:[%s1032_s22 + $0x8] sm:$0xff] %vm598_vm2, %v591_v58  ;;  %604 = vst.msk [vmem:[%s1032_s22 + $0x28] sm:$0xff] %vm598_vm2, %v595_v59  ;;  %v576_v2 = vmul.f32 %v762_v29, %v561_v60  ;;  %v540_v4 = vadd.f32 %v735_v24, %v539_v0  ;;  %v556_v5 = vadd.f32 %v735_v24, %v555_v1 }
 0x113   : > { %v580_v3 = vmul.f32 %v762_v29, %v565_v61  ;;  %v541_v6 = vpop.f32.mrf.mxu0  ;;  %v557_v7 = vpop.f32.mrf.mxu1 }
 0x114   : > { %v592_v8 = vadd.f32 %v584_v62, %v576_v2  ;;  %v562_v10 = vmax.f32 %v540_v4, 0.0  ;;  %v566_v11 = vmax.f32 %v556_v5, 0.0 }
 0x115   : > { %v596_v9 = vadd.f32 %v588_v63, %v580_v3 }
 0x116   : > { %601 = vst.msk [vmem:[%s1032_s22 + $0x10] sm:$0xff] %vm598_vm2, %v592_v8  ;;  %v577_v14 = vmul.f32 %v762_v29, %v562_v10  ;;  %v581_v15 = vmul.f32 %v762_v29, %v566_v11 }
 0x117   : > { %605 = vst.msk [vmem:[%s1032_s22 + $0x30] sm:$0xff] %vm598_vm2, %v596_v9 }
 0x118   : > { %v593_v16 = vadd.f32 %v585_v12, %v577_v14  ;;  %v597_v17 = vadd.f32 %v589_v13, %v581_v15 }
 0x11a   : > { %602 = vst.msk [vmem:[%s1032_s22 + $0x18] sm:$0xff] %vm598_vm2, %v593_v16  ;;  %606 = vst.msk [vmem:[%s1032_s22 + $0x38] sm:$0xff] %vm598_vm2, %v597_v17 }
 0x11b PF: > { %s15_s20 = sadd.s32 1, %s869_s20   ;;  %s1071_s18 = smov %s865_s19 }
 0x11c   : > { %p12_p5 = scmp.ge.s32.totalorder %s15_s20, 4   ;;  %s1072_s19 = smov %s1074_s21 }
 0x11e   :  { %14 = sbr.rel (!%p12_p5) target bundleno = 2 (0x2), region = 76 }

// kernel: pan_forward.17
= control target key start
LH: loop header
LB: loop body
LE: loop exit
PB: predicated region body
PF: predicated region fallthrough
CT: control target
= control target key end

     0   :  { %s353_s6 = smov 0   ;;  %s355_s7 = smov 0   ;;  %s404_s0 = inlined_call_operand.vmem [shape: f32[2,64,32], index: 0, kind: input, shape index: {}]   ;;  %s405_s1 = inlined_call_operand.vmem [shape: f32[2,1,32], index: 1, kind: output, shape index: {}]  }
   0x1   :  { %s357_s8 = smov 0  }
   0x2 LB: > { %s23_s9 = sadd.s32 1, %s336_s7  ;;  %p287_p0 = scmp.ge.s32.totalorder %s340_s8, 1  ;;  %s340_s8 = sphi %s357_s8, %s11_s8   ;;  %s336_s7 = sphi %s355_s7, %s407_s7   ;;  %s332_s6 = sphi %s353_s6, %s406_s6  }
   0x3   : > { %p25_p1 = scmp.ge.s32.totalorder %s23_s9, 2  ;;  %p106_p2 = scmp.lt.s32.totalorder %s340_s8, 3 }
   0x5   : > { %s409_s9 = smov (%p25_p1, %s23_s9), 0  ;;  %p107_p3 = pnand %p287_p0, %p106_p2 }
   0x6   : > { %p129_p4 = scmp.lt.s32.totalorder (!%p107_p3), %s332_s6, 1 }
   0x7   : > { %110 = sbr.rel (%p107_p3) target bundleno = 56 (0x38), region = 24 }
   0xc   : > { %s411_s6 = smov (!%p129_p4, %s332_s6), 1  ;;  %vm145_vm0 = vcmask 253952   ;;  %vm191_vm1 = vcmask 261120   ;;  %v342_v0 = vmov 0.0  }
   0xd   : > { %s292_s10 = sshll.u32 %s411_s6, 6  ;;  %s374_s13 = scalar_lea.vmem %s405_s1, %s411_s6 }
   0xe   : > { %s136_s16 = scalar_lea.vmem %s404_s0, %s292_s10  ;;  %146 = vst.msk [vmem:[%s374_s13] sm:$0x1] %vm145_vm0, %v342_v0 }
   0xf   : > { %v175_v1 = vld [vmem:[%s136_s16] sm:$0xff]  ;;  %v176_v2 = vld [vmem:[%s136_s16 + $0x8] sm:$0xff]  ;;  %v177_v3 = vld [vmem:[%s136_s16 + $0x10] sm:$0xff] }
  0x10   : > { %v192_v4 = vsel %vm191_vm1, %v175_v1, 0.0  ;;  %v193_v5 = vsel %vm191_vm1, %v176_v2, 0.0  ;;  %v178_v6 = vld [vmem:[%s136_s16 + $0x18] sm:$0xff]  ;;  %v195_v7 = vsel %vm191_vm1, %v177_v3, 0.0  ;;  %v179_v8 = vld [vmem:[%s136_s16 + $0x20] sm:$0xff]  ;;  %v180_v11 = vld [vmem:[%s136_s16 + $0x28] sm:$0xff] }
  0x11   : > { %v194_v9 = vadd.f32 %v193_v5, %v192_v4  ;;  %v197_v10 = vsel %vm191_vm1, %v178_v6, 0.0  ;;  %v199_v13 = vsel %vm191_vm1, %v179_v8, 0.0  ;;  %v181_v14 = vld [vmem:[%s136_s16 + $0x30] sm:$0xff]  ;;  %v201_v16 = vsel %vm191_vm1, %v180_v11, 0.0  ;;  %v182_v17 = vld [vmem:[%s136_s16 + $0x38] sm:$0xff] }
  0x12   : > { %v203_v19 = vsel %vm191_vm1, %v181_v14, 0.0  ;;  %v205_v21 = vsel %vm191_vm1, %v182_v17, 0.0 }
  0x13   : > { %v196_v12 = vadd.f32 %v195_v7, %v194_v9 }
  0x15   : > { %v198_v15 = vadd.f32 %v197_v10, %v196_v12  ;;  %v174_v29 = vld [vmem:[%s374_s13] sm:$0x1] }
  0x17   : > { %v200_v18 = vadd.f32 %v199_v13, %v198_v15 }
  0x19   : > { %v202_v20 = vadd.f32 %v201_v16, %v200_v18 }
  0x1b   : > { %v204_v22 = vadd.f32 %v203_v19, %v202_v20 }
  0x1d   : > { %v206_v23 = vadd.f32 %v205_v21, %v204_v22 }
  0x1f   : > { %v207_v24 = vrot.slane %v206_v23, 4 }
  0x21   : > { %v208_v25 = vadd.f32 %v207_v24, %v206_v23 }
  0x23   : > { %v209_v26 = vrot.slane %v208_v25, 2 }
  0x25   : > { %v210_v27 = vadd.f32 %v209_v26, %v208_v25 }
  0x27   : > { %v211_v28 = vrot.slane %v210_v27, 1 }
  0x29   : > { %v212_v30 = vadd.f32 %v211_v28, %v210_v27 }
  0x2b   : > { %v213_v31 = vadd.f32 %v212_v30, %v174_v29 }
  0x2d   : > { %215 = vst.msk [vmem:[%s374_s13] sm:$0x1] %vm145_vm0, %v213_v31 }
  0x34   : > { %v219_v32 = vld [vmem:[%s374_s13] sm:$0x1] }
  0x35   : > { %v220_v33 = vmul.f32 0.015625, %v219_v32 }
  0x37   : > { %221 = vst.msk [vmem:[%s374_s13] sm:$0x1] %vm145_vm0, %v220_v33 }
  0x38 PF: > { %s11_s8 = sadd.s32 1, %s340_s8   ;;  %s406_s6 = smov %s336_s7 }
  0x39   : > { %p8_p5 = scmp.ge.s32.totalorder %s11_s8, 4   ;;  %s407_s7 = smov %s409_s9 }
  0x3b   :  { %10 = sbr.rel (!%p8_p5) target bundleno = 2 (0x2), region = 62 }

// kernel: pan_forward.18
= control target key start
LH: loop header
LB: loop body
LE: loop exit
PB: predicated region body
PF: predicated region fallthrough
CT: control target
= control target key end

     0   :  { %s1298_s18 = smov 0   ;;  %s1300_s19 = smov 0   ;;  %s1594_s0 = inlined_call_operand.vmem [shape: bf16[2,256,144], index: 0, kind: input, shape index: {}]   ;;  %s1595_s1 = inlined_call_operand.vmem [shape: bf16[144,32], index: 1, kind: input, shape index: {}]   ;;  %s1596_s2 = inlined_call_operand.vmem [shape: f32[1,32], index: 2, kind: input, shape index: {}]   ;;  %s1597_s3 = inlined_call_operand.vmem [shape: f32[2,1,32], index: 3, kind: input, shape index: {}]   ;;  %s1598_s4 = inlined_call_operand.vmem [shape: f32[2,256,32], index: 4, kind: input, shape index: {}]   ;;  %s1599_s5 = inlined_call_operand.vmem [shape: f32[2,256,32], index: 5, kind: output, shape index: {}]  }
   0x1   :  { %s1302_s20 = smov 0  }
   0x2 LB: > { %s27_s21 = sadd.s32 1, %s1261_s19  ;;  %p1072_p0 = scmp.ge.s32.totalorder %s1265_s20, 1  ;;  %s1265_s20 = sphi %s1302_s20, %s15_s20   ;;  %s1261_s19 = sphi %s1300_s19, %s1601_s19   ;;  %s1257_s18 = sphi %s1298_s18, %s1600_s18  }
   0x3   : > { %p29_p1 = scmp.ge.s32.totalorder %s27_s21, 2  ;;  %p234_p2 = scmp.lt.s32.totalorder %s1265_s20, 3 }
   0x5   : > { %s1603_s21 = smov (%p29_p1, %s27_s21), 0  ;;  %p235_p3 = pnand %p1072_p0, %p234_p2 }
   0x6   : > { %p284_p4 = scmp.lt.s32.totalorder (!%p235_p3), %s1257_s18, 1 }
   0x7   : > { %238 = sbr.rel (%p235_p3) target bundleno = 311 (0x137), region = 40 }
   0xc   : > { %v1186_v0 = vld [vmem:[%s1595_s1 + $0x38] sm:$0xff]   ;;  %v1267_v1 = vmov 0   ;;  %v1187_v2 = vld [vmem:[%s1595_s1 + $0x30] sm:$0xff]   ;;  %s1605_s18 = smov (!%p284_p4, %s1257_s18), 1  ;;  %v1188_v3 = vld [vmem:[%s1595_s1 + $0x28] sm:$0xff]   ;;  %vm573_vm0 = vcmask 130048  }
   0xd   : > { %622 = vmatprep.subr.bf16.mxu0 %v1267_v1  ;;  %1143 = vmatprep.subr.bf16.mxu1 %v1267_v1  ;;  %s1325_s26 = sshll.u32 %s1605_s18, 8  ;;  %v1189_v4 = vld [vmem:[%s1595_s1 + $0x20] sm:$0xff]   ;;  %v1190_v7 = vld [vmem:[%s1595_s1 + $0x18] sm:$0xff]   ;;  %v1191_v8 = vld [vmem:[%s1595_s1 + $0x10] sm:$0xff]   ;;  %s296_s28 = scalar_lea.vmem %s1597_s3, %s1605_s18  ;;  %vm918_vm1 = vcmask 261120  }
   0xe   : > { %623 = vmatpush1.bf16.msra.mxu0 %v1186_v0  ;;  %1152 = vmatpush1.bf16.msra.mxu1 %v1186_v0  ;;  %s1334_s6 = scalar_lea.vmem %s1594_s0, %s1325_s26  ;;  %v1192_v9 = vld [vmem:[%s1595_s1 + $0x8] sm:$0xff]   ;;  %v1193_v10 = vld [vmem:[%s1595_s1] sm:$0xff]   ;;  %s1415_s7 = scalar_lea.vmem %s1598_s4, %s1325_s26 }
   0xf   : > { %624 = vmatprep.subr.bf16.mxu0 %v1267_v1  ;;  %1144 = vmatprep.subr.bf16.mxu1 %v1267_v1  ;;  %v1197_v5 = vld [vmem:[%s1334_s6 + $0x4] ss:$8 sps:$4 sm:$0xff]   ;;  %v1195_v12 = vld [vmem:[%s1334_s6] ss:$8 sps:$4 sm:$0xff]   ;;  %v1201_v14 = vld [vmem:[%s1334_s6 + $0x14] ss:$8 sps:$4 sm:$0xff]   ;;  %s1431_s8 = scalar_lea.vmem %s1599_s5, %s1325_s26 }
  0x10   : > { %v1200_v6 = vld [vmem:[%s1334_s6 + $0x84] ss:$8 sps:$4 sm:$0xff]   ;;  %1121 = vmatprep.mubr.msk.bf16.mxu0 %vm573_vm0, %v1197_v5  ;;  %v1198_v13 = vld [vmem:[%s1334_s6 + $0x80] ss:$8 sps:$4 sm:$0xff]   ;;  %v1203_v15 = vld [vmem:[%s1334_s6 + $0x94] ss:$8 sps:$4 sm:$0xff]  }
  0x11   : > { %1129 = vmatprep.mubr.msk.bf16.mxu1 %vm573_vm0, %v1200_v6  ;;  %v1194_v11 = vld [vmem:[%s1595_s1 + $0x40] sm:$0xff]   ;;  %v1205_v16 = vld [vmem:[%s1334_s6 + $0x10] ss:$8 sps:$4 sm:$0xff]   ;;  %v1213_v22 = vld [vmem:[%s1334_s6 + $0x34] ss:$8 sps:$4 sm:$0xff]  }
  0x12   : > { %625 = vmatpush1.bf16.msra.mxu0 %v1187_v2  ;;  %1153 = vmatpush1.bf16.msra.mxu1 %v1187_v2  ;;  %v1206_v17 = vld [vmem:[%s1334_s6 + $0x90] ss:$8 sps:$4 sm:$0xff]   ;;  %v1207_v18 = vld [vmem:[%s1334_s6 + $0x24] ss:$8 sps:$4 sm:$0xff]   ;;  %v1211_v20 = vld [vmem:[%s1334_s6 + $0x20] ss:$8 sps:$4 sm:$0xff]  }
  0x13   : > { %626 = vmatprep.subr.bf16.mxu0 %v1267_v1  ;;  %1145 = vmatprep.subr.bf16.mxu1 %v1267_v1  ;;  %v1209_v19 = vld [vmem:[%s1334_s6 + $0xa4] ss:$8 sps:$4 sm:$0xff]   ;;  %v1212_v21 = vld [vmem:[%s1334_s6 + $0xa0] ss:$8 sps:$4 sm:$0xff]   ;;  %v1215_v23 = vld [vmem:[%s1334_s6 + $0xb4] ss:$8 sps:$4 sm:$0xff]  }
  0x14   : > { %v1217_v24 = vld [vmem:[%s1334_s6 + $0x30] ss:$8 sps:$4 sm:$0xff]   ;;  %v1219_v26 = vld [vmem:[%s1334_s6 + $0x44] ss:$8 sps:$4 sm:$0xff]   ;;  %v1223_v28 = vld [vmem:[%s1334_s6 + $0x40] ss:$8 sps:$4 sm:$0xff]  }
  0x15   : > { %v1218_v25 = vld [vmem:[%s1334_s6 + $0xb0] ss:$8 sps:$4 sm:$0xff]   ;;  %v1221_v27 = vld [vmem:[%s1334_s6 + $0xc4] ss:$8 sps:$4 sm:$0xff]   ;;  %v1224_v29 = vld [vmem:[%s1334_s6 + $0xc0] ss:$8 sps:$4 sm:$0xff]  }
  0x16   : > { %627 = vmatpush1.bf16.msra.mxu0 %v1188_v3  ;;  %1154 = vmatpush1.bf16.msra.mxu1 %v1188_v3  ;;  %v1225_v30 = vld [vmem:[%s1334_s6 + $0x54] ss:$8 sps:$4 sm:$0xff]   ;;  %v1229_v32 = vld [vmem:[%s1334_s6 + $0x50] ss:$8 sps:$4 sm:$0xff]   ;;  %v1231_v34 = vld [vmem:[%s1334_s6 + $0x64] ss:$8 sps:$4 sm:$0xff]  }
  0x17   : > { %628 = vmatprep.subr.bf16.mxu0 %v1267_v1  ;;  %1146 = vmatprep.subr.bf16.mxu1 %v1267_v1  ;;  %v1227_v31 = vld [vmem:[%s1334_s6 + $0xd4] ss:$8 sps:$4 sm:$0xff]   ;;  %v1230_v33 = vld [vmem:[%s1334_s6 + $0xd0] ss:$8 sps:$4 sm:$0xff]   ;;  %v1233_v35 = vld [vmem:[%s1334_s6 + $0xe4] ss:$8 sps:$4 sm:$0xff]  }
  0x18   : > { %v1235_v36 = vld [vmem:[%s1334_s6 + $0x60] ss:$8 sps:$4 sm:$0xff]   ;;  %v1237_v38 = vld [vmem:[%s1334_s6 + $0x74] ss:$8 sps:$4 sm:$0xff]   ;;  %v1241_v40 = vld [vmem:[%s1334_s6 + $0x70] ss:$8 sps:$4 sm:$0xff]  }
  0x19   : > { %v1236_v37 = vld [vmem:[%s1334_s6 + $0xe0] ss:$8 sps:$4 sm:$0xff]   ;;  %v1239_v39 = vld [vmem:[%s1334_s6 + $0xf4] ss:$8 sps:$4 sm:$0xff]   ;;  %v1242_v41 = vld [vmem:[%s1334_s6 + $0xf0] ss:$8 sps:$4 sm:$0xff]  }
  0x1a   : > { %629 = vmatpush1.bf16.msra.mxu0 %v1189_v4  ;;  %1155 = vmatpush1.bf16.msra.mxu1 %v1189_v4  ;;  %v1405_v42 = vld [vmem:[%s1596_s2] ss:$0 sm:$0xff]  ;;  %v855_v2 = vld [vmem:[%s1415_s7 + $0x8] sm:$0xff] }
  0x1b   : > { %630 = vmatprep.subr.bf16.mxu0 %v1267_v1  ;;  %1147 = vmatprep.subr.bf16.mxu1 %v1267_v1  ;;  %v1419_v47 = vld [vmem:[%s296_s28] ss:$0 sm:$0xff]  ;;  %v871_v3 = vld [vmem:[%s1415_s7 + $0x88] sm:$0xff] }
  0x1c   : > { %v854_v52 = vld [vmem:[%s1415_s7] sm:$0xff] }
  0x1d   : > { %v870_v53 = vld [vmem:[%s1415_s7 + $0x80] sm:$0xff] }
  0x1e   : > { %631 = vmatpush1.bf16.msra.mxu0 %v1190_v7  ;;  %1156 = vmatpush1.bf16.msra.mxu1 %v1190_v7 }
  0x1f   : > { %632 = vmatprep.subr.bf16.mxu0 %v1267_v1  ;;  %1148 = vmatprep.subr.bf16.mxu1 %v1267_v1 }
  0x22   : > { %633 = vmatpush1.bf16.msra.mxu0 %v1191_v8  ;;  %1157 = vmatpush1.bf16.msra.mxu1 %v1191_v8 }
  0x23   : > { %634 = vmatprep.subr.bf16.mxu0 %v1267_v1  ;;  %1149 = vmatprep.subr.bf16.mxu1 %v1267_v1 }
  0x26   : > { %635 = vmatpush1.bf16.msra.mxu0 %v1192_v9  ;;  %1158 = vmatpush1.bf16.msra.mxu1 %v1192_v9 }
  0x27   : > { %636 = vmatprep.subr.bf16.mxu0 %v1267_v1  ;;  %1150 = vmatprep.subr.bf16.mxu1 %v1267_v1 }
  0x2a   : > { %637 = vmatpush1.bf16.msra.mxu0 %v1193_v10  ;;  %1159 = vmatpush1.bf16.msra.mxu1 %v1193_v10 }
  0x2b   : > { %652 = vmatprep.subr.bf16.mxu0 %v1267_v1  ;;  %1151 = vmatprep.subr.bf16.mxu1 %v1267_v1 }
  0x2e   : > { %653 = vmatpush2.bf16.msra.mxu0 %v1194_v11  ;;  %1160 = vmatpush2.bf16.msra.mxu1 %v1194_v11 }
  0x31   : > { %655 = vmatmul.mubr.bf16.vlgmr.msra.gmra.mxu0 %v1195_v12  ;;  %719 = vmatmul.mubr.bf16.vlgmr.msra.gmra.mxu1 %v1198_v13 }
  0x32   : > { %1122 = vmatprep.mubr.msk.bf16.mxu0 %vm573_vm0, %v1201_v14  ;;  %1130 = vmatprep.mubr.msk.bf16.mxu1 %vm573_vm0, %v1203_v15 }
  0x39   : > { %663 = vmatmul.mubr.bf16.gmra.mxu0 %v1205_v16  ;;  %727 = vmatmul.mubr.bf16.gmra.mxu1 %v1206_v17  ;;  %v856_v16 = vld [vmem:[%s1415_s7 + $0x10] sm:$0xff] }
  0x3a   : > { %1123 = vmatprep.mubr.msk.bf16.mxu0 %vm573_vm0, %v1207_v18  ;;  %1131 = vmatprep.mubr.msk.bf16.mxu1 %vm573_vm0, %v1209_v19  ;;  %v872_v17 = vld [vmem:[%s1415_s7 + $0x90] sm:$0xff] }
  0x41   : > { %671 = vmatmul.mubr.bf16.gmra.mxu0 %v1211_v20  ;;  %735 = vmatmul.mubr.bf16.gmra.mxu1 %v1212_v21 }
  0x42   : > { %1124 = vmatprep.mubr.msk.bf16.mxu0 %vm573_vm0, %v1213_v22  ;;  %1132 = vmatprep.mubr.msk.bf16.mxu1 %vm573_vm0, %v1215_v23 }
  0x49   : > { %679 = vmatmul.mubr.bf16.gmra.mxu0 %v1217_v24  ;;  %743 = vmatmul.mubr.bf16.gmra.mxu1 %v1218_v25 }
  0x4a   : > { %1125 = vmatprep.mubr.msk.bf16.mxu0 %vm573_vm0, %v1219_v26  ;;  %1133 = vmatprep.mubr.msk.bf16.mxu1 %vm573_vm0, %v1221_v27 }
  0x51   : > { %687 = vmatmul.mubr.bf16.gmra.mxu0 %v1223_v28  ;;  %751 = vmatmul.mubr.bf16.gmra.mxu1 %v1224_v29 }
  0x52   : > { %1126 = vmatprep.mubr.msk.bf16.mxu0 %vm573_vm0, %v1225_v30  ;;  %1134 = vmatprep.mubr.msk.bf16.mxu1 %vm573_vm0, %v1227_v31  ;;  %v857_v30 = vld [vmem:[%s1415_s7 + $0x18] sm:$0xff] }
  0x53   : > { %v873_v31 = vld [vmem:[%s1415_s7 + $0x98] sm:$0xff] }
  0x59   : > { %695 = vmatmul.mubr.bf16.gmra.mxu0 %v1229_v32  ;;  %759 = vmatmul.mubr.bf16.gmra.mxu1 %v1230_v33 }
  0x5a   : > { %1127 = vmatprep.mubr.msk.bf16.mxu0 %vm573_vm0, %v1231_v34  ;;  %1135 = vmatprep.mubr.msk.bf16.mxu1 %vm573_vm0, %v1233_v35 }
  0x61   : > { %703 = vmatmul.mubr.bf16.gmra.mxu0 %v1235_v36  ;;  %767 = vmatmul.mubr.bf16.gmra.mxu1 %v1236_v37 }
  0x62   : > { %1128 = vmatprep.mubr.msk.bf16.mxu0 %vm573_vm0, %v1237_v38  ;;  %1136 = vmatprep.mubr.msk.bf16.mxu1 %vm573_vm0, %v1239_v39 }
  0x69   : > { %711 = vmatmul.mubr.bf16.gmra.mxu0 %v1241_v40  ;;  %775 = vmatmul.mubr.bf16.gmra.mxu1 %v1242_v41 }
  0xf1   : > { %v656_v43 = vpop.f32.mrf.mxu0  ;;  %v720_v44 = vpop.f32.mrf.mxu1 }
  0xf2   : > { %v657_v45 = vadd.f32 %v1405_v42, %v656_v43  ;;  %v721_v46 = vadd.f32 %v1405_v42, %v720_v44 }
  0xf3   : > { %v658_v48 = vpop.f32.mrf.mxu0  ;;  %v722_v49 = vpop.f32.mrf.mxu1 }
  0xf4   : > { %v783_v50 = vmax.f32 %v657_v45, 0.0  ;;  %v799_v51 = vmax.f32 %v721_v46, 0.0  ;;  %v858_v45 = vld [vmem:[%s1415_s7 + $0x20] sm:$0xff] }
  0xf5   : > { %v659_v54 = vpop.f32.mrf.mxu0  ;;  %v723_v55 = vpop.f32.mrf.mxu1  ;;  %v874_v46 = vld [vmem:[%s1415_s7 + $0xa0] sm:$0xff] }
  0xf6   : > { %v822_v56 = vmul.f32 %v1419_v47, %v783_v50  ;;  %v838_v57 = vmul.f32 %v1419_v47, %v799_v51  ;;  %v660_v58 = vadd.f32 %v1405_v42, %v659_v54  ;;  %v724_v59 = vadd.f32 %v1405_v42, %v723_v55 }
  0xf7   : > { %v661_v60 = vpop.f32.mrf.mxu0  ;;  %v725_v61 = vpop.f32.mrf.mxu1 }
  0xf8   : > { %v886_v62 = vadd.f32 %v854_v52, %v822_v56  ;;  %v902_v63 = vadd.f32 %v870_v53, %v838_v57  ;;  %v784_v0 = vmax.f32 %v660_v58, 0.0  ;;  %v800_v1 = vmax.f32 %v724_v59, 0.0  ;;  %v859_v60 = vld [vmem:[%s1415_s7 + $0x28] sm:$0xff] }
  0xf9   : > { %v664_v4 = vpop.f32.mrf.mxu0  ;;  %v728_v5 = vpop.f32.mrf.mxu1  ;;  %v875_v61 = vld [vmem:[%s1415_s7 + $0xa8] sm:$0xff] }
  0xfa   : > { %919 = vst.msk [vmem:[%s1431_s8] sm:$0xff] %vm918_vm1, %v886_v62  ;;  %935 = vst.msk [vmem:[%s1431_s8 + $0x80] sm:$0xff] %vm918_vm1, %v902_v63  ;;  %v823_v6 = vmul.f32 %v1419_v47, %v784_v0  ;;  %v839_v7 = vmul.f32 %v1419_v47, %v800_v1  ;;  %v665_v8 = vadd.f32 %v1405_v42, %v664_v4 }
  0xfb   : > { %v729_v9 = vadd.f32 %v1405_v42, %v728_v5  ;;  %v666_v10 = vpop.f32.mrf.mxu0  ;;  %v730_v11 = vpop.f32.mrf.mxu1 }
  0xfc   : > { %v887_v12 = vadd.f32 %v855_v2, %v823_v6  ;;  %v903_v13 = vadd.f32 %v871_v3, %v839_v7  ;;  %v785_v14 = vmax.f32 %v665_v8, 0.0  ;;  %v860_v10 = vld [vmem:[%s1415_s7 + $0x30] sm:$0xff] }
  0xfd   : > { %v801_v15 = vmax.f32 %v729_v9, 0.0  ;;  %v667_v18 = vpop.f32.mrf.mxu0  ;;  %v731_v19 = vpop.f32.mrf.mxu1  ;;  %v876_v11 = vld [vmem:[%s1415_s7 + $0xb0] sm:$0xff] }
  0xfe   : > { %920 = vst.msk [vmem:[%s1431_s8 + $0x8] sm:$0xff] %vm918_vm1, %v887_v12  ;;  %936 = vst.msk [vmem:[%s1431_s8 + $0x88] sm:$0xff] %vm918_vm1, %v903_v13  ;;  %v824_v20 = vmul.f32 %v1419_v47, %v785_v14  ;;  %v668_v22 = vadd.f32 %v1405_v42, %v667_v18  ;;  %v732_v23 = vadd.f32 %v1405_v42, %v731_v19 }
  0xff   : > { %v840_v21 = vmul.f32 %v1419_v47, %v801_v15  ;;  %v669_v24 = vpop.f32.mrf.mxu0  ;;  %v733_v25 = vpop.f32.mrf.mxu1 }
 0x100   : > { %v888_v26 = vadd.f32 %v856_v16, %v824_v20  ;;  %v786_v28 = vmax.f32 %v668_v22, 0.0  ;;  %v802_v29 = vmax.f32 %v732_v23, 0.0  ;;  %v861_v24 = vld [vmem:[%s1415_s7 + $0x38] sm:$0xff] }
 0x101   : > { %v904_v27 = vadd.f32 %v872_v17, %v840_v21  ;;  %v672_v32 = vpop.f32.mrf.mxu0  ;;  %v736_v33 = vpop.f32.mrf.mxu1  ;;  %v877_v25 = vld [vmem:[%s1415_s7 + $0xb8] sm:$0xff] }
 0x102   : > { %921 = vst.msk [vmem:[%s1431_s8 + $0x10] sm:$0xff] %vm918_vm1, %v888_v26  ;;  %v825_v34 = vmul.f32 %v1419_v47, %v786_v28  ;;  %v841_v35 = vmul.f32 %v1419_v47, %v802_v29  ;;  %v673_v36 = vadd.f32 %v1405_v42, %v672_v32  ;;  %v737_v37 = vadd.f32 %v1405_v42, %v736_v33 }
 0x103   : > { %937 = vst.msk [vmem:[%s1431_s8 + $0x90] sm:$0xff] %vm918_vm1, %v904_v27  ;;  %v674_v38 = vpop.f32.mrf.mxu0  ;;  %v738_v39 = vpop.f32.mrf.mxu1 }
 0x104   : > { %v889_v40 = vadd.f32 %v857_v30, %v825_v34  ;;  %v905_v41 = vadd.f32 %v873_v31, %v841_v35  ;;  %v787_v43 = vmax.f32 %v673_v36, 0.0  ;;  %v803_v44 = vmax.f32 %v737_v37, 0.0  ;;  %v862_v38 = vld [vmem:[%s1415_s7 + $0x40] sm:$0xff] }
 0x105   : > { %v675_v48 = vpop.f32.mrf.mxu0  ;;  %v739_v49 = vpop.f32.mrf.mxu1  ;;  %v878_v39 = vld [vmem:[%s1415_s7 + $0xc0] sm:$0xff] }
 0x106   : > { %922 = vst.msk [vmem:[%s1431_s8 + $0x18] sm:$0xff] %vm918_vm1, %v889_v40  ;;  %938 = vst.msk [vmem:[%s1431_s8 + $0x98] sm:$0xff] %vm918_vm1, %v905_v41  ;;  %v826_v50 = vmul.f32 %v1419_v47, %v787_v43  ;;  %v842_v51 = vmul.f32 %v1419_v47, %v803_v44  ;;  %v676_v52 = vadd.f32 %v1405_v42, %v675_v48 }
 0x107   : > { %v740_v53 = vadd.f32 %v1405_v42, %v739_v49  ;;  %v677_v54 = vpop.f32.mrf.mxu0  ;;  %v741_v55 = vpop.f32.mrf.mxu1 }
 0x108   : > { %v890_v56 = vadd.f32 %v858_v45, %v826_v50  ;;  %v906_v57 = vadd.f32 %v874_v46, %v842_v51  ;;  %v788_v58 = vmax.f32 %v676_v52, 0.0  ;;  %v863_v54 = vld [vmem:[%s1415_s7 + $0x48] sm:$0xff] }
 0x109   : > { %v804_v59 = vmax.f32 %v740_v53, 0.0  ;;  %v680_v62 = vpop.f32.mrf.mxu0  ;;  %v744_v63 = vpop.f32.mrf.mxu1  ;;  %v879_v55 = vld [vmem:[%s1415_s7 + $0xc8] sm:$0xff] }
 0x10a   : > { %923 = vst.msk [vmem:[%s1431_s8 + $0x20] sm:$0xff] %vm918_vm1, %v890_v56  ;;  %939 = vst.msk [vmem:[%s1431_s8 + $0xa0] sm:$0xff] %vm918_vm1, %v906_v57  ;;  %v827_v0 = vmul.f32 %v1419_v47, %v788_v58  ;;  %v681_v2 = vadd.f32 %v1405_v42, %v680_v62  ;;  %v745_v3 = vadd.f32 %v1405_v42, %v744_v63 }
 0x10b   : > { %v843_v1 = vmul.f32 %v1419_v47, %v804_v59  ;;  %v682_v4 = vpop.f32.mrf.mxu0  ;;  %v746_v5 = vpop.f32.mrf.mxu1 }
 0x10c   : > { %v891_v6 = vadd.f32 %v859_v60, %v827_v0  ;;  %v789_v8 = vmax.f32 %v681_v2, 0.0  ;;  %v805_v9 = vmax.f32 %v745_v3, 0.0  ;;  %v864_v4 = vld [vmem:[%s1415_s7 + $0x50] sm:$0xff] }
 0x10d   : > { %v907_v7 = vadd.f32 %v875_v61, %v843_v1  ;;  %v683_v12 = vpop.f32.mrf.mxu0  ;;  %v747_v13 = vpop.f32.mrf.mxu1  ;;  %v880_v5 = vld [vmem:[%s1415_s7 + $0xd0] sm:$0xff] }
 0x10e   : > { %924 = vst.msk [vmem:[%s1431_s8 + $0x28] sm:$0xff] %vm918_vm1, %v891_v6  ;;  %v828_v14 = vmul.f32 %v1419_v47, %v789_v8  ;;  %v844_v15 = vmul.f32 %v1419_v47, %v805_v9  ;;  %v684_v16 = vadd.f32 %v1405_v42, %v683_v12  ;;  %v748_v17 = vadd.f32 %v1405_v42, %v747_v13 }
 0x10f   : > { %940 = vst.msk [vmem:[%s1431_s8 + $0xa8] sm:$0xff] %vm918_vm1, %v907_v7  ;;  %v685_v18 = vpop.f32.mrf.mxu0  ;;  %v749_v19 = vpop.f32.mrf.mxu1 }
 0x110   : > { %v892_v20 = vadd.f32 %v860_v10, %v828_v14  ;;  %v908_v21 = vadd.f32 %v876_v11, %v844_v15  ;;  %v790_v22 = vmax.f32 %v684_v16, 0.0  ;;  %v806_v23 = vmax.f32 %v748_v17, 0.0  ;;  %v865_v18 = vld [vmem:[%s1415_s7 + $0x58] sm:$0xff] }
 0x111   : > { %v688_v26 = vpop.f32.mrf.mxu0  ;;  %v752_v27 = vpop.f32.mrf.mxu1  ;;  %v881_v19 = vld [vmem:[%s1415_s7 + $0xd8] sm:$0xff] }
 0x112   : > { %925 = vst.msk [vmem:[%s1431_s8 + $0x30] sm:$0xff] %vm918_vm1, %v892_v20  ;;  %941 = vst.msk [vmem:[%s1431_s8 + $0xb0] sm:$0xff] %vm918_vm1, %v908_v21  ;;  %v829_v28 = vmul.f32 %v1419_v47, %v790_v22  ;;  %v845_v29 = vmul.f32 %v1419_v47, %v806_v23  ;;  %v689_v30 = vadd.f32 %v1405_v42, %v688_v26 }
 0x113   : > { %v753_v31 = vadd.f32 %v1405_v42, %v752_v27  ;;  %v690_v32 = vpop.f32.mrf.mxu0  ;;  %v754_v33 = vpop.f32.mrf.mxu1 }
 0x114   : > { %v893_v34 = vadd.f32 %v861_v24, %v829_v28  ;;  %v909_v35 = vadd.f32 %v877_v25, %v845_v29  ;;  %v791_v36 = vmax.f32 %v689_v30, 0.0  ;;  %v866_v32 = vld [vmem:[%s1415_s7 + $0x60] sm:$0xff] }
 0x115   : > { %v807_v37 = vmax.f32 %v753_v31, 0.0  ;;  %v691_v40 = vpop.f32.mrf.mxu0  ;;  %v755_v41 = vpop.f32.mrf.mxu1  ;;  %v882_v33 = vld [vmem:[%s1415_s7 + $0xe0] sm:$0xff] }
 0x116   : > { %926 = vst.msk [vmem:[%s1431_s8 + $0x38] sm:$0xff] %vm918_vm1, %v893_v34  ;;  %942 = vst.msk [vmem:[%s1431_s8 + $0xb8] sm:$0xff] %vm918_vm1, %v909_v35  ;;  %v830_v43 = vmul.f32 %v1419_v47, %v791_v36  ;;  %v692_v45 = vadd.f32 %v1405_v42, %v691_v40  ;;  %v756_v46 = vadd.f32 %v1405_v42, %v755_v41 }
 0x117   : > { %v846_v44 = vmul.f32 %v1419_v47, %v807_v37  ;;  %v693_v48 = vpop.f32.mrf.mxu0  ;;  %v757_v49 = vpop.f32.mrf.mxu1 }
 0x118   : > { %v894_v50 = vadd.f32 %v862_v38, %v830_v43  ;;  %v792_v52 = vmax.f32 %v692_v45, 0.0  ;;  %v808_v53 = vmax.f32 %v756_v46, 0.0  ;;  %v867_v48 = vld [vmem:[%s1415_s7 + $0x68] sm:$0xff] }
 0x119   : > { %v910_v51 = vadd.f32 %v878_v39, %v846_v44  ;;  %v696_v56 = vpop.f32.mrf.mxu0  ;;  %v760_v57 = vpop.f32.mrf.mxu1  ;;  %v883_v49 = vld [vmem:[%s1415_s7 + $0xe8] sm:$0xff] }
 0x11a   : > { %927 = vst.msk [vmem:[%s1431_s8 + $0x40] sm:$0xff] %vm918_vm1, %v894_v50  ;;  %v831_v58 = vmul.f32 %v1419_v47, %v792_v52  ;;  %v847_v59 = vmul.f32 %v1419_v47, %v808_v53  ;;  %v697_v60 = vadd.f32 %v1405_v42, %v696_v56  ;;  %v761_v61 = vadd.f32 %v1405_v42, %v760_v57 }
 0x11b   : > { %943 = vst.msk [vmem:[%s1431_s8 + $0xc0] sm:$0xff] %vm918_vm1, %v910_v51  ;;  %v698_v62 = vpop.f32.mrf.mxu0  ;;  %v762_v63 = vpop.f32.mrf.mxu1 }
 0x11c   : > { %v895_v0 = vadd.f32 %v863_v54, %v831_v58  ;;  %v911_v1 = vadd.f32 %v879_v55, %v847_v59  ;;  %v793_v2 = vmax.f32 %v697_v60, 0.0  ;;  %v809_v3 = vmax.f32 %v761_v61, 0.0  ;;  %v868_v62 = vld [vmem:[%s1415_s7 + $0x70] sm:$0xff] }
 0x11d   : > { %v699_v6 = vpop.f32.mrf.mxu0  ;;  %v763_v7 = vpop.f32.mrf.mxu1  ;;  %v884_v63 = vld [vmem:[%s1415_s7 + $0xf0] sm:$0xff] }
 0x11e   : > { %928 = vst.msk [vmem:[%s1431_s8 + $0x48] sm:$0xff] %vm918_vm1, %v895_v0  ;;  %944 = vst.msk [vmem:[%s1431_s8 + $0xc8] sm:$0xff] %vm918_vm1, %v911_v1  ;;  %v832_v8 = vmul.f32 %v1419_v47, %v793_v2  ;;  %v848_v9 = vmul.f32 %v1419_v47, %v809_v3  ;;  %v700_v10 = vadd.f32 %v1405_v42, %v699_v6 }
 0x11f   : > { %v764_v11 = vadd.f32 %v1405_v42, %v763_v7  ;;  %v701_v12 = vpop.f32.mrf.mxu0  ;;  %v765_v13 = vpop.f32.mrf.mxu1 }
 0x120   : > { %v896_v14 = vadd.f32 %v864_v4, %v832_v8  ;;  %v912_v15 = vadd.f32 %v880_v5, %v848_v9  ;;  %v794_v16 = vmax.f32 %v700_v10, 0.0  ;;  %v869_v12 = vld [vmem:[%s1415_s7 + $0x78] sm:$0xff] }
 0x121   : > { %v810_v17 = vmax.f32 %v764_v11, 0.0  ;;  %v704_v20 = vpop.f32.mrf.mxu0  ;;  %v768_v21 = vpop.f32.mrf.mxu1  ;;  %v885_v13 = vld [vmem:[%s1415_s7 + $0xf8] sm:$0xff] }
 0x122   : > { %929 = vst.msk [vmem:[%s1431_s8 + $0x50] sm:$0xff] %vm918_vm1, %v896_v14  ;;  %945 = vst.msk [vmem:[%s1431_s8 + $0xd0] sm:$0xff] %vm918_vm1, %v912_v15  ;;  %v833_v22 = vmul.f32 %v1419_v47, %v794_v16  ;;  %v705_v24 = vadd.f32 %v1405_v42, %v704_v20  ;;  %v769_v25 = vadd.f32 %v1405_v42, %v768_v21 }
 0x123   : > { %v849_v23 = vmul.f32 %v1419_v47, %v810_v17  ;;  %v706_v26 = vpop.f32.mrf.mxu0  ;;  %v770_v27 = vpop.f32.mrf.mxu1 }
 0x124   : > { %v897_v28 = vadd.f32 %v865_v18, %v833_v22  ;;  %v795_v30 = vmax.f32 %v705_v24, 0.0  ;;  %v811_v31 = vmax.f32 %v769_v25, 0.0 }
 0x125   : > { %v913_v29 = vadd.f32 %v881_v19, %v849_v23  ;;  %v707_v34 = vpop.f32.mrf.mxu0  ;;  %v771_v35 = vpop.f32.mrf.mxu1 }
 0x126   : > { %930 = vst.msk [vmem:[%s1431_s8 + $0x58] sm:$0xff] %vm918_vm1, %v897_v28  ;;  %v834_v36 = vmul.f32 %v1419_v47, %v795_v30  ;;  %v850_v37 = vmul.f32 %v1419_v47, %v811_v31  ;;  %v708_v38 = vadd.f32 %v1405_v42, %v707_v34  ;;  %v772_v39 = vadd.f32 %v1405_v42, %v771_v35 }
 0x127   : > { %946 = vst.msk [vmem:[%s1431_s8 + $0xd8] sm:$0xff] %vm918_vm1, %v913_v29  ;;  %v709_v40 = vpop.f32.mrf.mxu0  ;;  %v773_v41 = vpop.f32.mrf.mxu1 }
 0x128   : > { %v898_v43 = vadd.f32 %v866_v32, %v834_v36  ;;  %v914_v44 = vadd.f32 %v882_v33, %v850_v37  ;;  %v796_v45 = vmax.f32 %v708_v38, 0.0  ;;  %v812_v46 = vmax.f32 %v772_v39, 0.0 }
 0x129   : > { %v712_v50 = vpop.f32.mrf.mxu0  ;;  %v776_v51 = vpop.f32.mrf.mxu1 }
 0x12a   : > { %931 = vst.msk [vmem:[%s1431_s8 + $0x60] sm:$0xff] %vm918_vm1, %v898_v43  ;;  %947 = vst.msk [vmem:[%s1431_s8 + $0xe0] sm:$0xff] %vm918_vm1, %v914_v44  ;;  %v835_v52 = vmul.f32 %v1419_v47, %v796_v45  ;;  %v851_v53 = vmul.f32 %v1419_v47, %v812_v46  ;;  %v713_v54 = vadd.f32 %v1405_v42, %v712_v50 }
 0x12b   : > { %v777_v55 = vadd.f32 %v1405_v42, %v776_v51  ;;  %v714_v56 = vpop.f32.mrf.mxu0  ;;  %v778_v57 = vpop.f32.mrf.mxu1 }
 0x12c   : > { %v899_v58 = vadd.f32 %v867_v48, %v835_v52  ;;  %v915_v59 = vadd.f32 %v883_v49, %v851_v53  ;;  %v797_v60 = vmax.f32 %v713_v54, 0.0 }
 0x12d   : > { %v813_v61 = vmax.f32 %v777_v55, 0.0  ;;  %v715_v0 = vpop.f32.mrf.mxu0  ;;  %v779_v1 = vpop.f32.mrf.mxu1 }
 0x12e   : > { %932 = vst.msk [vmem:[%s1431_s8 + $0x68] sm:$0xff] %vm918_vm1, %v899_v58  ;;  %948 = vst.msk [vmem:[%s1431_s8 + $0xe8] sm:$0xff] %vm918_vm1, %v915_v59  ;;  %v836_v2 = vmul.f32 %v1419_v47, %v797_v60  ;;  %v716_v4 = vadd.f32 %v1405_v42, %v715_v0  ;;  %v780_v5 = vadd.f32 %v1405_v42, %v779_v1 }
 0x12f   : > { %v852_v3 = vmul.f32 %v1419_v47, %v813_v61  ;;  %v717_v6 = vpop.f32.mrf.mxu0  ;;  %v781_v7 = vpop.f32.mrf.mxu1 }
 0x130   : > { %v900_v8 = vadd.f32 %v868_v62, %v836_v2  ;;  %v798_v10 = vmax.f32 %v716_v4, 0.0  ;;  %v814_v11 = vmax.f32 %v780_v5, 0.0 }
 0x131   : > { %v916_v9 = vadd.f32 %v884_v63, %v852_v3 }
 0x132   : > { %933 = vst.msk [vmem:[%s1431_s8 + $0x70] sm:$0xff] %vm918_vm1, %v900_v8  ;;  %v837_v14 = vmul.f32 %v1419_v47, %v798_v10  ;;  %v853_v15 = vmul.f32 %v1419_v47, %v814_v11 }
 0x133   : > { %949 = vst.msk [vmem:[%s1431_s8 + $0xf0] sm:$0xff] %vm918_vm1, %v916_v9 }
 0x134   : > { %v901_v16 = vadd.f32 %v869_v12, %v837_v14  ;;  %v917_v17 = vadd.f32 %v885_v13, %v853_v15 }
 0x136   : > { %934 = vst.msk [vmem:[%s1431_s8 + $0x78] sm:$0xff] %vm918_vm1, %v901_v16  ;;  %950 = vst.msk [vmem:[%s1431_s8 + $0xf8] sm:$0xff] %vm918_vm1, %v917_v17 }
 0x137 PF: > { %s15_s20 = sadd.s32 1, %s1265_s20   ;;  %s1600_s18 = smov %s1261_s19 }
 0x138   : > { %p12_p5 = scmp.ge.s32.totalorder %s15_s20, 4   ;;  %s1601_s19 = smov %s1603_s21 }
 0x13a   :  { %14 = sbr.rel (!%p12_p5) target bundleno = 2 (0x2), region = 76 }

// kernel: pan_forward.19
= control target key start
LH: loop header
LB: loop body
LE: loop exit
PB: predicated region body
PF: predicated region fallthrough
CT: control target
= control target key end

     0   :  { %s868_s12 = smov 0   ;;  %s870_s13 = smov 0   ;;  %s1048_s0 = inlined_call_operand.vmem [shape: bf16[2,256,32], index: 0, kind: input, shape index: {}]   ;;  %s1049_s1 = inlined_call_operand.vmem [shape: bf16[32,11], index: 1, kind: input, shape index: {}]   ;;  %s1050_s2 = inlined_call_operand.vmem [shape: f32[1,11], index: 2, kind: input, shape index: {}]   ;;  %s1051_s3 = inlined_call_operand.vmem [shape: f32[2,256,11], index: 3, kind: output, shape index: {}]  }
   0x1   :  { %s872_s14 = smov 0  }
   0x2 LB: > { %s25_s15 = sadd.s32 1, %s842_s13  ;;  %p680_p0 = scmp.ge.s32.totalorder %s846_s14, 1  ;;  %s846_s14 = sphi %s872_s14, %s13_s14   ;;  %s842_s13 = sphi %s870_s13, %s1053_s13   ;;  %s838_s12 = sphi %s868_s12, %s1052_s12  }
   0x3   : > { %p27_p1 = scmp.ge.s32.totalorder %s25_s15, 2  ;;  %p158_p2 = scmp.lt.s32.totalorder %s846_s14, 3 }
   0x5   : > { %s1055_s15 = smov (%p27_p1, %s25_s15), 0  ;;  %p159_p3 = pnand %p680_p0, %p158_p2 }
   0x6   : > { %p191_p4 = scmp.lt.s32.totalorder (!%p159_p3), %s838_s12, 1 }
   0x7   : > { %162 = sbr.rel (%p159_p3) target bundleno = 247 (0xf7), region = 32 }
   0xc   : > { %v806_v0 = vld [vmem:[%s1049_s1 + $0x8] sm:$0xff]   ;;  %v807_v1 = vld [vmem:[%s1049_s1] sm:$0xff]   ;;  %s1057_s12 = smov (!%p191_p4, %s838_s12), 1  ;;  %vm346_vm0 = vcmask 261120   ;;  %vm556_vm1 = vcmask 89088  }
   0xd   : > { %742 = vmatprep.subr.bf16.mxu0 %v806_v0  ;;  %778 = vmatprep.subr.bf16.mxu1 %v806_v0  ;;  %s722_s20 = sshll.u32 %s1057_s12, 7  ;;  %s723_s24 = sshll.u32 %s1057_s12, 8  ;;  %v936_v18 = vld [vmem:[%s1050_s2] ss:$0 sm:$0xff] }
   0xe   : > { %743 = vmatpush3.bf16.msra.mxu0 %v806_v0  ;;  %780 = vmatpush3.bf16.msra.mxu1 %v806_v0  ;;  %s898_s23 = scalar_lea.vmem %s1048_s0, %s722_s20  ;;  %s941_s29 = scalar_lea.vmem %s1051_s3, %s723_s24 }
   0xf   : > { %744 = vmatprep.subr.bf16.mxu0 %v807_v1  ;;  %779 = vmatprep.subr.bf16.mxu1 %v807_v1  ;;  %v808_v2 = vld [vmem:[%s898_s23] sm:$0xff]   ;;  %v810_v4 = vld [vmem:[%s898_s23 + $0x8] sm:$0xff]   ;;  %v812_v6 = vld [vmem:[%s898_s23 + $0x10] sm:$0xff]  }
  0x10   : > { %v809_v3 = vld [vmem:[%s898_s23 + $0x40] sm:$0xff]   ;;  %746 = vmatprep.mubr.msk.bf16.mxu0 %vm346_vm0, %v808_v2  ;;  %v811_v5 = vld [vmem:[%s898_s23 + $0x48] sm:$0xff]   ;;  %v813_v7 = vld [vmem:[%s898_s23 + $0x50] sm:$0xff]  }
  0x11   : > { %762 = vmatprep.mubr.msk.bf16.mxu1 %vm346_vm0, %v809_v3  ;;  %v814_v8 = vld [vmem:[%s898_s23 + $0x18] sm:$0xff]   ;;  %v816_v10 = vld [vmem:[%s898_s23 + $0x20] sm:$0xff]   ;;  %v818_v12 = vld [vmem:[%s898_s23 + $0x28] sm:$0xff]  }
  0x12   : > { %745 = vmatpush3.bf16.msra.mxu0 %v807_v1  ;;  %781 = vmatpush3.bf16.msra.mxu1 %v807_v1  ;;  %v815_v9 = vld [vmem:[%s898_s23 + $0x58] sm:$0xff]   ;;  %v817_v11 = vld [vmem:[%s898_s23 + $0x60] sm:$0xff]   ;;  %v819_v13 = vld [vmem:[%s898_s23 + $0x68] sm:$0xff]  }
  0x13   : > { %v820_v14 = vld [vmem:[%s898_s23 + $0x30] sm:$0xff]   ;;  %v822_v16 = vld [vmem:[%s898_s23 + $0x38] sm:$0xff]  }
  0x14   : > { %v821_v15 = vld [vmem:[%s898_s23 + $0x70] sm:$0xff]   ;;  %v823_v17 = vld [vmem:[%s898_s23 + $0x78] sm:$0xff]  }
  0x15   : > { %747 = vmatmul.mubr.msk.bf16.vlgmr.msra.gmra.mxu0 %vm346_vm0, %v810_v4  ;;  %763 = vmatmul.mubr.msk.bf16.vlgmr.msra.gmra.mxu1 %vm346_vm0, %v811_v5 }
  0x16   : > { %750 = vmatprep.mubr.msk.bf16.mxu0 %vm346_vm0, %v812_v6  ;;  %766 = vmatprep.mubr.msk.bf16.mxu1 %vm346_vm0, %v813_v7 }
  0x1d   : > { %751 = vmatmul.mubr.msk.bf16.gmra.mxu0 %vm346_vm0, %v814_v8  ;;  %767 = vmatmul.mubr.msk.bf16.gmra.mxu1 %vm346_vm0, %v815_v9 }
  0x1e   : > { %754 = vmatprep.mubr.msk.bf16.mxu0 %vm346_vm0, %v816_v10  ;;  %770 = vmatprep.mubr.msk.bf16.mxu1 %vm346_vm0, %v817_v11 }
  0x25   : > { %755 = vmatmul.mubr.msk.bf16.gmra.mxu0 %vm346_vm0, %v818_v12  ;;  %771 = vmatmul.mubr.msk.bf16.gmra.mxu1 %vm346_vm0, %v819_v13 }
  0x26   : > { %758 = vmatprep.mubr.msk.bf16.mxu0 %vm346_vm0, %v820_v14  ;;  %774 = vmatprep.mubr.msk.bf16.mxu1 %vm346_vm0, %v821_v15 }
  0x2d   : > { %759 = vmatmul.mubr.msk.bf16.gmra.mxu0 %vm346_vm0, %v822_v16  ;;  %775 = vmatmul.mubr.msk.bf16.gmra.mxu1 %vm346_vm0, %v823_v17 }
  0xd5   : > { %v748_v19 = vpop.f32.mrf.mxu0  ;;  %v764_v21 = vpop.f32.mrf.mxu1 }
  0xd6   : > { %v438_v20 = vadd.f32 %v748_v19, %v936_v18  ;;  %v502_v22 = vadd.f32 %v764_v21, %v936_v18 }
  0xd7   : > { %v429_v23 = vpop.f32.mrf.mxu0  ;;  %v493_v25 = vpop.f32.mrf.mxu1 }
  0xd8   : > { %559 = vst.msk [vmem:[%s941_s29 + $0x10] sm:$0xff] %vm556_vm1, %v438_v20  ;;  %v430_v24 = vadd.f32 %v936_v18, %v429_v23  ;;  %575 = vst.msk [vmem:[%s941_s29 + $0x90] sm:$0xff] %vm556_vm1, %v502_v22  ;;  %v494_v26 = vadd.f32 %v936_v18, %v493_v25 }
  0xd9   : > { %v749_v27 = vpop.f32.mrf.mxu0  ;;  %v765_v29 = vpop.f32.mrf.mxu1 }
  0xda   : > { %557 = vst.msk [vmem:[%s941_s29] sm:$0xff] %vm556_vm1, %v430_v24  ;;  %v441_v28 = vadd.f32 %v749_v27, %v936_v18  ;;  %573 = vst.msk [vmem:[%s941_s29 + $0x80] sm:$0xff] %vm556_vm1, %v494_v26  ;;  %v505_v30 = vadd.f32 %v765_v29, %v936_v18 }
  0xdb   : > { %v432_v31 = vpop.f32.mrf.mxu0  ;;  %v496_v33 = vpop.f32.mrf.mxu1 }
  0xdc   : > { %560 = vst.msk [vmem:[%s941_s29 + $0x18] sm:$0xff] %vm556_vm1, %v441_v28  ;;  %v433_v32 = vadd.f32 %v936_v18, %v432_v31  ;;  %576 = vst.msk [vmem:[%s941_s29 + $0x98] sm:$0xff] %vm556_vm1, %v505_v30  ;;  %v497_v34 = vadd.f32 %v936_v18, %v496_v33 }
  0xdd   : > { %v752_v35 = vpop.f32.mrf.mxu0  ;;  %v768_v37 = vpop.f32.mrf.mxu1 }
  0xde   : > { %558 = vst.msk [vmem:[%s941_s29 + $0x8] sm:$0xff] %vm556_vm1, %v433_v32  ;;  %v454_v36 = vadd.f32 %v752_v35, %v936_v18  ;;  %574 = vst.msk [vmem:[%s941_s29 + $0x88] sm:$0xff] %vm556_vm1, %v497_v34  ;;  %v518_v38 = vadd.f32 %v768_v37, %v936_v18 }
  0xdf   : > { %v445_v39 = vpop.f32.mrf.mxu0  ;;  %v509_v41 = vpop.f32.mrf.mxu1 }
  0xe0   : > { %563 = vst.msk [vmem:[%s941_s29 + $0x30] sm:$0xff] %vm556_vm1, %v454_v36  ;;  %v446_v40 = vadd.f32 %v936_v18, %v445_v39  ;;  %579 = vst.msk [vmem:[%s941_s29 + $0xb0] sm:$0xff] %vm556_vm1, %v518_v38  ;;  %v510_v42 = vadd.f32 %v936_v18, %v509_v41 }
  0xe1   : > { %v753_v43 = vpop.f32.mrf.mxu0  ;;  %v769_v45 = vpop.f32.mrf.mxu1 }
  0xe2   : > { %561 = vst.msk [vmem:[%s941_s29 + $0x20] sm:$0xff] %vm556_vm1, %v446_v40  ;;  %v457_v44 = vadd.f32 %v753_v43, %v936_v18  ;;  %577 = vst.msk [vmem:[%s941_s29 + $0xa0] sm:$0xff] %vm556_vm1, %v510_v42  ;;  %v521_v46 = vadd.f32 %v769_v45, %v936_v18 }
  0xe3   : > { %v448_v47 = vpop.f32.mrf.mxu0  ;;  %v512_v49 = vpop.f32.mrf.mxu1 }
  0xe4   : > { %564 = vst.msk [vmem:[%s941_s29 + $0x38] sm:$0xff] %vm556_vm1, %v457_v44  ;;  %v449_v48 = vadd.f32 %v936_v18, %v448_v47  ;;  %580 = vst.msk [vmem:[%s941_s29 + $0xb8] sm:$0xff] %vm556_vm1, %v521_v46  ;;  %v513_v50 = vadd.f32 %v936_v18, %v512_v49 }
  0xe5   : > { %v756_v51 = vpop.f32.mrf.mxu0  ;;  %v772_v53 = vpop.f32.mrf.mxu1 }
  0xe6   : > { %562 = vst.msk [vmem:[%s941_s29 + $0x28] sm:$0xff] %vm556_vm1, %v449_v48  ;;  %v470_v52 = vadd.f32 %v756_v51, %v936_v18  ;;  %578 = vst.msk [vmem:[%s941_s29 + $0xa8] sm:$0xff] %vm556_vm1, %v513_v50  ;;  %v534_v54 = vadd.f32 %v772_v53, %v936_v18 }
  0xe7   : > { %v461_v55 = vpop.f32.mrf.mxu0  ;;  %v525_v57 = vpop.f32.mrf.mxu1 }
  0xe8   : > { %567 = vst.msk [vmem:[%s941_s29 + $0x50] sm:$0xff] %vm556_vm1, %v470_v52  ;;  %v462_v56 = vadd.f32 %v936_v18, %v461_v55  ;;  %583 = vst.msk [vmem:[%s941_s29 + $0xd0] sm:$0xff] %vm556_vm1, %v534_v54  ;;  %v526_v58 = vadd.f32 %v936_v18, %v525_v57 }
  0xe9   : > { %v757_v59 = vpop.f32.mrf.mxu0  ;;  %v773_v61 = vpop.f32.mrf.mxu1 }
  0xea   : > { %565 = vst.msk [vmem:[%s941_s29 + $0x40] sm:$0xff] %vm556_vm1, %v462_v56  ;;  %v473_v60 = vadd.f32 %v757_v59, %v936_v18  ;;  %581 = vst.msk [vmem:[%s941_s29 + $0xc0] sm:$0xff] %vm556_vm1, %v526_v58  ;;  %v537_v62 = vadd.f32 %v773_v61, %v936_v18 }
  0xeb   : > { %v464_v63 = vpop.f32.mrf.mxu0  ;;  %v528_v1 = vpop.f32.mrf.mxu1 }
  0xec   : > { %568 = vst.msk [vmem:[%s941_s29 + $0x58] sm:$0xff] %vm556_vm1, %v473_v60  ;;  %v465_v0 = vadd.f32 %v936_v18, %v464_v63  ;;  %584 = vst.msk [vmem:[%s941_s29 + $0xd8] sm:$0xff] %vm556_vm1, %v537_v62  ;;  %v529_v2 = vadd.f32 %v936_v18, %v528_v1 }
  0xed   : > { %v760_v3 = vpop.f32.mrf.mxu0  ;;  %v776_v5 = vpop.f32.mrf.mxu1 }
  0xee   : > { %566 = vst.msk [vmem:[%s941_s29 + $0x48] sm:$0xff] %vm556_vm1, %v465_v0  ;;  %v486_v4 = vadd.f32 %v760_v3, %v936_v18  ;;  %582 = vst.msk [vmem:[%s941_s29 + $0xc8] sm:$0xff] %vm556_vm1, %v529_v2  ;;  %v550_v6 = vadd.f32 %v776_v5, %v936_v18 }
  0xef   : > { %v477_v7 = vpop.f32.mrf.mxu0  ;;  %v541_v9 = vpop.f32.mrf.mxu1 }
  0xf0   : > { %571 = vst.msk [vmem:[%s941_s29 + $0x70] sm:$0xff] %vm556_vm1, %v486_v4  ;;  %v478_v8 = vadd.f32 %v936_v18, %v477_v7  ;;  %587 = vst.msk [vmem:[%s941_s29 + $0xf0] sm:$0xff] %vm556_vm1, %v550_v6  ;;  %v542_v10 = vadd.f32 %v936_v18, %v541_v9 }
  0xf1   : > { %v761_v11 = vpop.f32.mrf.mxu0  ;;  %v777_v13 = vpop.f32.mrf.mxu1 }
  0xf2   : > { %569 = vst.msk [vmem:[%s941_s29 + $0x60] sm:$0xff] %vm556_vm1, %v478_v8  ;;  %v489_v12 = vadd.f32 %v761_v11, %v936_v18  ;;  %585 = vst.msk [vmem:[%s941_s29 + $0xe0] sm:$0xff] %vm556_vm1, %v542_v10  ;;  %v553_v14 = vadd.f32 %v777_v13, %v936_v18 }
  0xf3   : > { %v480_v15 = vpop.f32.mrf.mxu0  ;;  %v544_v17 = vpop.f32.mrf.mxu1 }
  0xf4   : > { %572 = vst.msk [vmem:[%s941_s29 + $0x78] sm:$0xff] %vm556_vm1, %v489_v12  ;;  %v481_v16 = vadd.f32 %v936_v18, %v480_v15  ;;  %588 = vst.msk [vmem:[%s941_s29 + $0xf8] sm:$0xff] %vm556_vm1, %v553_v14  ;;  %v545_v19 = vadd.f32 %v936_v18, %v544_v17 }
  0xf6   : > { %570 = vst.msk [vmem:[%s941_s29 + $0x68] sm:$0xff] %vm556_vm1, %v481_v16  ;;  %586 = vst.msk [vmem:[%s941_s29 + $0xe8] sm:$0xff] %vm556_vm1, %v545_v19 }
  0xf7 PF: > { %s13_s14 = sadd.s32 1, %s846_s14   ;;  %s1052_s12 = smov %s842_s13 }
  0xf8   : > { %p10_p5 = scmp.ge.s32.totalorder %s13_s14, 4   ;;  %s1053_s13 = smov %s1055_s15 }
  0xfa   :  { %12 = sbr.rel (!%p10_p5) target bundleno = 2 (0x2), region = 62 }

</bundles_post_ra>
